<compile_context>
chip_gen: v6e
topology: v6e:2x2x1
jax: 0.10.0
libtpu: 0.0.40
codegen_flags: <defaults>
</compile_context>

<pallas_src>
import jax
import jax.numpy as jnp
import numpy as np
from jax.experimental import pallas as pl
from jax.experimental.pallas import tpu as pltpu

_K = 5      # kernel size
_PAD = 2    # ReflectionPad2d(2) / ZeroPad2d(2)


def _conv5x5_kernel(x_ref, w_ref, b_ref, o_ref):
    # x_ref: (1, H+4, W+4, Cin)   whole padded image for one batch element (NHWC)
    # w_ref: (25*Cin, Cout_p)     weight, row index = (5*kh + kw)*Cin + ci
    # b_ref: (1, Cout_p)          bias (zero padded to Cout_p)
    # o_ref: (1, th*W, Cout_p)    one row-tile of the flattened spatial output
    wp, cin = x_ref.shape[2], x_ref.shape[3]
    w = wp - 2 * _PAD
    th = o_ref.shape[1] // w                       # output rows in this tile
    rt = pl.program_id(1)
    row0 = rt * th

    # Rows [row0, row0 + th + 4) of the padded image cover this tile + halo.
    xt = x_ref[0, pl.ds(row0, th + 2 * _PAD), :, :]        # (th+4, W+4, Cin)

    # im2col: gather the 25 shifted windows once, fuse them on the contraction
    # axis, and do a single (th*W, 25*Cin) x (25*Cin, Cout_p) MXU matmul.
    pieces = []
    for kh in range(_K):
        for kw in range(_K):
            pieces.append(xt[kh:kh + th, kw:kw + w, :].reshape(th * w, cin))
    cols = jnp.concatenate(pieces, axis=-1)                # (th*W, 25*Cin)

    acc = jnp.dot(cols, w_ref[...], preferred_element_type=jnp.float32)
    acc = acc + b_ref[...]                                 # (1, Cout_p) broadcast
    o_ref[0] = acc.astype(o_ref.dtype)


def _pick_row_tile(h, w):
    """Largest divisor d of h with d*w % 8 == 0 and d*w <= 128; else the
    smallest divisor with d*w % 8 == 0; else h (single tile, full-dim block)."""
    small, best = None, None
    for d in range(1, h + 1):
        if h % d:
            continue
        rows = d * w
        if rows % 8:
            continue
        if small is None:
            small = d
        if rows <= 128:
            best = d
    if best is not None:
        return best
    if small is not None:
        return small
    return h


def conv5x5(x_nchw, weight_oihw, bias, use_refl=True):
    """Matches PyTorch Conv5x5.forward: pad(2) + conv2d(k=5, stride=1, bias)."""
    n, cin, h, w = x_nchw.shape
    cout = weight_oihw.shape[0]

    # ---- glue: layout + padding (reflection or zero) ----
    x_nhwc = jnp.transpose(x_nchw, (0, 2, 3, 1))
    pad_mode = "reflect" if use_refl else "constant"
    xpad = jnp.pad(x_nhwc, ((0, 0), (_PAD, _PAD), (_PAD, _PAD), (0, 0)),
                   mode=pad_mode)
    hp, wp = h + 2 * _PAD, w + 2 * _PAD

    # weight OIHW -> (kh, kw, Cin, Cout) -> (25*Cin, Cout); pad Cout to 128*k
    cout_p = ((cout + 127) // 128) * 128
    w_mat = jnp.transpose(weight_oihw, (2, 3, 1, 0)).reshape(_K * _K * cin, cout)
    w_mat = jnp.pad(w_mat, ((0, 0), (0, cout_p - cout)))
    b_pad = jnp.pad(bias, (0, cout_p - cout)).reshape(1, cout_p)
    # NOTE: casting xpad / w_mat to bf16 here (keeping f32 accumulation in the
    # kernel) would roughly double MXU throughput on v6e/v7x; kept f32 for
    # exact parity with the PyTorch module.

    th = _pick_row_tile(h, w)
    n_rt = h // th

    out_flat = pl.pallas_call(
        _conv5x5_kernel,
        out_shape=jax.ShapeDtypeStruct((n, h * w, cout_p), x_nchw.dtype),
        grid=(n, n_rt),
        in_specs=[
            # Whole padded image per batch element; block index is constant
            # along the row-tile axis, so it is fetched only once per image.
            pl.BlockSpec((1, hp, wp, cin), lambda b, r: (b, 0, 0, 0)),
            pl.BlockSpec((_K * _K * cin, cout_p), lambda b, r: (0, 0)),
            pl.BlockSpec((1, cout_p), lambda b, r: (0, 0)),
        ],
        out_specs=pl.BlockSpec((1, th * w, cout_p), lambda b, r: (b, r, 0)),
        compiler_params=pltpu.CompilerParams(
            dimension_semantics=("parallel", "parallel"),
            vmem_limit_bytes=32 * 1024 * 1024,
        ),
    )(xpad, w_mat, b_pad)
    # TODO(synk): for very large H*W (padded-image block approaching VMEM,
    # esp. v7x's 64 MiB), switch the input to memory_space=pl.ANY + manual
    # halo-row make_async_copy instead of keeping the whole image resident.

    # ---- glue: slice off Cout padding, back to NCHW ----
    out = out_flat[:, :, :cout].reshape(n, h, w, cout)
    return jnp.transpose(out, (0, 3, 1, 2))


def _reference_conv5x5(x_nchw, weight_oihw, bias, use_refl=True):
    pad_mode = "reflect" if use_refl else "constant"
    xpad = jnp.pad(x_nchw, ((0, 0), (0, 0), (_PAD, _PAD), (_PAD, _PAD)),
                   mode=pad_mode)
    out = jax.lax.conv_general_dilated(
        xpad, weight_oihw, window_strides=(1, 1), padding="VALID",
        dimension_numbers=("NCHW", "OIHW", "NCHW"),
        precision=jax.lax.Precision.HIGHEST)
    return out + bias.reshape(1, -1, 1, 1)


if __name__ == "__main__":
    N, CIN, COUT, H, W = 2, 4, 8, 16, 16

    key = jax.random.PRNGKey(0)
    kx, kw_, kb = jax.random.split(key, 3)
    x = jax.random.normal(kx, (N, CIN, H, W), dtype=jnp.float32)
    # deterministic synthetic params (Conv2d weight: (out, in, 5, 5), bias: (out,))
    fan_in = CIN * _K * _K
    bound = 1.0 / np.sqrt(fan_in)
    weight = jax.random.uniform(kw_, (COUT, CIN, _K, _K), dtype=jnp.float32,
                                minval=-bound, maxval=bound)
    bias = jax.random.uniform(kb, (COUT,), dtype=jnp.float32,
                              minval=-bound, maxval=bound)

    out = conv5x5(x, weight, bias, use_refl=True)
    out = jax.block_until_ready(out)

    ref = _reference_conv5x5(x, weight, bias, use_refl=True)
    ref = jax.block_until_ready(ref)

    assert out.shape == (N, COUT, H, W), out.shape
    np.testing.assert_allclose(np.asarray(out), np.asarray(ref),
                               rtol=1e-4, atol=1e-5)
    print("KERNEL_OK")
</pallas_src>

<mosaic_0001>
module attributes {stable_mosaic.version = 11 : i64} {
  func.func @_conv5x5_kernel(%arg0: i32, %arg1: i32, %arg2: memref<1x20x20x4xf32, #tpu.memory_space<vmem>>, %arg3: memref<100x128xf32, #tpu.memory_space<vmem>>, %arg4: memref<1x128xf32, #tpu.memory_space<vmem>>, %arg5: memref<1x128x128xf32, #tpu.memory_space<vmem>>) attributes {dimension_semantics = [#tpu.dimension_semantics<parallel>, #tpu.dimension_semantics<parallel>], iteration_bounds = array<i64: 2, 2>, scalar_prefetch = 0 : i64, scratch_operands = 0 : i64, tpu.core_type = #tpu.core_type<tc>, window_params = [{transform_indices = @transform_0, window_bounds = array<i64: 1, 20, 20, 4>}, {pipeline_mode = #tpu.pipeline_mode<synchronous>, transform_indices = @transform_1, window_bounds = array<i64: 100, 128>}, {pipeline_mode = #tpu.pipeline_mode<synchronous>, transform_indices = @transform_2, window_bounds = array<i64: 1, 128>}, {transform_indices = @transform_3, window_bounds = array<i64: 1, 128, 128>}]} {
    %c8_i32 = arith.constant 8 : i32
    %0 = arith.muli %arg1, %c8_i32 : i32
    %c0 = arith.constant 0 : index
    %1 = arith.index_cast %0 : i32 to index
    %c0_0 = arith.constant 0 : index
    %c0_1 = arith.constant 0 : index
    %2 = vector.load %arg2[%c0, %1, %c0_0, %c0_1] : memref<1x20x20x4xf32, #tpu.memory_space<vmem>>, vector<1x12x20x4xf32>
    %3 = vector.shape_cast %2 : vector<1x12x20x4xf32> to vector<12x20x4xf32>
    %4 = vector.extract_strided_slice %3 {offsets = [0, 0, 0], sizes = [8, 16, 4], strides = [1, 1, 1]} : vector<12x20x4xf32> to vector<8x16x4xf32>
    %5 = vector.shape_cast %4 : vector<8x16x4xf32> to vector<128x4xf32>
    %6 = vector.extract_strided_slice %3 {offsets = [0, 1, 0], sizes = [8, 16, 4], strides = [1, 1, 1]} : vector<12x20x4xf32> to vector<8x16x4xf32>
    %7 = vector.shape_cast %6 : vector<8x16x4xf32> to vector<128x4xf32>
    %8 = vector.extract_strided_slice %3 {offsets = [0, 2, 0], sizes = [8, 16, 4], strides = [1, 1, 1]} : vector<12x20x4xf32> to vector<8x16x4xf32>
    %9 = vector.shape_cast %8 : vector<8x16x4xf32> to vector<128x4xf32>
    %10 = vector.extract_strided_slice %3 {offsets = [0, 3, 0], sizes = [8, 16, 4], strides = [1, 1, 1]} : vector<12x20x4xf32> to vector<8x16x4xf32>
    %11 = vector.shape_cast %10 : vector<8x16x4xf32> to vector<128x4xf32>
    %12 = vector.extract_strided_slice %3 {offsets = [0, 4, 0], sizes = [8, 16, 4], strides = [1, 1, 1]} : vector<12x20x4xf32> to vector<8x16x4xf32>
    %13 = vector.shape_cast %12 : vector<8x16x4xf32> to vector<128x4xf32>
    %14 = vector.extract_strided_slice %3 {offsets = [1, 0, 0], sizes = [8, 16, 4], strides = [1, 1, 1]} : vector<12x20x4xf32> to vector<8x16x4xf32>
    %15 = vector.shape_cast %14 : vector<8x16x4xf32> to vector<128x4xf32>
    %16 = vector.extract_strided_slice %3 {offsets = [1, 1, 0], sizes = [8, 16, 4], strides = [1, 1, 1]} : vector<12x20x4xf32> to vector<8x16x4xf32>
    %17 = vector.shape_cast %16 : vector<8x16x4xf32> to vector<128x4xf32>
    %18 = vector.extract_strided_slice %3 {offsets = [1, 2, 0], sizes = [8, 16, 4], strides = [1, 1, 1]} : vector<12x20x4xf32> to vector<8x16x4xf32>
    %19 = vector.shape_cast %18 : vector<8x16x4xf32> to vector<128x4xf32>
    %20 = vector.extract_strided_slice %3 {offsets = [1, 3, 0], sizes = [8, 16, 4], strides = [1, 1, 1]} : vector<12x20x4xf32> to vector<8x16x4xf32>
    %21 = vector.shape_cast %20 : vector<8x16x4xf32> to vector<128x4xf32>
    %22 = vector.extract_strided_slice %3 {offsets = [1, 4, 0], sizes = [8, 16, 4], strides = [1, 1, 1]} : vector<12x20x4xf32> to vector<8x16x4xf32>
    %23 = vector.shape_cast %22 : vector<8x16x4xf32> to vector<128x4xf32>
    %24 = vector.extract_strided_slice %3 {offsets = [2, 0, 0], sizes = [8, 16, 4], strides = [1, 1, 1]} : vector<12x20x4xf32> to vector<8x16x4xf32>
    %25 = vector.shape_cast %24 : vector<8x16x4xf32> to vector<128x4xf32>
    %26 = vector.extract_strided_slice %3 {offsets = [2, 1, 0], sizes = [8, 16, 4], strides = [1, 1, 1]} : vector<12x20x4xf32> to vector<8x16x4xf32>
    %27 = vector.shape_cast %26 : vector<8x16x4xf32> to vector<128x4xf32>
    %28 = vector.extract_strided_slice %3 {offsets = [2, 2, 0], sizes = [8, 16, 4], strides = [1, 1, 1]} : vector<12x20x4xf32> to vector<8x16x4xf32>
    %29 = vector.shape_cast %28 : vector<8x16x4xf32> to vector<128x4xf32>
    %30 = vector.extract_strided_slice %3 {offsets = [2, 3, 0], sizes = [8, 16, 4], strides = [1, 1, 1]} : vector<12x20x4xf32> to vector<8x16x4xf32>
    %31 = vector.shape_cast %30 : vector<8x16x4xf32> to vector<128x4xf32>
    %32 = vector.extract_strided_slice %3 {offsets = [2, 4, 0], sizes = [8, 16, 4], strides = [1, 1, 1]} : vector<12x20x4xf32> to vector<8x16x4xf32>
    %33 = vector.shape_cast %32 : vector<8x16x4xf32> to vector<128x4xf32>
    %34 = vector.extract_strided_slice %3 {offsets = [3, 0, 0], sizes = [8, 16, 4], strides = [1, 1, 1]} : vector<12x20x4xf32> to vector<8x16x4xf32>
    %35 = vector.shape_cast %34 : vector<8x16x4xf32> to vector<128x4xf32>
    %36 = vector.extract_strided_slice %3 {offsets = [3, 1, 0], sizes = [8, 16, 4], strides = [1, 1, 1]} : vector<12x20x4xf32> to vector<8x16x4xf32>
    %37 = vector.shape_cast %36 : vector<8x16x4xf32> to vector<128x4xf32>
    %38 = vector.extract_strided_slice %3 {offsets = [3, 2, 0], sizes = [8, 16, 4], strides = [1, 1, 1]} : vector<12x20x4xf32> to vector<8x16x4xf32>
    %39 = vector.shape_cast %38 : vector<8x16x4xf32> to vector<128x4xf32>
    %40 = vector.extract_strided_slice %3 {offsets = [3, 3, 0], sizes = [8, 16, 4], strides = [1, 1, 1]} : vector<12x20x4xf32> to vector<8x16x4xf32>
    %41 = vector.shape_cast %40 : vector<8x16x4xf32> to vector<128x4xf32>
    %42 = vector.extract_strided_slice %3 {offsets = [3, 4, 0], sizes = [8, 16, 4], strides = [1, 1, 1]} : vector<12x20x4xf32> to vector<8x16x4xf32>
    %43 = vector.shape_cast %42 : vector<8x16x4xf32> to vector<128x4xf32>
    %44 = vector.extract_strided_slice %3 {offsets = [4, 0, 0], sizes = [8, 16, 4], strides = [1, 1, 1]} : vector<12x20x4xf32> to vector<8x16x4xf32>
    %45 = vector.shape_cast %44 : vector<8x16x4xf32> to vector<128x4xf32>
    %46 = vector.extract_strided_slice %3 {offsets = [4, 1, 0], sizes = [8, 16, 4], strides = [1, 1, 1]} : vector<12x20x4xf32> to vector<8x16x4xf32>
    %47 = vector.shape_cast %46 : vector<8x16x4xf32> to vector<128x4xf32>
    %48 = vector.extract_strided_slice %3 {offsets = [4, 2, 0], sizes = [8, 16, 4], strides = [1, 1, 1]} : vector<12x20x4xf32> to vector<8x16x4xf32>
    %49 = vector.shape_cast %48 : vector<8x16x4xf32> to vector<128x4xf32>
    %50 = vector.extract_strided_slice %3 {offsets = [4, 3, 0], sizes = [8, 16, 4], strides = [1, 1, 1]} : vector<12x20x4xf32> to vector<8x16x4xf32>
    %51 = vector.shape_cast %50 : vector<8x16x4xf32> to vector<128x4xf32>
    %52 = vector.extract_strided_slice %3 {offsets = [4, 4, 0], sizes = [8, 16, 4], strides = [1, 1, 1]} : vector<12x20x4xf32> to vector<8x16x4xf32>
    %53 = vector.shape_cast %52 : vector<8x16x4xf32> to vector<128x4xf32>
    %54 = tpu.concatenate %5, %7, %9, %11, %13, %15, %17, %19, %21, %23, %25, %27, %29, %31, %33, %35 in 1 : vector<128x4xf32>, vector<128x4xf32>, vector<128x4xf32>, vector<128x4xf32>, vector<128x4xf32>, vector<128x4xf32>, vector<128x4xf32>, vector<128x4xf32>, vector<128x4xf32>, vector<128x4xf32>, vector<128x4xf32>, vector<128x4xf32>, vector<128x4xf32>, vector<128x4xf32>, vector<128x4xf32>, vector<128x4xf32> -> vector<128x64xf32>
    %55 = tpu.concatenate %37, %39, %41, %43, %45, %47, %49, %51, %53 in 1 : vector<128x4xf32>, vector<128x4xf32>, vector<128x4xf32>, vector<128x4xf32>, vector<128x4xf32>, vector<128x4xf32>, vector<128x4xf32>, vector<128x4xf32>, vector<128x4xf32> -> vector<128x36xf32>
    %56 = tpu.concatenate %54, %55 in 1 : vector<128x64xf32>, vector<128x36xf32> -> vector<128x100xf32>
    %c0_2 = arith.constant 0 : index
    %c0_3 = arith.constant 0 : index
    %57 = vector.load %arg3[%c0_2, %c0_3] : memref<100x128xf32, #tpu.memory_space<vmem>>, vector<100x128xf32>
    %cst = arith.constant dense<0.000000e+00> : vector<128x128xf32>
    %58 = tpu.matmul %56, %57, %cst {dimension_numbers = #tpu.dot_dimension_numbers<[1], [0], [0], [1], [0, 0, 1, 1], [], []>} : vector<128x100xf32>, vector<100x128xf32>, vector<128x128xf32> -> vector<128x128xf32>
    %c0_4 = arith.constant 0 : index
    %c0_5 = arith.constant 0 : index
    %59 = vector.load %arg4[%c0_4, %c0_5] : memref<1x128xf32, #tpu.memory_space<vmem>>, vector<1x128xf32>
    %60 = vector.broadcast %59 : vector<1x128xf32> to vector<128x128xf32>
    %61 = arith.addf %58, %60 : vector<128x128xf32>
    %c0_6 = arith.constant 0 : index
    %c0_7 = arith.constant 0 : index
    %c0_8 = arith.constant 0 : index
    %62 = vector.load %arg5[%c0_6, %c0_7, %c0_8] : memref<1x128x128xf32, #tpu.memory_space<vmem>>, vector<1x128x128xf32>
    %63 = vector.shape_cast %62 : vector<1x128x128xf32> to vector<128x128xf32>
    %64 = vector.shape_cast %61 : vector<128x128xf32> to vector<1x128x128xf32>
    tpu.vector_store %arg5[%c0_6, %c0_7, %c0_8], %64 {strides = array<i32>} : memref<1x128x128xf32, #tpu.memory_space<vmem>>, vector<1x128x128xf32>,
    return
  }
  func.func @transform_0(%arg0: i32, %arg1: i32) -> (i32, i32, i32, i32) {
    %c0_i32 = arith.constant 0 : i32
    %c0_i32_0 = arith.constant 0 : i32
    %c0_i32_1 = arith.constant 0 : i32
    %c0_i32_2 = arith.constant 0 : i32
    return %arg0, %c0_i32, %c0_i32_0, %c0_i32_1 : i32, i32, i32, i32
  }
  func.func @transform_1(%arg0: i32, %arg1: i32) -> (i32, i32) {
    %c0_i32 = arith.constant 0 : i32
    %c0_i32_0 = arith.constant 0 : i32
    %c0_i32_1 = arith.constant 0 : i32
    return %c0_i32, %c0_i32_0 : i32, i32
  }
  func.func @transform_2(%arg0: i32, %arg1: i32) -> (i32, i32) {
    %c0_i32 = arith.constant 0 : i32
    %c0_i32_0 = arith.constant 0 : i32
    %c0_i32_1 = arith.constant 0 : i32
    return %c0_i32, %c0_i32_0 : i32, i32
  }
  func.func @transform_3(%arg0: i32, %arg1: i32) -> (i32, i32, i32) {
    %c0_i32 = arith.constant 0 : i32
    %c0_i32_0 = arith.constant 0 : i32
    return %arg0, %arg1, %c0_i32 : i32, i32, i32
  }
}

</mosaic_0001>

<bundles_post_ra>
// kernel: tpu_custom_call.1
= control target key start
LH: loop header
LB: loop body
LE: loop exit
PB: predicated region body
PF: predicated region fallthrough
CT: control target
= control target key end

     0   :  { %8 = vsyncpa [#allocation3], 0  ;;  %s5571_s0 = inlined_call_operand.vmem [shape: f32[2,20,20,4], index: 0, kind: input, shape index: {}]   ;;  %s5572_s1 = inlined_call_operand.vmem [shape: f32[100,128], index: 1, kind: input, shape index: {}]   ;;  %s5573_s2 = inlined_call_operand.vmem [shape: f32[1,128], index: 2, kind: input, shape index: {}]   ;;  %s5574_s3 = inlined_call_operand.hbm [shape: f32[2,256,128], index: 3, kind: output, shape index: {}]  }
   0x1   :  { %10 = vsyncpa [#allocation3 + $0x1], 0  ;;  %s2800_s12 = smov 0   ;;  %s2802_s13 = smov 0  }
   0x2   :  { %s2804_s14 = smov 0   ;;  %s2806_s15 = smov 0  }
   0x3   :  { %s2808_s16 = smov 0   ;;  %s2810_s17 = smov 0  }
   0x4   :  { %s2812_s18 = smov 0   ;;  %s2814_s19 = smov 0  }
   0x5 LB: > { %s2414_s20 = sadd.s32 4294967295, %s2760_s19   ;;  %s2415_s21 = sadd.s32 4294967294, %s2760_s19   ;;  %s2760_s19 = sphi %s2814_s19, %s16_s19   ;;  %s2756_s18 = sphi %s2812_s18, %s6250_s18   ;;  %s2752_s17 = sphi %s2810_s17, %s6249_s17   ;;  %s2748_s16 = sphi %s2808_s16, %s6248_s16   ;;  %s2744_s15 = sphi %s2806_s15, %s6247_s15   ;;  %s2740_s14 = sphi %s2804_s14, %s6246_s14   ;;  %s2736_s13 = sphi %s2802_s13, %s6245_s13   ;;  %s2732_s12 = sphi %s2800_s12, %s6244_s12  }
   0x6   : > { %s25_s22 = sadd.s32 1, %s2752_s17  ;;  %s28_s23 = sadd.s32 1, %s2756_s18 }
   0x7   : > { %p26_p0 = scmp.ge.s32.totalorder %s25_s22, 2  ;;  %p115_p1 = scmp.ne.s32.totalorder %s2740_s14, %s2736_s13 }
   0x8   : > { %p116_p2 = scmp.eq.s32.totalorder %s2414_s20, 3  ;;  %p121_p5 = scmp.ne.s32.totalorder %s2736_s13, %s2732_s12 }
   0x9   : > { %s6252_s22 = smov (%p26_p0, %s25_s22), 0  ;;  %s6254_s23 = smov (!%p26_p0, %s28_s23), %s2756_s18 }
   0xa   : > { %s101_s24 = ssub.s32 %s2752_s17, %s6252_s22  ;;  %p2851_p3 = por %p116_p2, %p115_p1 }
   0xb   : > { %p30_p4 = scmp.ge.s32.totalorder %s6254_s23, 2  ;;  %p122_p6 = scmp.eq.s32.totalorder %s2415_s21, 3 }
   0xc   : > { %p2418_p7 = scmp.ge.s32.totalorder %s2760_s19, 1  ;;  %p154_p9 = scmp.lt.s32.totalorder %s2760_s19, 5 }
   0xd   : > { %s6256_s23 = smov (%p30_p4, %s6254_s23), 0  ;;  %p2860_p8 = por %p122_p6, %p121_p5 }
   0xe   : > { %s100_s27 = ssub.s32 %s2756_s18, %s6256_s23  ;;  %s105_s28 = sadd.s32 1, %s2740_s14 }
   0xf   : > { %s102_s29 = sor.u32 %s101_s24, %s100_s27  ;;  %p155_p10 = pnand %p2418_p7, %p154_p9 }
  0x10   : > { %p103_p11 = scmp.eq.s32.totalorder %s102_s29, 0 }
  0x11   : > { %158 = sbr.rel (%p155_p10) target bundleno = 1162 (0x48a), region = 32 }
  0x12   : > { %s2869_s30 = scalar_select %p103_p11, %s2740_s14, %s105_s28  }
  0x16   : > { %p178_p12 = scmp.lt.s32.totalorder %s2748_s16, 1  ;;  %s2422_s5 = smul.u32 192, %s2744_s15  ;;  %vm247_vm0 = vcmask 1046528   ;;  %vm288_vm1 = vcmask 1045504   ;;  %vm329_vm2 = vcmask 1044480   ;;  %vm370_vm3 = vcmask 1043456  }
  0x17   : > { %s2762_s11 = smov 4   ;;  %s2763_s20 = smov 8   ;;  %vm1239_vm4 = vcmask 31744   ;;  %vm1256_vm5 = vcmask 64512   ;;  %vm1273_vm6 = vcmask 97280   ;;  %vm1290_vm7 = vcmask 130048  }
  0x18   : > { %s179_s4 = scalar_select %p178_p12, %s2748_s16, 1  ;;  %vm5679_vm8 = vcmask 162816   ;;  %vm5680_vm9 = vcmask 195584   ;;  %vm1341_vm10 = vcmask 228352   ;;  %vm5677_vm11 = vcmask 261120  }
  0x19   : > { %s2764_s21 = smov 12   ;;  %s2765_s24 = smov 16   ;;  %vm1375_vm12 = vcmask 293888   ;;  %vm5678_vm13 = vcmask 326656   ;;  %vm1409_vm14 = vcmask 359424   ;;  %vm5664_vm15 = vcmask 392192  }
  0x1a   : > { %s2552_s6 = smul.u32 480, %s179_s4  ;;  %s2766_s27 = smov 20  }
  0x1b   : > { %s2767_s28 = smov 24   ;;  %s2768_s29 = smov 28  }
  0x1c   : > { %s182_s9 = scalar_lea.vmem %s5571_s0, %s2552_s6  ;;  %s2769_s4 = smov 32  }
  0x1d   : > { %s2877_s10 = scalar_lea.vmem %s182_s9, %s2422_s5  ;;  %s2770_s5 = smov 36  }
  0x1e   : > { %v2880_v0 = vld [vmem:[%s2877_s10 + $0x18] sm:$0xff]  ;;  %v2883_v1 = vld [vmem:[%s2877_s10 + $0x20] sm:$0xff]  ;;  %v2891_v5 = vld [vmem:[%s2877_s10 + $0x8] sm:$0xff]  ;;  %s2771_s6 = smov 40   ;;  %s2772_s7 = smov 44  }
  0x1f   : > { %v2886_v2 = vld [vmem:[%s2877_s10] sm:$0xff]  ;;  %v253_v3 = vrot.slane %v2880_v0, 1  ;;  %v254_v4 = vrot.slane %v2883_v1, 1  ;;  %v2895_v7 = vld [vmem:[%s2877_s10 + $0x28] sm:$0xf]  ;;  %v249_v8 = vrot.slane %v2891_v5, 1 }
  0x20   : > { %v248_v6 = vrot.slane %v2886_v2, 1  ;;  %v256_v9 = vrot.slane %v2895_v7, 1  ;;  %v2900_v10 = vld [vmem:[%s2877_s10 + $0x10] sm:$0xf]  ;;  %v2903_v11 = vld [vmem:[%s2877_s10 + $0x38] sm:$0xff]  ;;  %v2933_v24 = vld [vmem:[%s2877_s10 + $0x48] sm:$0xff] }
  0x21   : > { %v2906_v12 = vsel %vm247_vm0, %v253_v3, %v254_v4  ;;  %v251_v13 = vrot.slane %v2900_v10, 1  ;;  %v2910_v14 = vld [vmem:[%s2877_s10 + $0x40] sm:$0xf]  ;;  %v2913_v15 = vld [vmem:[%s2877_s10 + $0x30] sm:$0xff]  ;;  %v259_v18 = vrot.slane %v2903_v11, 1  ;;  %v263_v29 = vrot.slane %v2933_v24, 1 }
  0x22   : > { %523 = vrot.lane.b32.xlu1 %v2906_v12, %s2762_s11  ;;  %v250_v16 = vsel %vm247_vm0, %v248_v6, %v249_v8  ;;  %v2920_v17 = vsel %vm247_vm0, %v254_v4, %v256_v9  ;;  %v261_v19 = vrot.slane %v2910_v14, 1  ;;  %v258_v21 = vrot.slane %v2913_v15, 1  ;;  %v2927_v22 = vld [vmem:[%s2877_s10 + $0x50] sm:$0xff]  ;;  %v2930_v23 = vld [vmem:[%s2877_s10 + $0x58] sm:$0xf]  ;;  %v2948_v30 = vld [vmem:[%s2877_s10 + $0x68] sm:$0xff] }
  0x23   : > { %519 = vrot.lane.b32.xlu0 %v250_v16, %s2762_s11  ;;  %v252_v20 = vsel %vm247_vm0, %v249_v8, %v251_v13  ;;  %v264_v26 = vrot.slane %v2927_v22, 1  ;;  %v266_v27 = vrot.slane %v2930_v23, 1  ;;  %v2951_v31 = vld [vmem:[%s2877_s10 + $0x70] sm:$0xf]  ;;  %v2954_v32 = vld [vmem:[%s2877_s10 + $0x60] sm:$0xff]  ;;  %v269_v34 = vrot.slane %v2948_v30, 1 }
  0x24   : > { %v2939_v25 = vsel %vm247_vm0, %v259_v18, %v261_v19  ;;  %v2944_v28 = vsel %vm247_vm0, %v258_v21, %v259_v18  ;;  %v271_v35 = vrot.slane %v2951_v31, 1  ;;  %v268_v37 = vrot.slane %v2954_v32, 1  ;;  %v2970_v38 = vld [vmem:[%s2877_s10 + $0x80] sm:$0xff]  ;;  %v2973_v39 = vld [vmem:[%s2877_s10 + $0x88] sm:$0xf]  ;;  %v2976_v40 = vld [vmem:[%s2877_s10 + $0x78] sm:$0xff] }
  0x25   : > { %v2961_v33 = vsel %vm247_vm0, %v264_v26, %v266_v27  ;;  %v2966_v36 = vsel %vm247_vm0, %v263_v29, %v264_v26  ;;  %v274_v42 = vrot.slane %v2970_v38, 1  ;;  %v276_v43 = vrot.slane %v2973_v39, 1  ;;  %v2992_v46 = vld [vmem:[%s2877_s10 + $0x98] sm:$0xff]  ;;  %v2995_v47 = vld [vmem:[%s2877_s10 + $0xa0] sm:$0xf]  ;;  %v2998_v48 = vld [vmem:[%s2877_s10 + $0x90] sm:$0xff] }
  0x26   : > { %525 = vrot.lane.b32.xlu1 %v2920_v17, %s2762_s11  ;;  %5683 = vst [vmem:[#allocation5_spill] sm:$0xff] %v2961_v33  ;;  %5684 = vst [vmem:[#allocation6_spill] sm:$0xff] %v2966_v36  ;;  %v2983_v41 = vsel %vm247_vm0, %v269_v34, %v271_v35  ;;  %v2988_v44 = vsel %vm247_vm0, %v268_v37, %v269_v34  ;;  %v273_v45 = vrot.slane %v2976_v40, 1  ;;  %v279_v50 = vrot.slane %v2992_v46, 1  ;;  %v3014_v54 = vld [vmem:[%s2877_s10 + $0xb0] sm:$0xff]  ;;  %v3020_v56 = vld [vmem:[%s2877_s10 + $0xa8] sm:$0xff] }
  0x27   : > { %521 = vrot.lane.b32.xlu0 %v252_v20, %s2762_s11  ;;  %5685 = vst [vmem:[#allocation7_spill] sm:$0xff] %v2983_v41  ;;  %5686 = vst [vmem:[#allocation8_spill] sm:$0xff] %v2988_v44  ;;  %v3005_v49 = vsel %vm247_vm0, %v274_v42, %v276_v43  ;;  %v281_v51 = vrot.slane %v2995_v47, 1  ;;  %v278_v53 = vrot.slane %v2998_v48, 1  ;;  %v3017_v55 = vld [vmem:[%s2877_s10 + $0xb8] sm:$0xf] }
  0x28   : > { %5687 = vst [vmem:[#allocation9_spill] sm:$0xff] %v3005_v49  ;;  %v3010_v52 = vsel %vm247_vm0, %v273_v45, %v274_v42  ;;  %v284_v58 = vrot.slane %v3014_v54, 1  ;;  %v286_v59 = vrot.slane %v3017_v55, 1  ;;  %v283_v61 = vrot.slane %v3020_v56, 1  ;;  %s2773_s8 = smov 48   ;;  %s2774_s9 = smov 52  }
  0x29   : > { %5688 = vst [vmem:[#allocation10_spill] sm:$0xff] %v3010_v52  ;;  %v3027_v57 = vsel %vm247_vm0, %v279_v50, %v281_v51  ;;  %v3032_v60 = vsel %vm247_vm0, %v278_v53, %v279_v50  ;;  %v290_v63 = vrot.slane %v2891_v5, 2  ;;  %v292_v3 = vrot.slane %v2900_v10, 2 }
  0x2a   : > { %529 = vrot.lane.b32.xlu1 %v2939_v25, %s2762_s11  ;;  %5689 = vst [vmem:[#allocation11_spill] sm:$0xff] %v3027_v57  ;;  %5690 = vst [vmem:[#allocation12_spill] sm:$0xff] %v3032_v60  ;;  %v3040_v62 = vsel %vm247_vm0, %v284_v58, %v286_v59  ;;  %v3045_v4 = vsel %vm247_vm0, %v283_v61, %v284_v58  ;;  %v289_v6 = vrot.slane %v2886_v2, 2  ;;  %v295_v9 = vrot.slane %v2883_v1, 2 }
  0x2b   : > { %527 = vrot.lane.b32.xlu0 %v2944_v28, %s2762_s11  ;;  %5691 = vst [vmem:[#allocation13_spill] sm:$0xff] %v3040_v62  ;;  %5692 = vst [vmem:[#allocation14_spill] sm:$0xff] %v3045_v4  ;;  %v293_v8 = vsel %vm288_vm1, %v290_v63, %v292_v3  ;;  %v297_v13 = vrot.slane %v2895_v7, 2  ;;  %v294_v18 = vrot.slane %v2880_v0, 2  ;;  %v300_v20 = vrot.slane %v2903_v11, 2 }
  0x2c   : > { %v291_v16 = vsel %vm288_vm1, %v289_v6, %v290_v63  ;;  %v302_v21 = vrot.slane %v2910_v14, 2  ;;  %v299_v27 = vrot.slane %v2913_v15, 2  ;;  %v305_v34 = vrot.slane %v2927_v22, 2 }
  0x2d   : > { %v3060_v19 = vsel %vm288_vm1, %v295_v9, %v297_v13  ;;  %v3065_v26 = vsel %vm288_vm1, %v294_v18, %v295_v9  ;;  %v307_v35 = vrot.slane %v2930_v23, 2  ;;  %v304_v42 = vrot.slane %v2933_v24, 2 }
  0x2e   : > { %533 = vrot.lane.b32.xlu1 %v2961_v33, %s2762_s11  ;;  %v3073_v29 = vsel %vm288_vm1, %v300_v20, %v302_v21  ;;  %v3078_v37 = vsel %vm288_vm1, %v299_v27, %v300_v20  ;;  %v310_v45 = vrot.slane %v2948_v30, 2  ;;  %v312_v50 = vrot.slane %v2951_v31, 2 }
  0x2f   : > { %531 = vrot.lane.b32.xlu0 %v2966_v36, %s2762_s11  ;;  %v3086_v43 = vsel %vm288_vm1, %v305_v34, %v307_v35  ;;  %v3091_v51 = vsel %vm288_vm1, %v304_v42, %v305_v34  ;;  %v309_v53 = vrot.slane %v2954_v32, 2  ;;  %v315_v59 = vrot.slane %v2970_v38, 2 }
  0x30   : > { %v3099_v58 = vsel %vm288_vm1, %v310_v45, %v312_v50  ;;  %v317_v61 = vrot.slane %v2973_v39, 2  ;;  %v314_v3 = vrot.slane %v2976_v40, 2  ;;  %v322_v9 = vrot.slane %v2995_v47, 2 }
  0x31   : > { %5693 = vst [vmem:[#allocation15_spill] sm:$0xff] %v3099_v58  ;;  %v3104_v63 = vsel %vm288_vm1, %v309_v53, %v310_v45  ;;  %v325_v20 = vrot.slane %v3014_v54, 2  ;;  %v327_v21 = vrot.slane %v3017_v55, 2  ;;  %v324_v34 = vrot.slane %v3020_v56, 2 }
  0x32   : > { %537 = vrot.lane.b32.xlu1 %v2983_v41, %s2762_s11  ;;  %v3112_v6 = vsel %vm288_vm1, %v315_v59, %v317_v61  ;;  %v3117_v13 = vsel %vm288_vm1, %v314_v3, %v315_v59  ;;  %v331_v42 = vrot.slane %v2891_v5, 3  ;;  %v333_v45 = vrot.slane %v2900_v10, 3 }
  0x33   : > { %535 = vrot.lane.b32.xlu0 %v2988_v44, %s2762_s11  ;;  %5694 = vst [vmem:[#allocation16_spill] sm:$0xff] %v3112_v6  ;;  %5695 = vst [vmem:[#allocation17_spill] sm:$0xff] %v3117_v13  ;;  %v3138_v35 = vsel %vm288_vm1, %v325_v20, %v327_v21  ;;  %v3143_v50 = vsel %vm288_vm1, %v324_v34, %v325_v20  ;;  %v330_v53 = vrot.slane %v2886_v2, 3  ;;  %v336_v61 = vrot.slane %v2883_v1, 3 }
  0x34   : > { %v334_v59 = vsel %vm329_vm2, %v331_v42, %v333_v45  ;;  %v338_v3 = vrot.slane %v2895_v7, 3  ;;  %v341_v20 = vrot.slane %v2903_v11, 3  ;;  %v343_v21 = vrot.slane %v2910_v14, 3 }
  0x35   : > { %v340_v45 = vrot.slane %v2913_v15, 3 }
  0x36   : > { %541 = vrot.lane.b32.xlu1 %v3005_v49, %s2762_s11 }
  0x37   : > { %539 = vrot.lane.b32.xlu0 %v3010_v52, %s2762_s11 }
  0x3a   : > { %545 = vrot.lane.b32.xlu1 %v3027_v57, %s2762_s11 }
  0x3b   : > { %543 = vrot.lane.b32.xlu0 %v3032_v60, %s2762_s11 }
  0x3e   : > { %549 = vrot.lane.b32.xlu1 %v3040_v62, %s2762_s11 }
  0x3f   : > { %547 = vrot.lane.b32.xlu0 %v3045_v4, %s2762_s11 }
  0x42   : > { %569 = vrot.lane.b32.xlu1 %v293_v8, %s2763_s20  ;;  %v320_v8 = vrot.slane %v2992_v46, 2 }
  0x43   : > { %567 = vrot.lane.b32.xlu0 %v291_v16, %s2763_s20  ;;  %v319_v16 = vrot.slane %v2998_v48, 2 }
  0x44   : > { %v3125_v18 = vsel %vm288_vm1, %v320_v8, %v322_v9  ;;  %v335_v9 = vrot.slane %v2880_v0, 3 }
  0x45   : > { %5696 = vst [vmem:[#allocation18_spill] sm:$0xff] %v3125_v18  ;;  %v3130_v27 = vsel %vm288_vm1, %v319_v16, %v320_v8  ;;  %v332_v8 = vsel %vm329_vm2, %v330_v53, %v331_v42  ;;  %v3158_v16 = vsel %vm329_vm2, %v336_v61, %v338_v3  ;;  %v3171_v42 = vsel %vm329_vm2, %v341_v20, %v343_v21 }
  0x46   : > { %573 = vrot.lane.b32.xlu1 %v3060_v19, %s2763_s20  ;;  %5697 = vst [vmem:[#allocation19_spill] sm:$0xff] %v3130_v27  ;;  %v3163_v34 = vsel %vm329_vm2, %v335_v9, %v336_v61  ;;  %5699 = vst [vmem:[#allocation21_spill] sm:$0xff] %v3171_v42  ;;  %v346_v53 = vrot.slane %v2927_v22, 3  ;;  %v3176_v3 = vsel %vm329_vm2, %v340_v45, %v341_v20  ;;  %v345_v61 = vrot.slane %v2933_v24, 3 }
  0x47   : > { %571 = vrot.lane.b32.xlu0 %v3065_v26, %s2763_s20  ;;  %5698 = vst [vmem:[#allocation20_spill] sm:$0xff] %v3163_v34  ;;  %5700 = vst [vmem:[#allocation22_spill] sm:$0xff] %v3176_v3  ;;  %v351_v9 = vrot.slane %v2948_v30, 3  ;;  %v353_v21 = vrot.slane %v2951_v31, 3  ;;  %v350_v20 = vrot.slane %v2954_v32, 3 }
  0x49   : > { %v3197_v45 = vsel %vm329_vm2, %v351_v9, %v353_v21  ;;  %v361_v21 = vrot.slane %v2992_v46, 3 }
  0x4a   : > { %577 = vrot.lane.b32.xlu1 %v3073_v29, %s2763_s20  ;;  %5703 = vst [vmem:[#allocation25_spill] sm:$0xff] %v3197_v45 }
  0x4b   : > { %575 = vrot.lane.b32.xlu0 %v3078_v37, %s2763_s20 }
  0x4e   : > { %581 = vrot.lane.b32.xlu1 %v3086_v43, %s2763_s20 }
  0x4f   : > { %579 = vrot.lane.b32.xlu0 %v3091_v51, %s2763_s20 }
  0x52   : > { %585 = vrot.lane.b32.xlu1 %v3099_v58, %s2763_s20 }
  0x53   : > { %583 = vrot.lane.b32.xlu0 %v3104_v63, %s2763_s20 }
  0x56   : > { %589 = vrot.lane.b32.xlu1 %v3112_v6, %s2763_s20 }
  0x57   : > { %587 = vrot.lane.b32.xlu0 %v3117_v13, %s2763_s20 }
  0x5a   : > { %593 = vrot.lane.b32.xlu1 %v3125_v18, %s2763_s20 }
  0x5b   : > { %591 = vrot.lane.b32.xlu0 %v3130_v27, %s2763_s20 }
  0x5e   : > { %597 = vrot.lane.b32.xlu1 %v3138_v35, %s2763_s20 }
  0x5f   : > { %595 = vrot.lane.b32.xlu0 %v3143_v50, %s2763_s20 }
  0x62   : > { %617 = vrot.lane.b32.xlu1 %v334_v59, %s2764_s21  ;;  %v348_v59 = vrot.slane %v2930_v23, 3 }
  0x63   : > { %615 = vrot.lane.b32.xlu0 %v332_v8, %s2764_s21 }
  0x64   : > { %v3184_v8 = vsel %vm329_vm2, %v346_v53, %v348_v59  ;;  %v356_v59 = vrot.slane %v2970_v38, 3 }
  0x65   : > { %5701 = vst [vmem:[#allocation23_spill] sm:$0xff] %v3184_v8 }
  0x66   : > { %621 = vrot.lane.b32.xlu1 %v3158_v16, %s2764_s21 }
  0x67   : > { %619 = vrot.lane.b32.xlu0 %v3163_v34, %s2764_s21  ;;  %v3189_v34 = vsel %vm329_vm2, %v345_v61, %v346_v53  ;;  %v355_v53 = vrot.slane %v2976_v40, 3 }
  0x68   : > { %5702 = vst [vmem:[#allocation24_spill] sm:$0xff] %v3189_v34 }
  0x6a   : > { %625 = vrot.lane.b32.xlu1 %v3171_v42, %s2764_s21  ;;  %v3202_v42 = vsel %vm329_vm2, %v350_v20, %v351_v9  ;;  %v360_v9 = vrot.slane %v2998_v48, 3 }
  0x6b   : > { %623 = vrot.lane.b32.xlu0 %v3176_v3, %s2764_s21  ;;  %v358_v3 = vrot.slane %v2973_v39, 3  ;;  %5704 = vst [vmem:[#allocation26_spill] sm:$0xff] %v3202_v42 }
  0x6d   : > { %v3210_v61 = vsel %vm329_vm2, %v356_v59, %v358_v3  ;;  %v366_v3 = vrot.slane %v3014_v54, 3 }
  0x6e   : > { %629 = vrot.lane.b32.xlu1 %v3184_v8, %s2764_s21  ;;  %5705 = vst [vmem:[#allocation27_spill] sm:$0xff] %v3210_v61  ;;  %v3215_v8 = vsel %vm329_vm2, %v355_v53, %v356_v59  ;;  %v365_v59 = vrot.slane %v3020_v56, 3 }
  0x6f   : > { %627 = vrot.lane.b32.xlu0 %v3189_v34, %s2764_s21  ;;  %v363_v34 = vrot.slane %v2995_v47, 3  ;;  %5706 = vst [vmem:[#allocation28_spill] sm:$0xff] %v3215_v8 }
  0x71   : > { %v3223_v20 = vsel %vm329_vm2, %v361_v21, %v363_v34  ;;  %v372_v34 = vrot.slane %v2891_v5, 4  ;;  %v379_v5 = vrot.slane %v2895_v7, 4  ;;  %v381_v7 = vrot.slane %v2913_v15, 4 }
  0x72   : > { %633 = vrot.lane.b32.xlu1 %v3197_v45, %s2764_s21  ;;  %5707 = vst [vmem:[#allocation29_spill] sm:$0xff] %v3223_v20  ;;  %v3228_v45 = vsel %vm329_vm2, %v360_v9, %v361_v21  ;;  %v371_v21 = vrot.slane %v2886_v2, 4 }
  0x73   : > { %631 = vrot.lane.b32.xlu0 %v3202_v42, %s2764_s21  ;;  %v368_v42 = vrot.slane %v3017_v55, 3  ;;  %5708 = vst [vmem:[#allocation30_spill] sm:$0xff] %v3228_v45 }
  0x75   : > { %v3236_v53 = vsel %vm329_vm2, %v366_v3, %v368_v42  ;;  %v377_v42 = vrot.slane %v2883_v1, 4 }
  0x76   : > { %637 = vrot.lane.b32.xlu1 %v3210_v61, %s2764_s21  ;;  %v3241_v61 = vsel %vm329_vm2, %v365_v59, %v366_v3  ;;  %v376_v3 = vrot.slane %v2880_v0, 4  ;;  %v382_v59 = vrot.slane %v2903_v11, 4 }
  0x77   : > { %635 = vrot.lane.b32.xlu0 %v3215_v8, %s2764_s21  ;;  %v374_v8 = vrot.slane %v2900_v10, 4  ;;  %5709 = vst [vmem:[#allocation31_spill] sm:$0xff] %v3241_v61  ;;  %v373_v10 = vsel %vm370_vm3, %v371_v21, %v372_v34  ;;  %v3256_v2 = vsel %vm370_vm3, %v377_v42, %v379_v5  ;;  %v387_v21 = vrot.slane %v2927_v22, 4 }
  0x79   : > { %v375_v9 = vsel %vm370_vm3, %v372_v34, %v374_v8  ;;  %v384_v8 = vrot.slane %v2910_v14, 4  ;;  %v3274_v14 = vsel %vm370_vm3, %v381_v7, %v382_v59  ;;  %v397_v7 = vrot.slane %v2970_v38, 4 }
  0x7a   : > { %641 = vrot.lane.b32.xlu1 %v3223_v20, %s2764_s21  ;;  %5710 = vst [vmem:[#allocation32_spill] sm:$0xff] %v3274_v14 }
  0x7b   : > { %639 = vrot.lane.b32.xlu0 %v3228_v45, %s2764_s21  ;;  %v3269_v34 = vsel %vm370_vm3, %v382_v59, %v384_v8  ;;  %v391_v59 = vrot.slane %v2954_v32, 4 }
  0x7e   : > { %645 = vrot.lane.b32.xlu1 %v3236_v53, %s2764_s21 }
  0x7f   : > { %643 = vrot.lane.b32.xlu0 %v3241_v61, %s2764_s21  ;;  %v3261_v61 = vsel %vm370_vm3, %v376_v3, %v377_v42  ;;  %v386_v42 = vrot.slane %v2933_v24, 4  ;;  %v394_v3 = vrot.slane %v2951_v31, 4 }
  0x82   : > { %665 = vrot.lane.b32.xlu1 %v375_v9, %s2765_s24  ;;  %v389_v9 = vrot.slane %v2930_v23, 4  ;;  %v3287_v23 = vsel %vm370_vm3, %v386_v42, %v387_v21 }
  0x83   : > { %663 = vrot.lane.b32.xlu0 %v373_v10, %s2765_s24  ;;  %v392_v10 = vrot.slane %v2948_v30, 4  ;;  %5712 = vst [vmem:[#allocation34_spill] sm:$0xff] %v3287_v23 }
  0x84   : > { %v3282_v5 = vsel %vm370_vm3, %v387_v21, %v389_v9  ;;  %v399_v9 = vrot.slane %v2973_v39, 4  ;;  %v396_v21 = vrot.slane %v2976_v40, 4 }
  0x85   : > { %5711 = vst [vmem:[#allocation33_spill] sm:$0xff] %v3282_v5  ;;  %v3295_v8 = vsel %vm370_vm3, %v392_v10, %v394_v3  ;;  %v3300_v31 = vsel %vm370_vm3, %v391_v59, %v392_v10  ;;  %v402_v3 = vrot.slane %v2992_v46, 4  ;;  %v401_v10 = vrot.slane %v2998_v48, 4 }
  0x86   : > { %669 = vrot.lane.b32.xlu1 %v3256_v2, %s2765_s24  ;;  %5713 = vst [vmem:[#allocation35_spill] sm:$0xff] %v3300_v31  ;;  %v3308_v42 = vsel %vm370_vm3, %v397_v7, %v399_v9  ;;  %v3315_v39 = vsel %vm370_vm3, %v396_v21, %v397_v7  ;;  %v406_v21 = vrot.slane %v3020_v56, 4 }
  0x87   : > { %667 = vrot.lane.b32.xlu0 %v3261_v61, %s2765_s24  ;;  %5714 = vst [vmem:[#allocation36_spill] sm:$0xff] %v3308_v42  ;;  %5716 = vst [vmem:[#allocation38_spill] sm:$0xff] %v3315_v39  ;;  %v3332_v7 = vsel %vm370_vm3, %v401_v10, %v402_v3 }
  0x88   : > { %5720 = vst [vmem:[#allocation42_spill] sm:$0xff] %v3332_v7 }
  0x8a   : > { %673 = vrot.lane.b32.xlu1 %v3269_v34, %s2765_s24 }
  0x8b   : > { %671 = vrot.lane.b32.xlu0 %v3274_v14, %s2765_s24 }
  0x8e   : > { %677 = vrot.lane.b32.xlu1 %v3282_v5, %s2765_s24 }
  0x8f   : > { %675 = vrot.lane.b32.xlu0 %v3287_v23, %s2765_s24  ;;  %v404_v23 = vrot.slane %v2995_v47, 4  ;;  %v407_v47 = vrot.slane %v3014_v54, 4 }
  0x91   : > { %v3325_v9 = vsel %vm370_vm3, %v402_v3, %v404_v23 }
  0x92   : > { %681 = vrot.lane.b32.xlu1 %v3295_v8, %s2765_s24  ;;  %5718 = vst [vmem:[#allocation40_spill] sm:$0xff] %v3325_v9 }
  0x93   : > { %679 = vrot.lane.b32.xlu0 %v3300_v31, %s2765_s24 }
  0x94   : > { %v3312_v5 = vpop.permute.xlu1 %523 }
  0x95   : > { %5715 = vst [vmem:[#allocation37_spill] sm:$0xff] %v3312_v5  ;;  %v3318_v59 = vpop.permute.xlu0 %519  ;;  %v409_v5 = vrot.slane %v3017_v55, 4  ;;  %v3347_v55 = vsel %vm370_vm3, %v406_v21, %v407_v47 }
  0x96   : > { %5717 = vst [vmem:[#allocation39_spill] sm:$0xff] %v3318_v59  ;;  %685 = vrot.lane.b32.xlu1 %v3308_v42, %s2765_s24 }
  0x97   : > { %683 = vrot.lane.b32.xlu0 %v3315_v39, %s2765_s24  ;;  %v3342_v23 = vsel %vm370_vm3, %v407_v47, %v409_v5 }
  0x98   : > { %v3329_v31 = vpop.permute.xlu1 %525 }
  0x99   : > { %5719 = vst [vmem:[#allocation41_spill] sm:$0xff] %v3329_v31  ;;  %v3335_v59 = vpop.permute.xlu0 %521 }
  0x9a   : > { %5721 = vst [vmem:[#allocation43_spill] sm:$0xff] %v3335_v59  ;;  %689 = vrot.lane.b32.xlu1 %v3325_v9, %s2765_s24 }
  0x9b   : > { %687 = vrot.lane.b32.xlu0 %v3332_v7, %s2765_s24 }
  0x9c   : > { %v3344_v39 = vpop.permute.xlu1 %529 }
  0x9d   : > { %5722 = vst [vmem:[#allocation44_spill] sm:$0xff] %v3344_v39  ;;  %v3349_v3 = vpop.permute.xlu0 %527 }
  0x9e   : > { %5723 = vst [vmem:[#allocation45_spill] sm:$0xff] %v3349_v3  ;;  %693 = vrot.lane.b32.xlu1 %v3342_v23, %s2765_s24 }
  0x9f   : > { %691 = vrot.lane.b32.xlu0 %v3347_v55, %s2765_s24 }
  0xa0   : > { %v3355_v10 = vpop.permute.xlu1 %533 }
  0xa1   : > { %5724 = vst [vmem:[#allocation46_spill] sm:$0xff] %v3355_v10  ;;  %v3357_v31 = vpop.permute.xlu0 %531 }
  0xa2   : > { %5725 = vst [vmem:[#allocation47_spill] sm:$0xff] %v3357_v31  ;;  %713 = vrot.lane.b32.xlu1 %v2883_v1, %s2766_s27 }
  0xa3   : > { %711 = vrot.lane.b32.xlu0 %v2880_v0, %s2766_s27 }
  0xa4   : > { %v3363_v5 = vpop.permute.xlu1 %537 }
  0xa5   : > { %5726 = vst [vmem:[#allocation48_spill] sm:$0xff] %v3363_v5  ;;  %v3365_v47 = vpop.permute.xlu0 %535 }
  0xa6   : > { %5727 = vst [vmem:[#allocation49_spill] sm:$0xff] %v3365_v47  ;;  %717 = vrot.lane.b32.xlu1 %v2903_v11, %s2766_s27 }
  0xa7   : > { %715 = vrot.lane.b32.xlu0 %v2913_v15, %s2766_s27 }
  0xa8   : > { %v3371_v21 = vpop.permute.xlu1 %541 }
  0xa9   : > { %5728 = vst [vmem:[#allocation50_spill] sm:$0xff] %v3371_v21  ;;  %v3373_v3 = vpop.permute.xlu0 %539 }
  0xaa   : > { %5729 = vst [vmem:[#allocation51_spill] sm:$0xff] %v3373_v3  ;;  %721 = vrot.lane.b32.xlu1 %v2927_v22, %s2766_s27 }
  0xab   : > { %719 = vrot.lane.b32.xlu0 %v2933_v24, %s2766_s27 }
  0xac   : > { %v3379_v0 = vpop.permute.xlu1 %545 }
  0xad   : > { %5730 = vst [vmem:[#allocation52_spill] sm:$0xff] %v3379_v0  ;;  %v3381_v1 = vpop.permute.xlu0 %543 }
  0xae   : > { %5731 = vst [vmem:[#allocation53_spill] sm:$0xff] %v3381_v1  ;;  %725 = vrot.lane.b32.xlu1 %v2948_v30, %s2766_s27 }
  0xaf   : > { %723 = vrot.lane.b32.xlu0 %v2954_v32, %s2766_s27 }
  0xb0   : > { %v3387_v21 = vpop.permute.xlu1 %549 }
  0xb1   : > { %5732 = vst [vmem:[#allocation54_spill] sm:$0xff] %v3387_v21  ;;  %v3389_v3 = vpop.permute.xlu0 %547 }
  0xb2   : > { %5733 = vst [vmem:[#allocation55_spill] sm:$0xff] %v3389_v3  ;;  %729 = vrot.lane.b32.xlu1 %v2970_v38, %s2766_s27  ;;  %v3412_v3 = vld [vmem:[%s2877_s10 + $0xc8] sm:$0xff] }
  0xb3   : > { %727 = vrot.lane.b32.xlu0 %v2976_v40, %s2766_s27 }
  0xb4   : > { %v3395_v5 = vpop.permute.xlu1 %569 }
  0xb5   : > { %5734 = vst [vmem:[#allocation56_spill] sm:$0xff] %v3395_v5  ;;  %v3397_v1 = vpop.permute.xlu0 %567 }
  0xb6   : > { %5735 = vst [vmem:[#allocation57_spill] sm:$0xff] %v3397_v1  ;;  %733 = vrot.lane.b32.xlu1 %v2992_v46, %s2766_s27  ;;  %v3417_v1 = vld [vmem:[%s2877_s10 + $0xc0] sm:$0xff] }
  0xb7   : > { %731 = vrot.lane.b32.xlu0 %v2998_v48, %s2766_s27  ;;  %v414_v31 = vrot.slane %v3417_v1, 1 }
  0xb8   : > { %v3403_v59 = vpop.permute.xlu1 %573 }
  0xb9   : > { %5736 = vst [vmem:[#allocation58_spill] sm:$0xff] %v3403_v59  ;;  %v3405_v47 = vpop.permute.xlu0 %571 }
  0xba   : > { %5737 = vst [vmem:[#allocation59_spill] sm:$0xff] %v3405_v47  ;;  %737 = vrot.lane.b32.xlu1 %v3014_v54, %s2766_s27 }
  0xbb   : > { %735 = vrot.lane.b32.xlu0 %v3020_v56, %s2766_s27 }
  0xbc   : > { %v3414_v5 = vpop.permute.xlu1 %577 }
  0xbd   : > { %5738 = vst [vmem:[#allocation60_spill] sm:$0xff] %v3414_v5  ;;  %v3419_v21 = vpop.permute.xlu0 %575 }
  0xbe   : > { %5739 = vst [vmem:[#allocation61_spill] sm:$0xff] %v3419_v21  ;;  %741 = vrot.lane.b32.xlu1 %v3412_v3, %s2766_s27 }
  0xbf   : > { %739 = vrot.lane.b32.xlu0 %v3417_v1, %s2766_s27 }
  0xc0   : > { %v3425_v59 = vpop.permute.xlu1 %581 }
  0xc1   : > { %5740 = vst [vmem:[#allocation62_spill] sm:$0xff] %v3425_v59  ;;  %v3427_v47 = vpop.permute.xlu0 %579 }
  0xc2   : > { %5741 = vst [vmem:[#allocation63_spill] sm:$0xff] %v3427_v47  ;;  %761 = vrot.lane.b32.xlu1 %v2920_v17, %s2767_s28 }
  0xc3   : > { %759 = vrot.lane.b32.xlu0 %v2906_v12, %s2767_s28 }
  0xc4   : > { %v3433_v0 = vpop.permute.xlu1 %585 }
  0xc5   : > { %5742 = vst [vmem:[#allocation64_spill] sm:$0xff] %v3433_v0  ;;  %v3435_v21 = vpop.permute.xlu0 %583 }
  0xc6   : > { %5743 = vst [vmem:[#allocation65_spill] sm:$0xff] %v3435_v21  ;;  %765 = vrot.lane.b32.xlu1 %v2939_v25, %s2767_s28  ;;  %v3468_v21 = vld [vmem:[%s2877_s10 + $0xd0] sm:$0xf] }
  0xc7   : > { %763 = vrot.lane.b32.xlu0 %v2944_v28, %s2767_s28 }
  0xc8   : > { %v3441_v59 = vpop.permute.xlu1 %589 }
  0xc9   : > { %5744 = vst [vmem:[#allocation66_spill] sm:$0xff] %v3441_v59  ;;  %v3443_v47 = vpop.permute.xlu0 %587 }
  0xca   : > { %5745 = vst [vmem:[#allocation67_spill] sm:$0xff] %v3443_v47  ;;  %769 = vrot.lane.b32.xlu1 %v2961_v33, %s2767_s28 }
  0xcb   : > { %767 = vrot.lane.b32.xlu0 %v2966_v36, %s2767_s28 }
  0xcc   : > { %v3449_v12 = vpop.permute.xlu1 %593 }
  0xcd   : > { %5746 = vst [vmem:[#allocation68_spill] sm:$0xff] %v3449_v12  ;;  %v3451_v17 = vpop.permute.xlu0 %591 }
  0xce   : > { %5747 = vst [vmem:[#allocation69_spill] sm:$0xff] %v3451_v17  ;;  %773 = vrot.lane.b32.xlu1 %v2983_v41, %s2767_s28 }
  0xcf   : > { %771 = vrot.lane.b32.xlu0 %v2988_v44, %s2767_s28 }
  0xd0   : > { %v3457_v0 = vpop.permute.xlu1 %597 }
  0xd1   : > { %5748 = vst [vmem:[#allocation70_spill] sm:$0xff] %v3457_v0  ;;  %v3459_v59 = vpop.permute.xlu0 %595  ;;  %v417_v0 = vrot.slane %v3468_v21, 1 }
  0xd2   : > { %5749 = vst [vmem:[#allocation71_spill] sm:$0xff] %v3459_v59  ;;  %777 = vrot.lane.b32.xlu1 %v3005_v49, %s2767_s28  ;;  %v415_v59 = vrot.slane %v3412_v3, 1 }
  0xd3   : > { %775 = vrot.lane.b32.xlu0 %v3010_v52, %s2767_s28 }
  0xd4   : > { %v3465_v47 = vpop.permute.xlu1 %617  ;;  %v3493_v5 = vsel %vm247_vm0, %v414_v31, %v415_v59 }
  0xd5   : > { %5750 = vst [vmem:[#allocation72_spill] sm:$0xff] %v3465_v47  ;;  %v3470_v17 = vpop.permute.xlu0 %615  ;;  %v3488_v47 = vsel %vm247_vm0, %v415_v59, %v417_v0 }
  0xd6   : > { %5751 = vst [vmem:[#allocation73_spill] sm:$0xff] %v3470_v17  ;;  %781 = vrot.lane.b32.xlu1 %v3027_v57, %s2767_s28  ;;  %5754 = vst [vmem:[#allocation76_spill] sm:$0xff] %v3488_v47 }
  0xd7   : > { %779 = vrot.lane.b32.xlu0 %v3032_v60, %s2767_s28 }
  0xd8   : > { %v3478_v12 = vpop.permute.xlu1 %621 }
  0xd9   : > { %5752 = vst [vmem:[#allocation74_spill] sm:$0xff] %v3478_v12  ;;  %v3481_v10 = vpop.permute.xlu0 %619 }
  0xda   : > { %5753 = vst [vmem:[#allocation75_spill] sm:$0xff] %v3481_v10  ;;  %785 = vrot.lane.b32.xlu1 %v3040_v62, %s2767_s28 }
  0xdb   : > { %783 = vrot.lane.b32.xlu0 %v3045_v4, %s2767_s28 }
  0xdc   : > { %v3490_v17 = vpop.permute.xlu1 %625 }
  0xdd   : > { %5755 = vst [vmem:[#allocation77_spill] sm:$0xff] %v3490_v17  ;;  %v3495_v39 = vpop.permute.xlu0 %623 }
  0xde   : > { %5756 = vst [vmem:[#allocation78_spill] sm:$0xff] %v3495_v39  ;;  %789 = vrot.lane.b32.xlu1 %v3488_v47, %s2767_s28 }
  0xdf   : > { %787 = vrot.lane.b32.xlu0 %v3493_v5, %s2767_s28 }
  0xe0   : > { %v3501_v12 = vpop.permute.xlu1 %629 }
  0xe1   : > { %5757 = vst [vmem:[#allocation79_spill] sm:$0xff] %v3501_v12  ;;  %v3503_v10 = vpop.permute.xlu0 %627 }
  0xe2   : > { %5758 = vst [vmem:[#allocation80_spill] sm:$0xff] %v3503_v10  ;;  %809 = vrot.lane.b32.xlu1 %v3060_v19, %s2768_s29 }
  0xe3   : > { %807 = vrot.lane.b32.xlu0 %v3065_v26, %s2768_s29 }
  0xe4   : > { %v3509_v31 = vpop.permute.xlu1 %633 }
  0xe5   : > { %5759 = vst [vmem:[#allocation81_spill] sm:$0xff] %v3509_v31  ;;  %v3511_v59 = vpop.permute.xlu0 %631 }
  0xe6   : > { %5760 = vst [vmem:[#allocation82_spill] sm:$0xff] %v3511_v59  ;;  %813 = vrot.lane.b32.xlu1 %v3073_v29, %s2768_s29 }
  0xe7   : > { %811 = vrot.lane.b32.xlu0 %v3078_v37, %s2768_s29 }
  0xe8   : > { %v3517_v0 = vpop.permute.xlu1 %637 }
  0xe9   : > { %5761 = vst [vmem:[#allocation83_spill] sm:$0xff] %v3517_v0  ;;  %v3519_v39 = vpop.permute.xlu0 %635 }
  0xea   : > { %5762 = vst [vmem:[#allocation84_spill] sm:$0xff] %v3519_v39  ;;  %817 = vrot.lane.b32.xlu1 %v3086_v43, %s2768_s29 }
  0xeb   : > { %815 = vrot.lane.b32.xlu0 %v3091_v51, %s2768_s29 }
  0xec   : > { %v3525_v19 = vpop.permute.xlu1 %641 }
  0xed   : > { %5763 = vst [vmem:[#allocation85_spill] sm:$0xff] %v3525_v19  ;;  %v3527_v26 = vpop.permute.xlu0 %639  ;;  %v419_v19 = vrot.slane %v3417_v1, 2 }
  0xee   : > { %5764 = vst [vmem:[#allocation86_spill] sm:$0xff] %v3527_v26  ;;  %821 = vrot.lane.b32.xlu1 %v3099_v58, %s2768_s29  ;;  %v420_v26 = vrot.slane %v3412_v3, 2 }
  0xef   : > { %819 = vrot.lane.b32.xlu0 %v3104_v63, %s2768_s29 }
  0xf0   : > { %v3533_v31 = vpop.permute.xlu1 %645  ;;  %v3566_v12 = vsel %vm288_vm1, %v419_v19, %v420_v26 }
  0xf1   : > { %5765 = vst [vmem:[#allocation87_spill] sm:$0xff] %v3533_v31  ;;  %v3535_v0 = vpop.permute.xlu0 %643  ;;  %5773 = vst [vmem:[#allocation95_spill] sm:$0xff] %v3566_v12 }
  0xf2   : > { %5766 = vst [vmem:[#allocation88_spill] sm:$0xff] %v3535_v0  ;;  %825 = vrot.lane.b32.xlu1 %v3112_v6, %s2768_s29  ;;  %v422_v0 = vrot.slane %v3468_v21, 2 }
  0xf3   : > { %823 = vrot.lane.b32.xlu0 %v3117_v13, %s2768_s29 }
  0xf4   : > { %v3541_v39 = vpop.permute.xlu1 %665 }
  0xf5   : > { %5767 = vst [vmem:[#allocation89_spill] sm:$0xff] %v3541_v39  ;;  %v3543_v59 = vpop.permute.xlu0 %663  ;;  %v3561_v39 = vsel %vm288_vm1, %v420_v26, %v422_v0  ;;  %v5777_v0 = vld [vmem:[#allocation20_spill] sm:$0xff] }
  0xf6   : > { %5768 = vst [vmem:[#allocation90_spill] sm:$0xff] %v3543_v59  ;;  %829 = vrot.lane.b32.xlu1 %v3125_v18, %s2768_s29  ;;  %5771 = vst [vmem:[#allocation93_spill] sm:$0xff] %v3561_v39 }
  0xf7   : > { %827 = vrot.lane.b32.xlu0 %v3130_v27, %s2768_s29 }
  0xf8   : > { %v3551_v31 = vpop.permute.xlu1 %669 }
  0xf9   : > { %5769 = vst [vmem:[#allocation91_spill] sm:$0xff] %v3551_v31  ;;  %v3554_v10 = vpop.permute.xlu0 %667 }
  0xfa   : > { %5770 = vst [vmem:[#allocation92_spill] sm:$0xff] %v3554_v10  ;;  %833 = vrot.lane.b32.xlu1 %v3138_v35, %s2768_s29 }
  0xfb   : > { %831 = vrot.lane.b32.xlu0 %v3143_v50, %s2768_s29 }
  0xfc   : > { %v3563_v59 = vpop.permute.xlu1 %673 }
  0xfd   : > { %5772 = vst [vmem:[#allocation94_spill] sm:$0xff] %v3563_v59  ;;  %v3568_v17 = vpop.permute.xlu0 %671  ;;  %v5781_v59 = vld [vmem:[#allocation22_spill] sm:$0xff] }
  0xfe   : > { %5774 = vst [vmem:[#allocation96_spill] sm:$0xff] %v3568_v17  ;;  %837 = vrot.lane.b32.xlu1 %v3561_v39, %s2768_s29  ;;  %v5780_v17 = vld [vmem:[#allocation21_spill] sm:$0xff] }
  0xff   : > { %835 = vrot.lane.b32.xlu0 %v3566_v12, %s2768_s29  ;;  %v5784_v12 = vld [vmem:[#allocation23_spill] sm:$0xff] }
 0x100   : > { %v3574_v31 = vpop.permute.xlu1 %677 }
 0x101   : > { %5775 = vst [vmem:[#allocation97_spill] sm:$0xff] %v3574_v31  ;;  %v3576_v10 = vpop.permute.xlu0 %675 }
 0x102   : > { %5776 = vst [vmem:[#allocation98_spill] sm:$0xff] %v3576_v10  ;;  %857 = vrot.lane.b32.xlu1 %v3158_v16, %s2769_s4  ;;  %v5785_v16 = vld [vmem:[#allocation24_spill] sm:$0xff] }
 0x103   : > { %855 = vrot.lane.b32.xlu0 %v5777_v0, %s2769_s4 }
 0x104   : > { %v3582_v19 = vpop.permute.xlu1 %681 }
 0x105   : > { %5778 = vst [vmem:[#allocation20_spill] sm:$0xff] %v3582_v19  ;;  %v3584_v26 = vpop.permute.xlu0 %679 }
 0x106   : > { %5779 = vst [vmem:[#allocation99_spill] sm:$0xff] %v3584_v26  ;;  %861 = vrot.lane.b32.xlu1 %v5780_v17, %s2769_s4  ;;  %v5788_v26 = vld [vmem:[#allocation25_spill] sm:$0xff]  ;;  %v5789_v17 = vld [vmem:[#allocation26_spill] sm:$0xff] }
 0x107   : > { %859 = vrot.lane.b32.xlu0 %v5781_v59, %s2769_s4 }
 0x108   : > { %v3590_v31 = vpop.permute.xlu1 %685 }
 0x109   : > { %5782 = vst [vmem:[#allocation100_spill] sm:$0xff] %v3590_v31  ;;  %v3592_v10 = vpop.permute.xlu0 %683 }
 0x10a   : > { %5783 = vst [vmem:[#allocation101_spill] sm:$0xff] %v3592_v10  ;;  %865 = vrot.lane.b32.xlu1 %v5784_v12, %s2769_s4  ;;  %v5792_v10 = vld [vmem:[#allocation27_spill] sm:$0xff]  ;;  %v5793_v12 = vld [vmem:[#allocation28_spill] sm:$0xff] }
 0x10b   : > { %863 = vrot.lane.b32.xlu0 %v5785_v16, %s2769_s4 }
 0x10c   : > { %v3598_v0 = vpop.permute.xlu1 %689 }
 0x10d   : > { %5786 = vst [vmem:[#allocation102_spill] sm:$0xff] %v3598_v0  ;;  %v3600_v19 = vpop.permute.xlu0 %687 }
 0x10e   : > { %5787 = vst [vmem:[#allocation103_spill] sm:$0xff] %v3600_v19  ;;  %869 = vrot.lane.b32.xlu1 %v5788_v26, %s2769_s4  ;;  %v425_v19 = vrot.slane %v3412_v3, 3 }
 0x10f   : > { %867 = vrot.lane.b32.xlu0 %v5789_v17, %s2769_s4 }
 0x110   : > { %v3606_v59 = vpop.permute.xlu1 %693 }
 0x111   : > { %5790 = vst [vmem:[#allocation104_spill] sm:$0xff] %v3606_v59  ;;  %v3608_v31 = vpop.permute.xlu0 %691 }
 0x112   : > { %5791 = vst [vmem:[#allocation105_spill] sm:$0xff] %v3608_v31  ;;  %873 = vrot.lane.b32.xlu1 %v5792_v10, %s2769_s4  ;;  %v427_v31 = vrot.slane %v3468_v21, 3  ;;  %v424_v10 = vrot.slane %v3417_v1, 3 }
 0x113   : > { %871 = vrot.lane.b32.xlu0 %v5793_v12, %s2769_s4 }
 0x114   : > { %v3614_v16 = vpop.permute.xlu1 %713 }
 0x115   : > { %5794 = vst [vmem:[#allocation106_spill] sm:$0xff] %v3614_v16  ;;  %v3616_v0 = vpop.permute.xlu0 %711  ;;  %v5798_v16 = vld [vmem:[#allocation31_spill] sm:$0xff] }
 0x116   : > { %5795 = vst [vmem:[#allocation107_spill] sm:$0xff] %v3616_v0  ;;  %877 = vrot.lane.b32.xlu1 %v3223_v20, %s2769_s4  ;;  %v3634_v0 = vsel %vm329_vm2, %v425_v19, %v427_v31  ;;  %v3639_v20 = vsel %vm329_vm2, %v424_v10, %v425_v19 }
 0x117   : > { %875 = vrot.lane.b32.xlu0 %v3228_v45, %s2769_s4 }
 0x118   : > { %v3624_v59 = vpop.permute.xlu1 %717 }
 0x119   : > { %5796 = vst [vmem:[#allocation108_spill] sm:$0xff] %v3624_v59  ;;  %v3627_v17 = vpop.permute.xlu0 %715 }
 0x11a   : > { %5797 = vst [vmem:[#allocation109_spill] sm:$0xff] %v3627_v17  ;;  %881 = vrot.lane.b32.xlu1 %v3236_v53, %s2769_s4 }
 0x11b   : > { %879 = vrot.lane.b32.xlu0 %v5798_v16, %s2769_s4 }
 0x11c   : > { %v3636_v45 = vpop.permute.xlu1 %721 }
 0x11d   : > { %v3641_v12 = vpop.permute.xlu0 %719 }
 0x11e   : > { %5799 = vst [vmem:[#allocation31_spill] sm:$0xff] %v3641_v12  ;;  %885 = vrot.lane.b32.xlu1 %v3634_v0, %s2769_s4 }
 0x11f   : > { %883 = vrot.lane.b32.xlu0 %v3639_v20, %s2769_s4 }
 0x120   : > { %v3647_v59 = vpop.permute.xlu1 %725 }
 0x121   : > { %v3649_v17 = vpop.permute.xlu0 %723 }
 0x122   : > { %5800 = vst [vmem:[#allocation110_spill] sm:$0xff] %v3649_v17  ;;  %905 = vrot.lane.b32.xlu1 %v3256_v2, %s2770_s5  ;;  %v5805_v17 = vld [vmem:[#allocation33_spill] sm:$0xff]  ;;  %v5806_v2 = vld [vmem:[#allocation34_spill] sm:$0xff] }
 0x123   : > { %903 = vrot.lane.b32.xlu0 %v3261_v61, %s2770_s5 }
 0x124   : > { %v3655_v10 = vpop.permute.xlu1 %729 }
 0x125   : > { %5801 = vst [vmem:[#allocation111_spill] sm:$0xff] %v3655_v10  ;;  %v3657_v31 = vpop.permute.xlu0 %727 }
 0x126   : > { %5802 = vst [vmem:[#allocation112_spill] sm:$0xff] %v3657_v31  ;;  %909 = vrot.lane.b32.xlu1 %v3269_v34, %s2770_s5  ;;  %v5809_v31 = vld [vmem:[#allocation35_spill] sm:$0xff] }
 0x127   : > { %907 = vrot.lane.b32.xlu0 %v3274_v14, %s2770_s5 }
 0x128   : > { %v3663_v19 = vpop.permute.xlu1 %733 }
 0x129   : > { %5803 = vst [vmem:[#allocation113_spill] sm:$0xff] %v3663_v19  ;;  %v3665_v12 = vpop.permute.xlu0 %731 }
 0x12a   : > { %5804 = vst [vmem:[#allocation114_spill] sm:$0xff] %v3665_v12  ;;  %913 = vrot.lane.b32.xlu1 %v5805_v17, %s2770_s5  ;;  %v5812_v12 = vld [vmem:[#allocation38_spill] sm:$0xff] }
 0x12b   : > { %911 = vrot.lane.b32.xlu0 %v5806_v2, %s2770_s5 }
 0x12c   : > { %v3671_v61 = vpop.permute.xlu1 %737 }
 0x12d   : > { %5807 = vst [vmem:[#allocation33_spill] sm:$0xff] %v3671_v61  ;;  %v3673_v10 = vpop.permute.xlu0 %735 }
 0x12e   : > { %5808 = vst [vmem:[#allocation115_spill] sm:$0xff] %v3673_v10  ;;  %917 = vrot.lane.b32.xlu1 %v3295_v8, %s2770_s5  ;;  %v430_v10 = vrot.slane %v3412_v3, 4 }
 0x12f   : > { %915 = vrot.lane.b32.xlu0 %v5809_v31, %s2770_s5 }
 0x130   : > { %v3679_v14 = vpop.permute.xlu1 %741 }
 0x131   : > { %5810 = vst [vmem:[#allocation116_spill] sm:$0xff] %v3679_v14  ;;  %v3681_v19 = vpop.permute.xlu0 %739 }
 0x132   : > { %5811 = vst [vmem:[#allocation117_spill] sm:$0xff] %v3681_v19  ;;  %921 = vrot.lane.b32.xlu1 %v3308_v42, %s2770_s5  ;;  %v432_v19 = vrot.slane %v3468_v21, 4  ;;  %v429_v42 = vrot.slane %v3417_v1, 4 }
 0x133   : > { %919 = vrot.lane.b32.xlu0 %v5812_v12, %s2770_s5 }
 0x134   : > { %v3687_v2 = vpop.permute.xlu1 %761 }
 0x135   : > { %5813 = vst [vmem:[#allocation38_spill] sm:$0xff] %v3687_v2  ;;  %v3689_v61 = vpop.permute.xlu0 %759  ;;  %v3707_v2 = vsel %vm370_vm3, %v430_v10, %v432_v19 }
 0x136   : > { %5814 = vst [vmem:[#allocation118_spill] sm:$0xff] %v3689_v61  ;;  %925 = vrot.lane.b32.xlu1 %v3325_v9, %s2770_s5  ;;  %5817 = vst [vmem:[#allocation121_spill] sm:$0xff] %v3707_v2  ;;  %v3712_v9 = vsel %vm370_vm3, %v429_v42, %v430_v10 }
 0x137   : > { %923 = vrot.lane.b32.xlu0 %v3332_v7, %s2770_s5  ;;  %5818 = vst [vmem:[#allocation122_spill] sm:$0xff] %v3712_v9 }
 0x138   : > { %v3697_v14 = vpop.permute.xlu1 %765 }
 0x139   : > { %5815 = vst [vmem:[#allocation119_spill] sm:$0xff] %v3697_v14  ;;  %v3700_v31 = vpop.permute.xlu0 %763 }
 0x13a   : > { %5816 = vst [vmem:[#allocation120_spill] sm:$0xff] %v3700_v31  ;;  %929 = vrot.lane.b32.xlu1 %v3342_v23, %s2770_s5 }
 0x13b   : > { %927 = vrot.lane.b32.xlu0 %v3347_v55, %s2770_s5 }
 0x13c   : > { %v3709_v61 = vpop.permute.xlu1 %769 }
 0x13d   : > { %v3714_v21 = vpop.permute.xlu0 %767 }
 0x13e   : > { %5819 = vst [vmem:[#allocation123_spill] sm:$0xff] %v3714_v21  ;;  %933 = vrot.lane.b32.xlu1 %v3707_v2, %s2770_s5  ;;  %v2641_v2 = vld [vmem:[%s2877_s10 + $0x38] sm:$0xff] }
 0x13f   : > { %931 = vrot.lane.b32.xlu0 %v3712_v9, %s2770_s5  ;;  %s2775_s5 = smov 56  }
 0x140   : > { %v3720_v14 = vpop.permute.xlu1 %773 }
 0x141   : > { %v3722_v31 = vpop.permute.xlu0 %771 }
 0x142   : > { %953 = vrot.lane.b32.xlu1 %v2903_v11, %s2771_s6 }
 0x143   : > { %951 = vrot.lane.b32.xlu0 %v2913_v15, %s2771_s6 }
 0x144   : > { %v3728_v42 = vpop.permute.xlu1 %777 }
 0x145   : > { %5820 = vst [vmem:[#allocation124_spill] sm:$0xff] %v3728_v42  ;;  %v3730_v10 = vpop.permute.xlu0 %775 }
 0x146   : > { %5821 = vst [vmem:[#allocation125_spill] sm:$0xff] %v3730_v10  ;;  %957 = vrot.lane.b32.xlu1 %v2927_v22, %s2771_s6 }
 0x147   : > { %955 = vrot.lane.b32.xlu0 %v2933_v24, %s2771_s6 }
 0x148   : > { %v3736_v19 = vpop.permute.xlu1 %781 }
 0x149   : > { %5822 = vst [vmem:[#allocation126_spill] sm:$0xff] %v3736_v19  ;;  %v3738_v21 = vpop.permute.xlu0 %779 }
 0x14a   : > { %5823 = vst [vmem:[#allocation127_spill] sm:$0xff] %v3738_v21  ;;  %961 = vrot.lane.b32.xlu1 %v2948_v30, %s2771_s6 }
 0x14b   : > { %959 = vrot.lane.b32.xlu0 %v2954_v32, %s2771_s6 }
 0x14c   : > { %v3744_v11 = vpop.permute.xlu1 %785 }
 0x14d   : > { %v3746_v15 = vpop.permute.xlu0 %783 }
 0x14e   : > { %5824 = vst [vmem:[#allocation128_spill] sm:$0xff] %v3746_v15  ;;  %965 = vrot.lane.b32.xlu1 %v2970_v38, %s2771_s6  ;;  %v3782_v15 = vld [vmem:[%s2877_s10 + $0xd8] sm:$0xff] }
 0x14f   : > { %963 = vrot.lane.b32.xlu0 %v2976_v40, %s2771_s6  ;;  %v437_v10 = vrot.slane %v3782_v15, 1 }
 0x150   : > { %v3752_v22 = vpop.permute.xlu1 %789 }
 0x151   : > { %v3754_v24 = vpop.permute.xlu0 %787 }
 0x152   : > { %969 = vrot.lane.b32.xlu1 %v2992_v46, %s2771_s6  ;;  %v3777_v46 = vld [vmem:[%s2877_s10 + $0xe0] sm:$0xff] }
 0x153   : > { %967 = vrot.lane.b32.xlu0 %v2998_v48, %s2771_s6  ;;  %5829 = vst [vmem:[#allocation133_spill] sm:$0xff] %v3777_v46  ;;  %v438_v42 = vrot.slane %v3777_v46, 1 }
 0x154   : > { %v3760_v30 = vpop.permute.xlu1 %809 }
 0x155   : > { %5825 = vst [vmem:[#allocation129_spill] sm:$0xff] %v3760_v30  ;;  %v3762_v32 = vpop.permute.xlu0 %807  ;;  %v3833_v30 = vld [vmem:[%s2877_s10 + $0xe8] sm:$0xf] }
 0x156   : > { %5826 = vst [vmem:[#allocation130_spill] sm:$0xff] %v3762_v32  ;;  %973 = vrot.lane.b32.xlu1 %v3014_v54, %s2771_s6  ;;  %5837 = vst [vmem:[#allocation141_spill] sm:$0xff] %v3833_v30  ;;  %v440_v32 = vrot.slane %v3833_v30, 1 }
 0x157   : > { %971 = vrot.lane.b32.xlu0 %v3020_v56, %s2771_s6 }
 0x158   : > { %v3768_v38 = vpop.permute.xlu1 %813 }
 0x159   : > { %5827 = vst [vmem:[#allocation131_spill] sm:$0xff] %v3768_v38  ;;  %v3770_v40 = vpop.permute.xlu0 %811 }
 0x15a   : > { %5828 = vst [vmem:[#allocation132_spill] sm:$0xff] %v3770_v40  ;;  %977 = vrot.lane.b32.xlu1 %v3412_v3, %s2771_s6 }
 0x15b   : > { %975 = vrot.lane.b32.xlu0 %v3417_v1, %s2771_s6 }
 0x15c   : > { %v3779_v48 = vpop.permute.xlu1 %817 }
 0x15d   : > { %v3784_v54 = vpop.permute.xlu0 %815 }
 0x15e   : > { %5830 = vst [vmem:[#allocation134_spill] sm:$0xff] %v3784_v54  ;;  %981 = vrot.lane.b32.xlu1 %v3777_v46, %s2771_s6 }
 0x15f   : > { %979 = vrot.lane.b32.xlu0 %v3782_v15, %s2771_s6 }
 0x160   : > { %v3790_v56 = vpop.permute.xlu1 %821 }
 0x161   : > { %v3792_v38 = vpop.permute.xlu0 %819 }
 0x162   : > { %1001 = vrot.lane.b32.xlu1 %v2939_v25, %s2772_s7 }
 0x163   : > { %999 = vrot.lane.b32.xlu0 %v2944_v28, %s2772_s7 }
 0x164   : > { %v3798_v19 = vpop.permute.xlu1 %825 }
 0x165   : > { %5831 = vst [vmem:[#allocation135_spill] sm:$0xff] %v3798_v19  ;;  %v3800_v54 = vpop.permute.xlu0 %823 }
 0x166   : > { %5832 = vst [vmem:[#allocation136_spill] sm:$0xff] %v3800_v54  ;;  %1005 = vrot.lane.b32.xlu1 %v2961_v33, %s2772_s7 }
 0x167   : > { %1003 = vrot.lane.b32.xlu0 %v2966_v36, %s2772_s7  ;;  %v3858_v36 = vsel %vm247_vm0, %v437_v10, %v438_v42 }
 0x168   : > { %v3806_v40 = vpop.permute.xlu1 %829  ;;  %5842 = vst [vmem:[#allocation146_spill] sm:$0xff] %v3858_v36 }
 0x169   : > { %5833 = vst [vmem:[#allocation137_spill] sm:$0xff] %v3806_v40  ;;  %v3808_v21 = vpop.permute.xlu0 %827 }
 0x16a   : > { %5834 = vst [vmem:[#allocation138_spill] sm:$0xff] %v3808_v21  ;;  %1009 = vrot.lane.b32.xlu1 %v2983_v41, %s2772_s7 }
 0x16b   : > { %1007 = vrot.lane.b32.xlu0 %v2988_v44, %s2772_s7 }
 0x16c   : > { %v3814_v25 = vpop.permute.xlu1 %833 }
 0x16d   : > { %v3816_v28 = vpop.permute.xlu0 %831 }
 0x16e   : > { %5835 = vst [vmem:[#allocation139_spill] sm:$0xff] %v3816_v28  ;;  %1013 = vrot.lane.b32.xlu1 %v3005_v49, %s2772_s7 }
 0x16f   : > { %1011 = vrot.lane.b32.xlu0 %v3010_v52, %s2772_s7 }
 0x170   : > { %v3822_v19 = vpop.permute.xlu1 %837 }
 0x171   : > { %v3824_v40 = vpop.permute.xlu0 %835 }
 0x172   : > { %1017 = vrot.lane.b32.xlu1 %v3027_v57, %s2772_s7  ;;  %v442_v57 = vrot.slane %v3782_v15, 2 }
 0x173   : > { %1015 = vrot.lane.b32.xlu0 %v3032_v60, %s2772_s7 }
 0x174   : > { %v3830_v21 = vpop.permute.xlu1 %857 }
 0x175   : > { %5836 = vst [vmem:[#allocation140_spill] sm:$0xff] %v3830_v21  ;;  %v3835_v28 = vpop.permute.xlu0 %855  ;;  %v3853_v21 = vsel %vm247_vm0, %v438_v42, %v440_v32 }
 0x176   : > { %5838 = vst [vmem:[#allocation142_spill] sm:$0xff] %v3835_v28  ;;  %1021 = vrot.lane.b32.xlu1 %v3040_v62, %s2772_s7  ;;  %5841 = vst [vmem:[#allocation145_spill] sm:$0xff] %v3853_v21 }
 0x177   : > { %1019 = vrot.lane.b32.xlu0 %v3045_v4, %s2772_s7  ;;  %v445_v4 = vrot.slane %v3833_v30, 2 }
 0x178   : > { %v3843_v54 = vpop.permute.xlu1 %861 }
 0x179   : > { %5839 = vst [vmem:[#allocation143_spill] sm:$0xff] %v3843_v54  ;;  %v3846_v33 = vpop.permute.xlu0 %859 }
 0x17a   : > { %5840 = vst [vmem:[#allocation144_spill] sm:$0xff] %v3846_v33  ;;  %1025 = vrot.lane.b32.xlu1 %v3488_v47, %s2772_s7  ;;  %v2642_v47 = vld [vmem:[%s2877_s10 + $0x50] sm:$0xff] }
 0x17b   : > { %1023 = vrot.lane.b32.xlu0 %v3493_v5, %s2772_s7 }
 0x17c   : > { %v3855_v28 = vpop.permute.xlu1 %865 }
 0x17d   : > { %v3860_v62 = vpop.permute.xlu0 %863 }
 0x17e   : > { %5843 = vst [vmem:[#allocation147_spill] sm:$0xff] %v3860_v62  ;;  %1029 = vrot.lane.b32.xlu1 %v3853_v21, %s2772_s7  ;;  %v5858_v21 = vld [vmem:[#allocation22_spill] sm:$0xff] }
 0x17f   : > { %1027 = vrot.lane.b32.xlu0 %v3858_v36, %s2772_s7  ;;  %v5868_v36 = vld [vmem:[#allocation28_spill] sm:$0xff] }
 0x180   : > { %v3866_v54 = vpop.permute.xlu1 %869 }
 0x181   : > { %v3868_v33 = vpop.permute.xlu0 %867 }
 0x182   : > { %1049 = vrot.lane.b32.xlu1 %v3073_v29, %s2773_s8 }
 0x183   : > { %1047 = vrot.lane.b32.xlu0 %v3078_v37, %s2773_s8 }
 0x184   : > { %v3874_v42 = vpop.permute.xlu1 %873 }
 0x185   : > { %5844 = vst [vmem:[#allocation148_spill] sm:$0xff] %v3874_v42  ;;  %v3876_v10 = vpop.permute.xlu0 %871 }
 0x186   : > { %5845 = vst [vmem:[#allocation149_spill] sm:$0xff] %v3876_v10  ;;  %1053 = vrot.lane.b32.xlu1 %v3086_v43, %s2773_s8 }
 0x187   : > { %1051 = vrot.lane.b32.xlu0 %v3091_v51, %s2773_s8 }
 0x188   : > { %v3882_v32 = vpop.permute.xlu1 %877 }
 0x189   : > { %5846 = vst [vmem:[#allocation150_spill] sm:$0xff] %v3882_v32  ;;  %v3884_v62 = vpop.permute.xlu0 %875 }
 0x18a   : > { %5847 = vst [vmem:[#allocation151_spill] sm:$0xff] %v3884_v62  ;;  %1057 = vrot.lane.b32.xlu1 %v3099_v58, %s2773_s8  ;;  %v5876_v58 = vld [vmem:[#allocation77_spill] sm:$0xff] }
 0x18b   : > { %1055 = vrot.lane.b32.xlu0 %v3104_v63, %s2773_s8 }
 0x18c   : > { %v3890_v29 = vpop.permute.xlu1 %881 }
 0x18d   : > { %v3892_v37 = vpop.permute.xlu0 %879 }
 0x18e   : > { %5848 = vst [vmem:[#allocation152_spill] sm:$0xff] %v3892_v37  ;;  %1061 = vrot.lane.b32.xlu1 %v3112_v6, %s2773_s8  ;;  %v443_v37 = vrot.slane %v3777_v46, 2  ;;  %v5862_v6 = vld [vmem:[#allocation24_spill] sm:$0xff] }
 0x18f   : > { %1059 = vrot.lane.b32.xlu0 %v3117_v13, %s2773_s8  ;;  %v5869_v13 = vld [vmem:[#allocation29_spill] sm:$0xff] }
 0x190   : > { %v3898_v42 = vpop.permute.xlu1 %885 }
 0x191   : > { %v3900_v32 = vpop.permute.xlu0 %883 }
 0x192   : > { %1065 = vrot.lane.b32.xlu1 %v3125_v18, %s2773_s8 }
 0x193   : > { %1063 = vrot.lane.b32.xlu0 %v3130_v27, %s2773_s8  ;;  %v3931_v27 = vsel %vm288_vm1, %v442_v57, %v443_v37 }
 0x194   : > { %v3906_v62 = vpop.permute.xlu1 %905  ;;  %5855 = vst [vmem:[#allocation157_spill] sm:$0xff] %v3931_v27 }
 0x195   : > { %5849 = vst [vmem:[#allocation153_spill] sm:$0xff] %v3906_v62  ;;  %v3908_v10 = vpop.permute.xlu0 %903  ;;  %v5853_v62 = vld [vmem:[#allocation95_spill] sm:$0xff] }
 0x196   : > { %5850 = vst [vmem:[#allocation154_spill] sm:$0xff] %v3908_v10  ;;  %1069 = vrot.lane.b32.xlu1 %v3138_v35, %s2773_s8  ;;  %v3926_v10 = vsel %vm288_vm1, %v443_v37, %v445_v4  ;;  %v5857_v4 = vld [vmem:[#allocation21_spill] sm:$0xff] }
 0x197   : > { %1067 = vrot.lane.b32.xlu0 %v3143_v50, %s2773_s8  ;;  %5854 = vst [vmem:[#allocation95_spill] sm:$0xff] %v3926_v10 }
 0x198   : > { %v3916_v7 = vpop.permute.xlu1 %909 }
 0x199   : > { %5851 = vst [vmem:[#allocation155_spill] sm:$0xff] %v3916_v7  ;;  %v3919_v18 = vpop.permute.xlu0 %907 }
 0x19a   : > { %5852 = vst [vmem:[#allocation156_spill] sm:$0xff] %v3919_v18  ;;  %1073 = vrot.lane.b32.xlu1 %v3561_v39, %s2773_s8 }
 0x19b   : > { %1071 = vrot.lane.b32.xlu0 %v5853_v62, %s2773_s8 }
 0x19c   : > { %v3928_v60 = vpop.permute.xlu1 %913 }
 0x19d   : > { %v3933_v49 = vpop.permute.xlu0 %911 }
 0x19e   : > { %5856 = vst [vmem:[#allocation158_spill] sm:$0xff] %v3933_v49  ;;  %1077 = vrot.lane.b32.xlu1 %v3926_v10, %s2773_s8  ;;  %v5861_v49 = vld [vmem:[#allocation23_spill] sm:$0xff] }
 0x19f   : > { %1075 = vrot.lane.b32.xlu0 %v3931_v27, %s2773_s8  ;;  %v5870_v27 = vld [vmem:[#allocation30_spill] sm:$0xff] }
 0x1a0   : > { %v3939_v7 = vpop.permute.xlu1 %917 }
 0x1a1   : > { %v3941_v18 = vpop.permute.xlu0 %915 }
 0x1a2   : > { %1097 = vrot.lane.b32.xlu1 %v5857_v4, %s2774_s9 }
 0x1a3   : > { %1095 = vrot.lane.b32.xlu0 %v5858_v21, %s2774_s9  ;;  %v5865_v21 = vld [vmem:[#allocation26_spill] sm:$0xff] }
 0x1a4   : > { %v3947_v57 = vpop.permute.xlu1 %921 }
 0x1a5   : > { %5859 = vst [vmem:[#allocation21_spill] sm:$0xff] %v3947_v57  ;;  %v3949_v37 = vpop.permute.xlu0 %919 }
 0x1a6   : > { %5860 = vst [vmem:[#allocation22_spill] sm:$0xff] %v3949_v37  ;;  %1101 = vrot.lane.b32.xlu1 %v5861_v49, %s2774_s9  ;;  %v5867_v37 = vld [vmem:[#allocation27_spill] sm:$0xff] }
 0x1a7   : > { %1099 = vrot.lane.b32.xlu0 %v5862_v6, %s2774_s9 }
 0x1a8   : > { %v3955_v10 = vpop.permute.xlu1 %925 }
 0x1a9   : > { %5863 = vst [vmem:[#allocation23_spill] sm:$0xff] %v3955_v10  ;;  %v3957_v52 = vpop.permute.xlu0 %923 }
 0x1aa   : > { %5864 = vst [vmem:[#allocation24_spill] sm:$0xff] %v3957_v52  ;;  %1105 = vrot.lane.b32.xlu1 %v5788_v26, %s2774_s9 }
 0x1ab   : > { %1103 = vrot.lane.b32.xlu0 %v5865_v21, %s2774_s9 }
 0x1ac   : > { %v3963_v4 = vpop.permute.xlu1 %929 }
 0x1ad   : > { %v3965_v57 = vpop.permute.xlu0 %927 }
 0x1ae   : > { %5866 = vst [vmem:[#allocation159_spill] sm:$0xff] %v3965_v57  ;;  %1109 = vrot.lane.b32.xlu1 %v5867_v37, %s2774_s9  ;;  %v5871_v57 = vld [vmem:[#allocation44_spill] sm:$0xff] }
 0x1af   : > { %1107 = vrot.lane.b32.xlu0 %v5868_v36, %s2774_s9  ;;  %v1245_v9 = vsel %vm1239_vm4, %v2641_v2, %v5871_v57  ;;  %v5873_v36 = vld [vmem:[#allocation60_spill] sm:$0xff]  ;;  %v3996_v2 = vld [vmem:[%s2877_s10 + $0x48] sm:$0xff]  ;;  %v5878_v57 = vld [vmem:[#allocation47_spill] sm:$0xff] }
 0x1b0   : > { %v3971_v10 = vpop.permute.xlu1 %933  ;;  %v1262_v26 = vsel %vm1256_vm5, %v1245_v9, %v5873_v36  ;;  %v1246_v36 = vsel %vm1239_vm4, %v3996_v2, %v5878_v57  ;;  %v5879_v9 = vld [vmem:[#allocation94_spill] sm:$0xff]  ;;  %v447_v57 = vrot.slane %v3782_v15, 3 }
 0x1b1   : > { %v3973_v52 = vpop.permute.xlu0 %931 }
 0x1b2   : > { %1113 = vrot.lane.b32.xlu1 %v5869_v13, %s2774_s9  ;;  %v5875_v13 = vld [vmem:[#allocation46_spill] sm:$0xff] }
 0x1b3   : > { %1111 = vrot.lane.b32.xlu0 %v5870_v27, %s2774_s9  ;;  %v1247_v21 = vsel %vm1239_vm4, %v2642_v47, %v5875_v13  ;;  %v1279_v27 = vsel %vm1273_vm6, %v1262_v26, %v5876_v58  ;;  %5877 = vst [vmem:[#allocation46_spill] sm:$0xff] %v3996_v2  ;;  %v448_v13 = vrot.slane %v3777_v46, 3  ;;  %v450_v58 = vrot.slane %v3833_v30, 3  ;;  %v5880_v47 = vld [vmem:[#allocation62_spill] sm:$0xff]  ;;  %v5882_v2 = vld [vmem:[#allocation63_spill] sm:$0xff] }
 0x1b4   : > { %v3982_v37 = vpop.permute.xlu1 %953  ;;  %v1264_v26 = vsel %vm1256_vm5, %v1247_v21, %v5880_v47  ;;  %v5885_v21 = vld [vmem:[#allocation80_spill] sm:$0xff] }
 0x1b5   : > { %5872 = vst [vmem:[#allocation44_spill] sm:$0xff] %v3982_v37  ;;  %v3986_v41 = vpop.permute.xlu0 %951  ;;  %v1296_v37 = vsel %vm1290_vm7, %v1279_v27, %v5879_v9  ;;  %v1263_v27 = vsel %vm1256_vm5, %v1246_v36, %v5882_v2  ;;  %v5883_v9 = vld [vmem:[#allocation79_spill] sm:$0xff]  ;;  %v5887_v2 = vld [vmem:[#allocation98_spill] sm:$0xff] }
 0x1b6   : > { %5874 = vst [vmem:[#allocation60_spill] sm:$0xff] %v3986_v41  ;;  %1117 = vrot.lane.b32.xlu1 %v3236_v53, %s2774_s9  ;;  %v1313_v41 = vsel %vm5679_vm8, %v1296_v37, %v3636_v45  ;;  %v1281_v44 = vsel %vm1273_vm6, %v1264_v26, %v5883_v9  ;;  %v1280_v45 = vsel %vm1273_vm6, %v1263_v27, %v5885_v21  ;;  %v5886_v37 = vld [vmem:[#allocation97_spill] sm:$0xff]  ;;  %v5888_v27 = vld [vmem:[#allocation110_spill] sm:$0xff] }
 0x1b7   : > { %1115 = vrot.lane.b32.xlu0 %v5798_v16, %s2774_s9  ;;  %v1330_v30 = vsel %vm5680_vm9, %v1313_v41, %v3709_v61  ;;  %v1298_v47 = vsel %vm1290_vm7, %v1281_v44, %v5886_v37  ;;  %v1297_v36 = vsel %vm1290_vm7, %v1280_v45, %v5887_v2  ;;  %v4037_v61 = vsel %vm329_vm2, %v448_v13, %v450_v58  ;;  %v5891_v37 = vld [vmem:[#allocation52_spill] sm:$0xff] }
 0x1b8   : > { %v4011_v39 = vpop.permute.xlu1 %957  ;;  %v1315_v44 = vsel %vm5679_vm8, %v1298_v47, %v3647_v59  ;;  %v4044_v26 = vsel %vm329_vm2, %v447_v57, %v448_v13  ;;  %v5893_v2 = vld [vmem:[#allocation68_spill] sm:$0xff] }
 0x1b9   : > { %5881 = vst [vmem:[#allocation77_spill] sm:$0xff] %v4011_v39  ;;  %v4020_v46 = vpop.permute.xlu0 %955  ;;  %v1347_v39 = vsel %vm1341_vm10, %v1330_v30, %v3779_v48 }
 0x1ba   : > { %5884 = vst [vmem:[#allocation47_spill] sm:$0xff] %v4020_v46  ;;  %1121 = vrot.lane.b32.xlu1 %v3634_v0, %s2774_s9  ;;  %v1364_v41 = vsel %vm5677_vm11, %v1347_v39, %v3855_v28  ;;  %v1314_v39 = vsel %vm5679_vm8, %v1297_v36, %v5888_v27  ;;  %v1332_v28 = vsel %vm5680_vm9, %v1315_v44, %v3720_v14  ;;  %v5895_v44 = vld [vmem:[#allocation85_spill] sm:$0xff]  ;;  %v5897_v27 = vld [vmem:[#allocation34_spill] sm:$0xff] }
 0x1bb   : > { %1119 = vrot.lane.b32.xlu0 %v3639_v20, %s2774_s9  ;;  %v1381_v30 = vsel %vm1375_vm12, %v1364_v41, %v3928_v60  ;;  %v1331_v59 = vsel %vm5680_vm9, %v1314_v39, %v3722_v31  ;;  %v1349_v60 = vsel %vm1341_vm10, %v1332_v28, %v3790_v56  ;;  %v4104_v39 = vld [vmem:[%s2877_s10 + $0xb0] sm:$0xff]  ;;  %v5898_v28 = vld [vmem:[#allocation54_spill] sm:$0xff] }
 0x1bc   : > { %v962_v48 = vpop.permute.xlu1 %961  ;;  %v1348_v13 = vsel %vm1341_vm10, %v1331_v59, %v3792_v38  ;;  %v1366_v14 = vsel %vm5677_vm11, %v1349_v60, %v3866_v54  ;;  %v1255_v59 = vsel %vm1239_vm4, %v4104_v39, %v5898_v28  ;;  %v5899_v60 = vld [vmem:[#allocation33_spill] sm:$0xff]  ;;  %v5907_v28 = vld [vmem:[#allocation104_spill] sm:$0xff] }
 0x1bd   : > { %v4051_v58 = vsel %vm5678_vm13, %v1381_v30, %v962_v48  ;;  %v4053_v9 = vpop.permute.xlu0 %959  ;;  %v1365_v57 = vsel %vm5677_vm11, %v1348_v13, %v3868_v33  ;;  %v1383_v31 = vsel %vm1375_vm12, %v1366_v14, %v3939_v7  ;;  %v5890_v33 = vld [vmem:[#allocation32_spill] sm:$0xff] }
 0x1be   : > { %5889 = vst [vmem:[#allocation94_spill] sm:$0xff] %v4053_v9  ;;  %1125 = vrot.lane.b32.xlu1 %v4037_v61, %s2774_s9  ;;  %v1382_v56 = vsel %vm1375_vm12, %v1365_v57, %v3941_v18  ;;  %v4084_v7 = vld [vmem:[%s2877_s10 + $0x98] sm:$0xff]  ;;  %v4114_v57 = vld [vmem:[%s2877_s10 + $0xa8] sm:$0xff] }
 0x1bf   : > { %1123 = vrot.lane.b32.xlu0 %v4044_v26, %s2774_s9  ;;  %v1253_v18 = vsel %vm1239_vm4, %v4084_v7, %v5891_v37 }
 0x1c0   : > { %v966_v21 = vpop.permute.xlu1 %965  ;;  %v1270_v36 = vsel %vm1256_vm5, %v1253_v18, %v5893_v2  ;;  %v5904_v18 = vld [vmem:[#allocation71_spill] sm:$0xff] }
 0x1c1   : > { %v4074_v45 = vsel %vm5678_vm13, %v1383_v31, %v966_v21  ;;  %v964_v38 = vpop.permute.xlu0 %963  ;;  %v1287_v30 = vsel %vm1273_vm6, %v1270_v36, %v5895_v44  ;;  %v5901_v31 = vld [vmem:[#allocation55_spill] sm:$0xff] }
 0x1c2   : > { %v4077_v54 = vsel %vm5678_vm13, %v1382_v56, %v964_v38  ;;  %1145 = vrot.lane.b32.xlu1 %v3269_v34, %s2775_s5  ;;  %v5896_v34 = vld [vmem:[#allocation102_spill] sm:$0xff]  ;;  %v1254_v21 = vsel %vm1239_vm4, %v4114_v57, %v5901_v31  ;;  %v5905_v36 = vld [vmem:[#allocation87_spill] sm:$0xff] }
 0x1c3   : > { %1143 = vrot.lane.b32.xlu0 %v5890_v33, %s2775_s5  ;;  %v1304_v48 = vsel %vm1290_vm7, %v1287_v30, %v5896_v34  ;;  %v5902_v56 = vld [vmem:[#allocation70_spill] sm:$0xff]  ;;  %v1271_v2 = vsel %vm1256_vm5, %v1254_v21, %v5904_v18  ;;  %v5906_v34 = vld [vmem:[#allocation88_spill] sm:$0xff] }
 0x1c4   : > { %v4089_v47 = vpop.permute.xlu1 %969  ;;  %v1321_v13 = vsel %vm5679_vm8, %v1304_v48, %v5899_v60  ;;  %v1272_v38 = vsel %vm1256_vm5, %v1255_v59, %v5902_v56  ;;  %v1288_v48 = vsel %vm1273_vm6, %v1271_v2, %v5906_v34  ;;  %v5908_v60 = vld [vmem:[#allocation35_spill] sm:$0xff]  ;;  %v5910_v21 = vld [vmem:[#allocation116_spill] sm:$0xff] }
 0x1c5   : > { %5892 = vst [vmem:[#allocation62_spill] sm:$0xff] %v4089_v47  ;;  %v4093_v41 = vpop.permute.xlu0 %967  ;;  %v1338_v33 = vsel %vm5680_vm9, %v1321_v13, %v3744_v11  ;;  %v1289_v44 = vsel %vm1273_vm6, %v1272_v38, %v5905_v36  ;;  %v5909_v13 = vld [vmem:[#allocation105_spill] sm:$0xff]  ;;  %v5913_v34 = vld [vmem:[#allocation36_spill] sm:$0xff] }
 0x1c6   : > { %5894 = vst [vmem:[#allocation63_spill] sm:$0xff] %v4093_v41  ;;  %1149 = vrot.lane.b32.xlu1 %v5805_v17, %s2775_s5  ;;  %v1355_v30 = vsel %vm1341_vm10, %v1338_v33, %v3814_v25  ;;  %v1306_v11 = vsel %vm1290_vm7, %v1289_v44, %v5907_v28  ;;  %v1305_v31 = vsel %vm1290_vm7, %v1288_v48, %v5909_v13  ;;  %v5911_v33 = vld [vmem:[#allocation117_spill] sm:$0xff] }
 0x1c7   : > { %1147 = vrot.lane.b32.xlu0 %v5897_v27, %s2775_s5  ;;  %v1372_v59 = vsel %vm5677_vm11, %v1355_v30, %v3890_v29  ;;  %v1323_v25 = vsel %vm5679_vm8, %v1306_v11, %v5910_v21  ;;  %v1322_v18 = vsel %vm5679_vm8, %v1305_v31, %v5911_v33 }
 0x1c8   : > { %v4111_v14 = vpop.permute.xlu1 %973  ;;  %v1389_v56 = vsel %vm1375_vm12, %v1372_v59, %v3963_v4  ;;  %v1340_v2 = vsel %vm5680_vm9, %v1323_v25, %v3752_v22  ;;  %v1339_v44 = vsel %vm5680_vm9, %v1322_v18, %v3754_v24 }
 0x1c9   : > { %5900 = vst [vmem:[#allocation79_spill] sm:$0xff] %v4111_v14  ;;  %v4123_v37 = vpop.permute.xlu0 %971  ;;  %v1357_v30 = vsel %vm1341_vm10, %v1340_v2, %v3822_v19  ;;  %v1356_v4 = vsel %vm1341_vm10, %v1339_v44, %v3824_v40  ;;  %v4241_v44 = vld [vmem:[%s2877_s10 + $0x68] sm:$0xff]  ;;  %v5980_v14 = vld [vmem:[#allocation27_spill] sm:$0xff] }
 0x1ca   : > { %5903 = vst [vmem:[#allocation80_spill] sm:$0xff] %v4123_v37  ;;  %1153 = vrot.lane.b32.xlu1 %v3295_v8, %s2775_s5  ;;  %v1374_v48 = vsel %vm5677_vm11, %v1357_v30, %v3898_v42  ;;  %v1373_v22 = vsel %vm5677_vm11, %v1356_v4, %v3900_v32  ;;  %5924 = vst [vmem:[#allocation55_spill] sm:$0xff] %v4241_v44  ;;  %v5927_v4 = vld [vmem:[#allocation8_spill] sm:$0xff] }
 0x1cb   : > { %1151 = vrot.lane.b32.xlu0 %v5908_v60, %s2775_s5  ;;  %v1391_v24 = vsel %vm1375_vm12, %v1374_v48, %v3971_v10  ;;  %v1390_v19 = vsel %vm1375_vm12, %v1373_v22, %v3973_v52 }
 0x1cc   : > { %v978_v38 = vpop.permute.xlu1 %977 }
 0x1cd   : > { %v1406_v29 = vsel %vm5678_vm13, %v1389_v56, %v978_v38  ;;  %v4152_v36 = vpop.permute.xlu0 %975 }
 0x1ce   : > { %5912 = vst [vmem:[#allocation97_spill] sm:$0xff] %v4152_v36  ;;  %1157 = vrot.lane.b32.xlu1 %v5913_v34, %s2775_s5 }
 0x1cf   : > { %1155 = vrot.lane.b32.xlu0 %v5812_v12, %s2775_s5 }
 0x1d0   : > { %v982_v28 = vpop.permute.xlu1 %981 }
 0x1d1   : > { %v1408_v11 = vsel %vm5678_vm13, %v1391_v24, %v982_v28  ;;  %v980_v59 = vpop.permute.xlu0 %979  ;;  %v5931_v24 = vld [vmem:[#allocation15_spill] sm:$0xff] }
 0x1d2   : > { %v1407_v40 = vsel %vm5678_vm13, %v1390_v19, %v980_v59  ;;  %1510 = vrot.lane.b32.xlu1 %v3143_v50, %s2762_s11  ;;  %v5933_v59 = vld [vmem:[#allocation26_spill] sm:$0xff] }
 0x1d3   : > { %1494 = vrot.lane.b32.xlu0 %v3091_v51, %s2762_s11 }
 0x1d4   : > { %v4178_v42 = vpop.permute.xlu1 %1001 }
 0x1d5   : > { %5914 = vst [vmem:[#allocation98_spill] sm:$0xff] %v4178_v42  ;;  %v4180_v32 = vpop.permute.xlu0 %999  ;;  %v5987_v42 = vld [vmem:[#allocation19_spill] sm:$0xff] }
 0x1d6   : > { %5915 = vst [vmem:[#allocation110_spill] sm:$0xff] %v4180_v32  ;;  %1512 = vrot.lane.b32.xlu1 %v3138_v35, %s2762_s11 }
 0x1d7   : > { %1496 = vrot.lane.b32.xlu0 %v3086_v43, %s2762_s11 }
 0x1d8   : > { %v4186_v52 = vpop.permute.xlu1 %1005 }
 0x1d9   : > { %5916 = vst [vmem:[#allocation32_spill] sm:$0xff] %v4186_v52  ;;  %v4188_v10 = vpop.permute.xlu0 %1003  ;;  %v5978_v52 = vld [vmem:[#allocation145_spill] sm:$0xff] }
 0x1da   : > { %5917 = vst [vmem:[#allocation52_spill] sm:$0xff] %v4188_v10  ;;  %1558 = vrot.lane.b32.xlu1 %v5798_v16, %s2763_s20 }
 0x1db   : > { %1542 = vrot.lane.b32.xlu0 %v5862_v6, %s2763_s20 }
 0x1dc   : > { %v1010_v51 = vpop.permute.xlu1 %1009 }
 0x1dd   : > { %v1415_v13 = vsel %vm1409_vm14, %v4051_v58, %v1010_v51  ;;  %v4196_v31 = vpop.permute.xlu0 %1007 }
 0x1de   : > { %5918 = vst [vmem:[#allocation68_spill] sm:$0xff] %v4196_v31  ;;  %1560 = vrot.lane.b32.xlu1 %v3236_v53, %s2763_s20 }
 0x1df   : > { %1544 = vrot.lane.b32.xlu0 %v5861_v49, %s2763_s20 }
 0x1e0   : > { %v1014_v43 = vpop.permute.xlu1 %1013 }
 0x1e1   : > { %v1417_v21 = vsel %vm1409_vm14, %v4074_v45, %v1014_v43  ;;  %v1012_v25 = vpop.permute.xlu0 %1011 }
 0x1e2   : > { %v1416_v6 = vsel %vm1409_vm14, %v4077_v54, %v1012_v25  ;;  %1606 = vrot.lane.b32.xlu1 %v3347_v55, %s2764_s21  ;;  %v4225_v54 = vld [vmem:[%s2877_s10 + $0x60] sm:$0xff] }
 0x1e3   : > { %1590 = vrot.lane.b32.xlu0 %v5897_v27, %s2764_s21 }
 0x1e4   : > { %v4210_v58 = vpop.permute.xlu1 %1017 }
 0x1e5   : > { %5919 = vst [vmem:[#allocation85_spill] sm:$0xff] %v4210_v58  ;;  %v4212_v56 = vpop.permute.xlu0 %1015 }
 0x1e6   : > { %5920 = vst [vmem:[#allocation102_spill] sm:$0xff] %v4212_v56  ;;  %1608 = vrot.lane.b32.xlu1 %v3342_v23, %s2764_s21 }
 0x1e7   : > { %1592 = vrot.lane.b32.xlu0 %v5805_v17, %s2764_s21 }
 0x1e8   : > { %v4218_v49 = vpop.permute.xlu1 %1021 }
 0x1e9   : > { %5921 = vst [vmem:[#allocation34_spill] sm:$0xff] %v4218_v49  ;;  %v4220_v45 = vpop.permute.xlu0 %1019 }
 0x1ea   : > { %5922 = vst [vmem:[#allocation54_spill] sm:$0xff] %v4220_v45  ;;  %1654 = vrot.lane.b32.xlu1 %v3417_v1, %s2765_s24 }
 0x1eb   : > { %1638 = vrot.lane.b32.xlu0 %v4225_v54, %s2765_s24 }
 0x1ec   : > { %v1026_v27 = vpop.permute.xlu1 %1025 }
 0x1ed   : > { %v1423_v38 = vsel %vm1409_vm14, %v1406_v29, %v1026_v27  ;;  %v4230_v33 = vpop.permute.xlu0 %1023  ;;  %v5934_v27 = vld [vmem:[#allocation76_spill] sm:$0xff] }
 0x1ee   : > { %5923 = vst [vmem:[#allocation33_spill] sm:$0xff] %v4230_v33  ;;  %1514 = vrot.lane.b32.xlu1 %v5853_v62, %s2762_s11 }
 0x1ef   : > { %1498 = vrot.lane.b32.xlu0 %v3104_v63, %s2762_s11 }
 0x1f0   : > { %v1030_v17 = vpop.permute.xlu1 %1029 }
 0x1f1   : > { %v1425_v18 = vsel %vm1409_vm14, %v1408_v11, %v1030_v17  ;;  %v1028_v1 = vpop.permute.xlu0 %1027  ;;  %v5935_v17 = vld [vmem:[#allocation7_spill] sm:$0xff] }
 0x1f2   : > { %v1424_v2 = vsel %vm1409_vm14, %v1407_v40, %v1028_v1  ;;  %1656 = vrot.lane.b32.xlu1 %v3412_v3, %s2765_s24  ;;  %v5930_v3 = vld [vmem:[#allocation93_spill] sm:$0xff] }
 0x1f3   : > { %1640 = vrot.lane.b32.xlu0 %v4241_v44, %s2765_s24 }
 0x1f4   : > { %v4245_v29 = vpop.permute.xlu1 %1049 }
 0x1f5   : > { %5925 = vst [vmem:[#allocation70_spill] sm:$0xff] %v4245_v29  ;;  %v4247_v30 = vpop.permute.xlu0 %1047 }
 0x1f6   : > { %5926 = vst [vmem:[#allocation71_spill] sm:$0xff] %v4247_v30  ;;  %1702 = vrot.lane.b32.xlu1 %v3493_v5, %s2766_s27 }
 0x1f7   : > { %1686 = vrot.lane.b32.xlu0 %v5927_v4, %s2766_s27 }
 0x1f8   : > { %v4253_v48 = vpop.permute.xlu1 %1053 }
 0x1f9   : > { %5928 = vst [vmem:[#allocation87_spill] sm:$0xff] %v4253_v48  ;;  %v4255_v22 = vpop.permute.xlu0 %1051 }
 0x1fa   : > { %5929 = vst [vmem:[#allocation88_spill] sm:$0xff] %v4255_v22  ;;  %1516 = vrot.lane.b32.xlu1 %v5930_v3, %s2762_s11 }
 0x1fb   : > { %1500 = vrot.lane.b32.xlu0 %v5931_v24, %s2762_s11 }
 0x1fc   : > { %v1058_v28 = vpop.permute.xlu1 %1057 }
 0x1fd   : > { %v1432_v19 = vsel %vm5664_vm15, %v1415_v13, %v1058_v28  ;;  %v4262_v11 = vpop.permute.xlu0 %1055 }
 0x1fe   : > { %5932 = vst [vmem:[#allocation104_spill] sm:$0xff] %v4262_v11  ;;  %1562 = vrot.lane.b32.xlu1 %v3639_v20, %s2763_s20 }
 0x1ff   : > { %1546 = vrot.lane.b32.xlu0 %v5933_v59, %s2763_s20 }
 0x200   : > { %v1062_v40 = vpop.permute.xlu1 %1061 }
 0x201   : > { %v1434_v51 = vsel %vm5664_vm15, %v1417_v21, %v1062_v40  ;;  %v1060_v43 = vpop.permute.xlu0 %1059 }
 0x202   : > { %v1433_v25 = vsel %vm5664_vm15, %v1416_v6, %v1060_v43  ;;  %1704 = vrot.lane.b32.xlu1 %v5934_v27, %s2766_s27  ;;  %v5940_v6 = vld [vmem:[#allocation25_spill] sm:$0xff] }
 0x203   : > { %1688 = vrot.lane.b32.xlu0 %v5935_v17, %s2766_s27 }
 0x204   : > { %v4274_v13 = vpop.permute.xlu1 %1065 }
 0x205   : > { %5936 = vst [vmem:[#allocation35_spill] sm:$0xff] %v4274_v13  ;;  %v4276_v1 = vpop.permute.xlu0 %1063 }
 0x206   : > { %5937 = vst [vmem:[#allocation105_spill] sm:$0xff] %v4276_v1  ;;  %1750 = vrot.lane.b32.xlu1 %v5853_v62, %s2767_s28  ;;  %v5942_v62 = vld [vmem:[#allocation122_spill] sm:$0xff]  ;;  %v5991_v1 = vld [vmem:[#allocation12_spill] sm:$0xff] }
 0x207   : > { %1734 = vrot.lane.b32.xlu0 %v3104_v63, %s2767_s28 }
 0x208   : > { %v4282_v21 = vpop.permute.xlu1 %1069 }
 0x209   : > { %5938 = vst [vmem:[#allocation116_spill] sm:$0xff] %v4282_v21  ;;  %v4284_v28 = vpop.permute.xlu0 %1067  ;;  %v5975_v21 = vld [vmem:[#allocation28_spill] sm:$0xff] }
 0x20a   : > { %5939 = vst [vmem:[#allocation117_spill] sm:$0xff] %v4284_v28  ;;  %1564 = vrot.lane.b32.xlu1 %v3634_v0, %s2763_s20 }
 0x20b   : > { %1548 = vrot.lane.b32.xlu0 %v5940_v6, %s2763_s20 }
 0x20c   : > { %v1074_v40 = vpop.permute.xlu1 %1073 }
 0x20d   : > { %v1440_v43 = vsel %vm5664_vm15, %v1423_v38, %v1074_v40  ;;  %v4291_v11 = vpop.permute.xlu0 %1071 }
 0x20e   : > { %5941 = vst [vmem:[#allocation36_spill] sm:$0xff] %v4291_v11  ;;  %1610 = vrot.lane.b32.xlu1 %v5942_v62, %s2764_s21 }
 0x20f   : > { %1594 = vrot.lane.b32.xlu0 %v5908_v60, %s2764_s21 }
 0x210   : > { %v1078_v63 = vpop.permute.xlu1 %1077 }
 0x211   : > { %v1442_v31 = vsel %vm5664_vm15, %v1425_v18, %v1078_v63  ;;  %v1076_v33 = vpop.permute.xlu0 %1075 }
 0x212   : > { %v1441_v9 = vsel %vm5664_vm15, %v1424_v2, %v1076_v33  ;;  %1752 = vrot.lane.b32.xlu1 %v5930_v3, %s2767_s28  ;;  %v5947_v2 = vld [vmem:[#allocation121_spill] sm:$0xff]  ;;  %vm1443_vm15 = vcmask 424960  }
 0x213   : > { %1736 = vrot.lane.b32.xlu0 %v5931_v24, %s2767_s28 }
 0x214   : > { %v4303_v38 = vpop.permute.xlu1 %1097 }
 0x215   : > { %5943 = vst [vmem:[#allocation8_spill] sm:$0xff] %v4303_v38  ;;  %v4305_v40 = vpop.permute.xlu0 %1095 }
 0x216   : > { %5944 = vst [vmem:[#allocation93_spill] sm:$0xff] %v4305_v40  ;;  %1798 = vrot.lane.b32.xlu1 %v3639_v20, %s2768_s29  ;;  %v4327_v20 = vld [vmem:[%s2877_s10 + $0x78] sm:$0xff] }
 0x217   : > { %1782 = vrot.lane.b32.xlu0 %v5933_v59, %s2768_s29  ;;  %5950 = vst [vmem:[#allocation161_spill] sm:$0xff] %v4327_v20 }
 0x218   : > { %v4311_v18 = vpop.permute.xlu1 %1101 }
 0x219   : > { %5945 = vst [vmem:[#allocation15_spill] sm:$0xff] %v4311_v18  ;;  %v4313_v33 = vpop.permute.xlu0 %1099 }
 0x21a   : > { %5946 = vst [vmem:[#allocation26_spill] sm:$0xff] %v4313_v33  ;;  %1612 = vrot.lane.b32.xlu1 %v5947_v2, %s2764_s21 }
 0x21b   : > { %1596 = vrot.lane.b32.xlu0 %v3295_v8, %s2764_s21 }
 0x21c   : > { %v1106_v3 = vpop.permute.xlu1 %1105 }
 0x21d   : > { %v4320_v24 = vsel %vm1443_vm15, %v1432_v19, %v1106_v3  ;;  %v4322_v63 = vpop.permute.xlu0 %1103 }
 0x21e   : > { %5948 = vst [vmem:[#allocation25_spill] sm:$0xff] %v4320_v24  ;;  %5949 = vst [vmem:[#allocation160_spill] sm:$0xff] %v4322_v63  ;;  %1658 = vrot.lane.b32.xlu1 %v3782_v15, %s2765_s24 }
 0x21f   : > { %1642 = vrot.lane.b32.xlu0 %v4327_v20, %s2765_s24 }
 0x220   : > { %v1110_v59 = vpop.permute.xlu1 %1109 }
 0x221   : > { %v4332_v11 = vsel %vm1443_vm15, %v1434_v51, %v1110_v59  ;;  %v1108_v36 = vpop.permute.xlu0 %1107 }
 0x222   : > { %5951 = vst [vmem:[#allocation162_spill] sm:$0xff] %v4332_v11  ;;  %v4335_v18 = vsel %vm1443_vm15, %v1433_v25, %v1108_v36  ;;  %1800 = vrot.lane.b32.xlu1 %v3634_v0, %s2768_s29  ;;  %v5957_v25 = vld [vmem:[#allocation157_spill] sm:$0xff] }
 0x223   : > { %5952 = vst [vmem:[#allocation163_spill] sm:$0xff] %v4335_v18  ;;  %1784 = vrot.lane.b32.xlu0 %v5940_v6, %s2768_s29  ;;  %v5958_v0 = vld [vmem:[#allocation17_spill] sm:$0xff] }
 0x224   : > { %v4341_v19 = vpop.permute.xlu1 %1113  ;;  %v5961_v18 = vld [vmem:[#allocation133_spill] sm:$0xff] }
 0x225   : > { %5953 = vst [vmem:[#allocation164_spill] sm:$0xff] %v4341_v19  ;;  %v4343_v3 = vpop.permute.xlu0 %1111 }
 0x226   : > { %5954 = vst [vmem:[#allocation165_spill] sm:$0xff] %v4343_v3  ;;  %1846 = vrot.lane.b32.xlu1 %v5942_v62, %s2769_s4  ;;  %v219_v3 = vld [vmem:[%s2877_s10 + $0x100] sm:$0xf] }
 0x227   : > { %1830 = vrot.lane.b32.xlu0 %v5908_v60, %s2769_s4  ;;  %v4365_v60 = vld [vmem:[%s2877_s10 + $0x80] sm:$0xff]  ;;  %v484_v32 = vrot.slane %v219_v3, 2  ;;  %v489_v62 = vrot.slane %v219_v3, 3 }
 0x228   : > { %v4349_v51 = vpop.permute.xlu1 %1117  ;;  %5962 = vst [vmem:[#allocation133_spill] sm:$0xff] %v4365_v60 }
 0x229   : > { %5955 = vst [vmem:[#allocation166_spill] sm:$0xff] %v4349_v51  ;;  %v4351_v36 = vpop.permute.xlu0 %1115 }
 0x22a   : > { %5956 = vst [vmem:[#allocation167_spill] sm:$0xff] %v4351_v36  ;;  %1518 = vrot.lane.b32.xlu1 %v5957_v25, %s2762_s11 }
 0x22b   : > { %1502 = vrot.lane.b32.xlu0 %v5958_v0, %s2762_s11 }
 0x22c   : > { %v1122_v6 = vpop.permute.xlu1 %1121 }
 0x22d   : > { %v4358_v59 = vsel %vm1443_vm15, %v1440_v43, %v1122_v6  ;;  %v4360_v11 = vpop.permute.xlu0 %1119  ;;  %v5965_v43 = vld [vmem:[#allocation146_spill] sm:$0xff] }
 0x22e   : > { %5959 = vst [vmem:[#allocation157_spill] sm:$0xff] %v4358_v59  ;;  %5960 = vst [vmem:[#allocation17_spill] sm:$0xff] %v4360_v11  ;;  %1660 = vrot.lane.b32.xlu1 %v5961_v18, %s2765_s24  ;;  %v5966_v6 = vld [vmem:[#allocation10_spill] sm:$0xff] }
 0x22f   : > { %1644 = vrot.lane.b32.xlu0 %v4365_v60, %s2765_s24 }
 0x230   : > { %v1126_v24 = vpop.permute.xlu1 %1125 }
 0x231   : > { %v4370_v63 = vsel %vm1443_vm15, %v1442_v31, %v1126_v24  ;;  %v1124_v51 = vpop.permute.xlu0 %1123  ;;  %v5971_v24 = vld [vmem:[#allocation95_spill] sm:$0xff] }
 0x232   : > { %5963 = vst [vmem:[#allocation168_spill] sm:$0xff] %v4370_v63  ;;  %v4373_v48 = vsel %vm1443_vm15, %v1441_v9, %v1124_v51  ;;  %1706 = vrot.lane.b32.xlu1 %v5965_v43, %s2766_s27  ;;  %v5972_v51 = vld [vmem:[#allocation16_spill] sm:$0xff] }
 0x233   : > { %5964 = vst [vmem:[#allocation169_spill] sm:$0xff] %v4373_v48  ;;  %1690 = vrot.lane.b32.xlu0 %v5966_v6, %s2766_s27  ;;  %v463_v6 = vrot.slane %v219_v3, 1 }
 0x234   : > { %v4379_v59 = vpop.permute.xlu1 %1145 }
 0x235   : > { %5967 = vst [vmem:[#allocation170_spill] sm:$0xff] %v4379_v59  ;;  %v4381_v11 = vpop.permute.xlu0 %1143 }
 0x236   : > { %5968 = vst [vmem:[#allocation171_spill] sm:$0xff] %v4381_v11  ;;  %1848 = vrot.lane.b32.xlu1 %v5947_v2, %s2769_s4 }
 0x237   : > { %1832 = vrot.lane.b32.xlu0 %v3295_v8, %s2769_s4 }
 0x238   : > { %v4387_v31 = vpop.permute.xlu1 %1149 }
 0x239   : > { %5969 = vst [vmem:[#allocation172_spill] sm:$0xff] %v4387_v31  ;;  %v4389_v9 = vpop.permute.xlu0 %1147 }
 0x23a   : > { %5970 = vst [vmem:[#allocation173_spill] sm:$0xff] %v4389_v9  ;;  %1520 = vrot.lane.b32.xlu1 %v5971_v24, %s2762_s11  ;;  %v5979_v9 = vld [vmem:[#allocation9_spill] sm:$0xff] }
 0x23b   : > { %1504 = vrot.lane.b32.xlu0 %v5972_v51, %s2762_s11 }
 0x23c   : > { %v4395_v63 = vpop.permute.xlu1 %1153 }
 0x23d   : > { %5973 = vst [vmem:[#allocation95_spill] sm:$0xff] %v4395_v63  ;;  %v4397_v48 = vpop.permute.xlu0 %1151 }
 0x23e   : > { %5974 = vst [vmem:[#allocation16_spill] sm:$0xff] %v4397_v48  ;;  %1566 = vrot.lane.b32.xlu1 %v4044_v26, %s2763_s20 }
 0x23f   : > { %1550 = vrot.lane.b32.xlu0 %v5975_v21, %s2763_s20 }
 0x240   : > { %v4403_v8 = vpop.permute.xlu1 %1157 }
 0x241   : > { %5976 = vst [vmem:[#allocation28_spill] sm:$0xff] %v4403_v8  ;;  %v4405_v31 = vpop.permute.xlu0 %1155  ;;  %v452_v8 = vrot.slane %v3782_v15, 4 }
 0x242   : > { %5977 = vst [vmem:[#allocation174_spill] sm:$0xff] %v4405_v31  ;;  %1708 = vrot.lane.b32.xlu1 %v5978_v52, %s2766_s27  ;;  %v453_v31 = vrot.slane %v5961_v18, 4  ;;  %v5992_v52 = vld [vmem:[#allocation18_spill] sm:$0xff] }
 0x243   : > { %1692 = vrot.lane.b32.xlu0 %v5979_v9, %s2766_s27 }
 0x244   : > { %v4411_v49 = vpop.permute.xlu1 %1510  ;;  %v4430_v36 = vsel %vm370_vm3, %v452_v8, %v453_v31  ;;  %v5982_v8 = vld [vmem:[#allocation141_spill] sm:$0xff] }
 0x245   : > { %v4413_v63 = vpop.permute.xlu0 %1494  ;;  %5981 = vst [vmem:[#allocation27_spill] sm:$0xff] %v4430_v36  ;;  %v455_v22 = vrot.slane %v5982_v8, 4 }
 0x246   : > { %1754 = vrot.lane.b32.xlu1 %v5957_v25, %s2767_s28 }
 0x247   : > { %1738 = vrot.lane.b32.xlu0 %v5958_v0, %s2767_s28  ;;  %v4458_v45 = vsel %vm370_vm3, %v453_v31, %v455_v22  ;;  %v4478_v22 = vld [vmem:[%s2877_s10 + $0x90] sm:$0xff]  ;;  %v4485_v31 = vld [vmem:[%s2877_s10 + $0xf8] sm:$0xff] }
 0x248   : > { %v4421_v48 = vpop.permute.xlu1 %1512  ;;  %5983 = vst [vmem:[#allocation141_spill] sm:$0xff] %v4458_v45  ;;  %5985 = vst [vmem:[#allocation176_spill] sm:$0xff] %v4478_v22  ;;  %v482_v38 = vrot.slane %v4485_v31, 2  ;;  %v461_v58 = vrot.slane %v4485_v31, 1 }
 0x249   : > { %v4423_v33 = vpop.permute.xlu0 %1496  ;;  %5986 = vst [vmem:[#allocation177_spill] sm:$0xff] %v4485_v31 }
 0x24a   : > { %1568 = vrot.lane.b32.xlu1 %v4037_v61, %s2763_s20 }
 0x24b   : > { %1552 = vrot.lane.b32.xlu0 %v5980_v14, %s2763_s20 }
 0x24c   : > { %v4432_v25 = vpop.permute.xlu1 %1558 }
 0x24d   : > { %v4434_v0 = vpop.permute.xlu0 %1542 }
 0x24e   : > { %1614 = vrot.lane.b32.xlu1 %v4430_v36, %s2764_s21 }
 0x24f   : > { %1598 = vrot.lane.b32.xlu0 %v5812_v12, %s2764_s21 }
 0x250   : > { %v4440_v15 = vpop.permute.xlu1 %1560 }
 0x251   : > { %v4442_v18 = vpop.permute.xlu0 %1544 }
 0x252   : > { %1756 = vrot.lane.b32.xlu1 %v5971_v24, %s2767_s28 }
 0x253   : > { %1740 = vrot.lane.b32.xlu0 %v5972_v51, %s2767_s28  ;;  %v4469_v51 = vld [vmem:[%s2877_s10 + $0xf0] sm:$0xff] }
 0x254   : > { %v4449_v28 = vpop.permute.xlu1 %1606  ;;  %5984 = vst [vmem:[#allocation175_spill] sm:$0xff] %v4469_v51  ;;  %v481_v59 = vrot.slane %v4469_v51, 2  ;;  %v460_v11 = vrot.slane %v4469_v51, 1 }
 0x255   : > { %v4451_v10 = vpop.permute.xlu0 %1590 }
 0x256   : > { %1802 = vrot.lane.b32.xlu1 %v4044_v26, %s2768_s29 }
 0x257   : > { %1786 = vrot.lane.b32.xlu0 %v5975_v21, %s2768_s29 }
 0x258   : > { %v4460_v24 = vpop.permute.xlu1 %1608 }
 0x259   : > { %v4462_v46 = vpop.permute.xlu0 %1592 }
 0x25a   : > { %1616 = vrot.lane.b32.xlu1 %v4458_v45, %s2764_s21 }
 0x25b   : > { %1600 = vrot.lane.b32.xlu0 %v5913_v34, %s2764_s21 }
 0x25c   : > { %v4471_v8 = vpop.permute.xlu1 %1654 }
 0x25d   : > { %v4473_v26 = vpop.permute.xlu0 %1638 }
 0x25e   : > { %1662 = vrot.lane.b32.xlu1 %v4469_v51, %s2765_s24 }
 0x25f   : > { %1646 = vrot.lane.b32.xlu0 %v4478_v22, %s2765_s24  ;;  %v487_v22 = vrot.slane %v4485_v31, 3 }
 0x260   : > { %v4482_v21 = vpop.permute.xlu1 %1514 }
 0x261   : > { %v4487_v37 = vpop.permute.xlu0 %1498 }
 0x262   : > { %1804 = vrot.lane.b32.xlu1 %v4037_v61, %s2768_s29  ;;  %v483_v61 = vsel %vm288_vm1, %v481_v59, %v482_v38 }
 0x263   : > { %1788 = vrot.lane.b32.xlu0 %v5980_v14, %s2768_s29 }
 0x264   : > { %v4495_v19 = vpop.permute.xlu1 %1656 }
 0x265   : > { %v4497_v29 = vpop.permute.xlu0 %1640 }
 0x266   : > { %1850 = vrot.lane.b32.xlu1 %v4430_v36, %s2769_s4 }
 0x267   : > { %1834 = vrot.lane.b32.xlu0 %v5812_v12, %s2769_s4  ;;  %v4522_v12 = vsel %vm247_vm0, %v460_v11, %v461_v58  ;;  %v486_v11 = vrot.slane %v4469_v51, 3 }
 0x268   : > { %v4504_v13 = vpop.permute.xlu1 %1702  ;;  %5990 = vst [vmem:[#allocation179_spill] sm:$0xff] %v4522_v12 }
 0x269   : > { %v4506_v14 = vpop.permute.xlu0 %1686 }
 0x26a   : > { %1522 = vrot.lane.b32.xlu1 %v483_v61, %s2762_s11 }
 0x26b   : > { %1506 = vrot.lane.b32.xlu0 %v5987_v42, %s2762_s11 }
 0x26c   : > { %v4513_v40 = vpop.permute.xlu1 %1516 }
 0x26d   : > { %5988 = vst [vmem:[#allocation19_spill] sm:$0xff] %v4513_v40  ;;  %v4515_v47 = vpop.permute.xlu0 %1500 }
 0x26e   : > { %5989 = vst [vmem:[#allocation178_spill] sm:$0xff] %v4515_v47  ;;  %1664 = vrot.lane.b32.xlu1 %v4485_v31, %s2765_s24 }
 0x26f   : > { %1648 = vrot.lane.b32.xlu0 %v4084_v7, %s2765_s24  ;;  %v485_v7 = vsel %vm288_vm1, %v482_v38, %v484_v32  ;;  %v5995_v32 = vld [vmem:[#allocation30_spill] sm:$0xff]  ;;  %v4560_v38 = vsel %vm247_vm0, %v461_v58, %v463_v6  ;;  %v490_v58 = vsel %vm329_vm2, %v487_v22, %v489_v62  ;;  %v491_v6 = vrot.slane %v4469_v51, 4 }
 0x270   : > { %v4524_v59 = vpop.permute.xlu1 %1562  ;;  %5996 = vst [vmem:[#allocation30_spill] sm:$0xff] %v4560_v38  ;;  %v6003_v62 = vld [vmem:[#allocation42_spill] sm:$0xff] }
 0x271   : > { %v4527_v30 = vpop.permute.xlu0 %1546 }
 0x272   : > { %1710 = vrot.lane.b32.xlu1 %v4522_v12, %s2766_s27  ;;  %v492_v12 = vrot.slane %v4485_v31, 4 }
 0x273   : > { %1694 = vrot.lane.b32.xlu0 %v5991_v1, %s2766_s27 }
 0x274   : > { %v4533_v56 = vpop.permute.xlu1 %1704 }
 0x275   : > { %v4535_v41 = vpop.permute.xlu0 %1688 }
 0x276   : > { %1852 = vrot.lane.b32.xlu1 %v4458_v45, %s2769_s4  ;;  %v488_v45 = vsel %vm329_vm2, %v486_v11, %v487_v22  ;;  %v5999_v11 = vld [vmem:[#allocation11_spill] sm:$0xff] }
 0x277   : > { %1836 = vrot.lane.b32.xlu0 %v5913_v34, %s2769_s4 }
 0x278   : > { %v4544_v36 = vpop.permute.xlu1 %1750 }
 0x279   : > { %v4546_v9 = vpop.permute.xlu0 %1734 }
 0x27a   : > { %1524 = vrot.lane.b32.xlu1 %v485_v7, %s2762_s11 }
 0x27b   : > { %1508 = vrot.lane.b32.xlu0 %v5992_v52, %s2762_s11 }
 0x27c   : > { %v4552_v43 = vpop.permute.xlu1 %1564 }
 0x27d   : > { %5993 = vst [vmem:[#allocation18_spill] sm:$0xff] %v4552_v43  ;;  %v4554_v34 = vpop.permute.xlu0 %1548 }
 0x27e   : > { %5994 = vst [vmem:[#allocation180_spill] sm:$0xff] %v4554_v34  ;;  %1570 = vrot.lane.b32.xlu1 %v488_v45, %s2763_s20 }
 0x27f   : > { %1554 = vrot.lane.b32.xlu0 %v5995_v32, %s2763_s20 }
 0x280   : > { %v4562_v60 = vpop.permute.xlu1 %1610 }
 0x281   : > { %5997 = vst [vmem:[#allocation181_spill] sm:$0xff] %v4562_v60  ;;  %v4564_v20 = vpop.permute.xlu0 %1594 }
 0x282   : > { %5998 = vst [vmem:[#allocation182_spill] sm:$0xff] %v4564_v20  ;;  %1712 = vrot.lane.b32.xlu1 %v4560_v38, %s2766_s27  ;;  %v6015_v20 = vld [vmem:[#allocation14_spill] sm:$0xff] }
 0x283   : > { %1696 = vrot.lane.b32.xlu0 %v5999_v11, %s2766_s27  ;;  %v6000_v11 = vld [vmem:[#allocation29_spill] sm:$0xff] }
 0x284   : > { %v4570_v2 = vpop.permute.xlu1 %1752 }
 0x285   : > { %v4572_v1 = vpop.permute.xlu0 %1736 }
 0x286   : > { %1758 = vrot.lane.b32.xlu1 %v483_v61, %s2767_s28  ;;  %v493_v61 = vsel %vm370_vm3, %v491_v6, %v492_v12  ;;  %v494_v6 = vrot.slane %v219_v3, 4  ;;  %v4618_v3 = vld [vmem:[%s2877_s10 + $0x108] sm:$0xff] }
 0x287   : > { %1742 = vrot.lane.b32.xlu0 %v5987_v42, %s2767_s28 }
 0x288   : > { %v4580_v38 = vpop.permute.xlu1 %1798 }
 0x289   : > { %v4582_v44 = vpop.permute.xlu0 %1782 }
 0x28a   : > { %1572 = vrot.lane.b32.xlu1 %v490_v58, %s2763_s20 }
 0x28b   : > { %1556 = vrot.lane.b32.xlu0 %v6000_v11, %s2763_s20 }
 0x28c   : > { %v4588_v34 = vpop.permute.xlu1 %1612 }
 0x28d   : > { %6001 = vst [vmem:[#allocation29_spill] sm:$0xff] %v4588_v34  ;;  %v4590_v42 = vpop.permute.xlu0 %1596 }
 0x28e   : > { %6002 = vst [vmem:[#allocation183_spill] sm:$0xff] %v4590_v42  ;;  %1618 = vrot.lane.b32.xlu1 %v493_v61, %s2764_s21  ;;  %v495_v42 = vsel %vm370_vm3, %v492_v12, %v494_v6 }
 0x28f   : > { %1602 = vrot.lane.b32.xlu0 %v6003_v62, %s2764_s21 }
 0x290   : > { %v4595_v22 = vpop.permute.xlu1 %1658 }
 0x291   : > { %6004 = vst [vmem:[#allocation42_spill] sm:$0xff] %v4595_v22  ;;  %v4597_v31 = vpop.permute.xlu0 %1642 }
 0x292   : > { %6005 = vst [vmem:[#allocation184_spill] sm:$0xff] %v4597_v31  ;;  %1760 = vrot.lane.b32.xlu1 %v485_v7, %s2767_s28 }
 0x293   : > { %1744 = vrot.lane.b32.xlu0 %v5992_v52, %s2767_s28  ;;  %v6006_v52 = vld [vmem:[#allocation40_spill] sm:$0xff] }
 0x294   : > { %v4602_v51 = vpop.permute.xlu1 %1800 }
 0x295   : > { %v4604_v34 = vpop.permute.xlu0 %1784 }
 0x296   : > { %1806 = vrot.lane.b32.xlu1 %v488_v45, %s2768_s29 }
 0x297   : > { %1790 = vrot.lane.b32.xlu0 %v5995_v32, %s2768_s29 }
 0x298   : > { %v4610_v43 = vpop.permute.xlu1 %1846 }
 0x299   : > { %v4612_v31 = vpop.permute.xlu0 %1830 }
 0x29a   : > { %1620 = vrot.lane.b32.xlu1 %v495_v42, %s2764_s21 }
 0x29b   : > { %1604 = vrot.lane.b32.xlu0 %v6006_v52, %s2764_s21  ;;  %s2443_s21 = sshll.u32 %s2748_s16, 5 }
 0x29c   : > { %v4620_v7 = vpop.permute.xlu1 %1518 }
 0x29d   : > { %6007 = vst [vmem:[#allocation40_spill] sm:$0xff] %v4620_v7  ;;  %v4622_v45 = vpop.permute.xlu0 %1502  ;;  %v4638_v7 = vld [vmem:[%s2877_s10 + $0x110] sm:$0xff] }
 0x29e   : > { %6008 = vst [vmem:[#allocation185_spill] sm:$0xff] %v4622_v45  ;;  %1666 = vrot.lane.b32.xlu1 %v4618_v3, %s2765_s24 }
 0x29f   : > { %1650 = vrot.lane.b32.xlu0 %v4114_v57, %s2765_s24 }
 0x2a0   : > { %v4628_v12 = vpop.permute.xlu1 %1660 }
 0x2a1   : > { %6009 = vst [vmem:[#allocation186_spill] sm:$0xff] %v4628_v12  ;;  %v4630_v32 = vpop.permute.xlu0 %1644  ;;  %v499_v12 = vrot.slane %v4618_v3, 1 }
 0x2a2   : > { %6010 = vst [vmem:[#allocation187_spill] sm:$0xff] %v4630_v32  ;;  %1808 = vrot.lane.b32.xlu1 %v490_v58, %s2768_s29  ;;  %v500_v32 = vrot.slane %v4638_v7, 1 }
 0x2a3   : > { %1792 = vrot.lane.b32.xlu0 %v6000_v11, %s2768_s29 }
 0x2a4   : > { %v4635_v6 = vpop.permute.xlu1 %1706  ;;  %v501_v11 = vsel %vm247_vm0, %v499_v12, %v500_v32 }
 0x2a5   : > { %6011 = vst [vmem:[#allocation188_spill] sm:$0xff] %v4635_v6  ;;  %v4640_v45 = vpop.permute.xlu0 %1690 }
 0x2a6   : > { %6012 = vst [vmem:[#allocation189_spill] sm:$0xff] %v4640_v45  ;;  %1854 = vrot.lane.b32.xlu1 %v493_v61, %s2769_s4  ;;  %v4659_v45 = vld [vmem:[%s2877_s10 + $0x118] sm:$0xf] }
 0x2a7   : > { %1838 = vrot.lane.b32.xlu0 %v6003_v62, %s2769_s4  ;;  %v502_v17 = vrot.slane %v4659_v45, 1 }
 0x2a8   : > { %v4647_v22 = vpop.permute.xlu1 %1848 }
 0x2a9   : > { %v4649_v58 = vpop.permute.xlu0 %1832  ;;  %v503_v12 = vsel %vm247_vm0, %v500_v32, %v502_v17  ;;  %v2099_v32 = vld [vmem:[%s5572_s1 + $0x60] sm:$0xf]  ;;  %vm6116_vm0 = vcmask 392192  }
 0x2aa   : > { %1668 = vrot.lane.b32.xlu1 %v4638_v7, %s2765_s24  ;;  %2476 = vmatprep.subr.msk.mxu0 %vm370_vm3, %v2099_v32 }
 0x2ab   : > { %1652 = vrot.lane.b32.xlu0 %v4104_v39, %s2765_s24  ;;  %2526 = vmatprep.subr.msk.mxu1 %vm370_vm3, %v2099_v32  ;;  %s2776_s24 = smov 60  }
 0x2ac   : > { %v4656_v61 = vpop.permute.xlu1 %1520  ;;  %2477 = vmatpush3.msk.msra.mxu0 %vm370_vm3, %v2099_v32  ;;  %2539 = vmatpush3.msk.msra.mxu1 %vm370_vm3, %v2099_v32 }
 0x2ad   : > { %6013 = vst [vmem:[#allocation190_spill] sm:$0xff] %v4656_v61  ;;  %v4661_v6 = vpop.permute.xlu0 %1504 }
 0x2ae   : > { %6014 = vst [vmem:[#allocation191_spill] sm:$0xff] %v4661_v6  ;;  %1714 = vrot.lane.b32.xlu1 %v501_v11, %s2766_s27  ;;  %v504_v6 = vrot.slane %v4618_v3, 2  ;;  %v505_v11 = vrot.slane %v4638_v7, 2 }
 0x2af   : > { %1698 = vrot.lane.b32.xlu0 %v6015_v20, %s2766_s27 }
 0x2b0   : > { %v4667_v47 = vpop.permute.xlu1 %1566 }
 0x2b1   : > { %6016 = vst [vmem:[#allocation14_spill] sm:$0xff] %v4667_v47  ;;  %v4669_v27 = vpop.permute.xlu0 %1550  ;;  %v6020_v47 = vld [vmem:[#allocation13_spill] sm:$0xff] }
 0x2b2   : > { %6017 = vst [vmem:[#allocation192_spill] sm:$0xff] %v4669_v27  ;;  %1856 = vrot.lane.b32.xlu1 %v495_v42, %s2769_s4  ;;  %v506_v42 = vsel %vm288_vm1, %v504_v6, %v505_v11  ;;  %v507_v27 = vrot.slane %v4659_v45, 2  ;;  %v510_v6 = vrot.slane %v4638_v7, 3 }
 0x2b3   : > { %1840 = vrot.lane.b32.xlu0 %v6006_v52, %s2769_s4 }
 0x2b4   : > { %v4677_v61 = vpop.permute.xlu1 %1708 }
 0x2b5   : > { %6018 = vst [vmem:[#allocation193_spill] sm:$0xff] %v4677_v61  ;;  %v4679_v40 = vpop.permute.xlu0 %1692 }
 0x2b6   : > { %6019 = vst [vmem:[#allocation194_spill] sm:$0xff] %v4679_v40  ;;  %1716 = vrot.lane.b32.xlu1 %v503_v12, %s2766_s27  ;;  %v508_v12 = vsel %vm288_vm1, %v505_v11, %v507_v27  ;;  %v509_v40 = vrot.slane %v4618_v3, 3  ;;  %v512_v11 = vrot.slane %v4659_v45, 3  ;;  %vm1460_vm1 = vcmask 457728  }
 0x2b7   : > { %1700 = vrot.lane.b32.xlu0 %v6020_v47, %s2766_s27 }
 0x2b8   : > { %v4686_v60 = vpop.permute.xlu1 %1754  ;;  %v511_v27 = vsel %vm329_vm2, %v509_v40, %v510_v6  ;;  %v513_v40 = vsel %vm329_vm2, %v510_v6, %v512_v11  ;;  %v2093_v11 = vld [vmem:[%s5572_s1 + $0x30] sm:$0xff]  ;;  %vm1477_vm2 = vcmask 490496  }
 0x2b9   : > { %v4688_v17 = vpop.permute.xlu0 %1738 }
 0x2ba   : > { %1762 = vrot.lane.b32.xlu1 %v506_v42, %s2767_s28 }
 0x2bb   : > { %1746 = vrot.lane.b32.xlu0 %v3143_v50, %s2767_s28  ;;  %v2098_v50 = vld [vmem:[%s5572_s1 + $0x58] sm:$0xff] }
 0x2bc   : > { %v4700_v61 = vpop.permute.xlu1 %1568  ;;  %2478 = vmatprep.subr.mxu0 %v2098_v50  ;;  %2527 = vmatprep.subr.mxu1 %v2098_v50 }
 0x2bd   : > { %6021 = vst [vmem:[#allocation13_spill] sm:$0xff] %v4700_v61  ;;  %v4704_v42 = vpop.permute.xlu0 %1552  ;;  %2479 = vmatpush3.msra.mxu0 %v2098_v50  ;;  %2540 = vmatpush3.msra.mxu1 %v2098_v50  ;;  %v2095_v50 = vld [vmem:[%s5572_s1 + $0x40] sm:$0xff] }
 0x2be   : > { %6022 = vst [vmem:[#allocation195_spill] sm:$0xff] %v4704_v42  ;;  %1764 = vrot.lane.b32.xlu1 %v508_v12, %s2767_s28  ;;  %v2097_v42 = vld [vmem:[%s5572_s1 + $0x50] sm:$0xff]  ;;  %v514_v12 = vrot.slane %v4618_v3, 4 }
 0x2bf   : > { %1748 = vrot.lane.b32.xlu0 %v3138_v35, %s2767_s28  ;;  %2480 = vmatprep.subr.mxu0 %v2097_v42  ;;  %v2096_v35 = vld [vmem:[%s5572_s1 + $0x48] sm:$0xff]  ;;  %s2777_s28 = smov 64  }
 0x2c0   : > { %v4718_v61 = vpop.permute.xlu1 %1614  ;;  %2528 = vmatprep.subr.mxu1 %v2097_v42  ;;  %2481 = vmatpush3.msra.mxu0 %v2097_v42 }
 0x2c1   : > { %6023 = vst [vmem:[#allocation196_spill] sm:$0xff] %v4718_v61  ;;  %v4720_v32 = vpop.permute.xlu0 %1598  ;;  %v515_v61 = vrot.slane %v4638_v7, 4  ;;  %2541 = vmatpush3.msra.mxu1 %v2097_v42  ;;  %2482 = vmatprep.subr.mxu0 %v2096_v35  ;;  %v517_v7 = vrot.slane %v4659_v45, 4 }
 0x2c2   : > { %6024 = vst [vmem:[#allocation197_spill] sm:$0xff] %v4720_v32  ;;  %1810 = vrot.lane.b32.xlu1 %v511_v27, %s2768_s29  ;;  %2529 = vmatprep.subr.mxu1 %v2096_v35 }
 0x2c3   : > { %1794 = vrot.lane.b32.xlu0 %v5798_v16, %s2768_s29  ;;  %2483 = vmatpush3.msra.mxu0 %v2096_v35  ;;  %v2094_v16 = vld [vmem:[%s5572_s1 + $0x38] sm:$0xff]  ;;  %v516_v3 = vsel %vm370_vm3, %v514_v12, %v515_v61 }
 0x2c4   : > { %v4731_v32 = vpop.permute.xlu1 %1756  ;;  %2542 = vmatpush3.msra.mxu1 %v2096_v35  ;;  %2484 = vmatprep.subr.mxu0 %v2095_v50  ;;  %v2092_v35 = vld [vmem:[%s5572_s1 + $0x28] sm:$0xff] }
 0x2c5   : > { %v4736_v27 = vpop.permute.xlu0 %1740  ;;  %2530 = vmatprep.subr.mxu1 %v2095_v50  ;;  %2485 = vmatpush3.msra.mxu0 %v2095_v50 }
 0x2c6   : > { %1812 = vrot.lane.b32.xlu1 %v513_v40, %s2768_s29  ;;  %2543 = vmatpush3.msra.mxu1 %v2095_v50 }
 0x2c7   : > { %1796 = vrot.lane.b32.xlu0 %v3236_v53, %s2768_s29  ;;  %2486 = vmatprep.subr.mxu0 %v2094_v16  ;;  %v518_v53 = vsel %vm370_vm3, %v515_v61, %v517_v7  ;;  %v2091_v61 = vld [vmem:[%s5572_s1 + $0x20] sm:$0xff]  ;;  %v2089_v7 = vld [vmem:[%s5572_s1 + $0x10] sm:$0xff]  ;;  %vm6119_vm3 = vmmov %vm6116_vm0 }
 0x2c8   : > { %v4746_v6 = vpop.permute.xlu1 %1802  ;;  %2531 = vmatprep.subr.mxu1 %v2094_v16  ;;  %2487 = vmatpush3.msra.mxu0 %v2094_v16 }
 0x2c9   : > { %v4748_v42 = vpop.permute.xlu0 %1786  ;;  %2544 = vmatpush3.msra.mxu1 %v2094_v16  ;;  %2488 = vmatprep.subr.mxu0 %v2093_v11  ;;  %v2090_v16 = vld [vmem:[%s5572_s1 + $0x18] sm:$0xff] }
 0x2ca   : > { %1858 = vrot.lane.b32.xlu1 %v516_v3, %s2769_s4  ;;  %2532 = vmatprep.subr.mxu1 %v2093_v11 }
 0x2cb   : > { %1842 = vrot.lane.b32.xlu0 %v3347_v55, %s2769_s4  ;;  %2489 = vmatpush3.msra.mxu0 %v2093_v11 }
 0x2cc   : > { %v4757_v45 = vpop.permute.xlu1 %1616  ;;  %2545 = vmatpush3.msra.mxu1 %v2093_v11  ;;  %2490 = vmatprep.subr.mxu0 %v2092_v35 }
 0x2cd   : > { %v4762_v40 = vpop.permute.xlu0 %1600  ;;  %2533 = vmatprep.subr.mxu1 %v2092_v35  ;;  %2491 = vmatpush3.msra.mxu0 %v2092_v35 }
 0x2ce   : > { %6025 = vst [vmem:[#allocation198_spill] sm:$0xff] %v4762_v40  ;;  %1860 = vrot.lane.b32.xlu1 %v518_v53, %s2769_s4  ;;  %2546 = vmatpush3.msra.mxu1 %v2092_v35  ;;  %v6026_v53 = vld [vmem:[#allocation6_spill] sm:$0xff] }
 0x2cf   : > { %1844 = vrot.lane.b32.xlu0 %v3342_v23, %s2769_s4  ;;  %2492 = vmatprep.subr.mxu0 %v2091_v61  ;;  %v1878_v35 = vsel %vm1239_vm4, %v6026_v53, %v4413_v63  ;;  %s2442_s4 = sshll.u32 %s2744_s15, 4 }
 0x2d0   : > { %v4770_v12 = vpop.permute.xlu1 %1662  ;;  %2534 = vmatprep.subr.mxu1 %v2091_v61  ;;  %2493 = vmatpush3.msra.mxu0 %v2091_v61  ;;  %v1894_v40 = vsel %vm1256_vm5, %v1878_v35, %v4434_v0 }
 0x2d1   : > { %v4772_v50 = vpop.permute.xlu0 %1646  ;;  %2547 = vmatpush3.msra.mxu1 %v2091_v61  ;;  %2494 = vmatprep.subr.mxu0 %v2090_v16  ;;  %v1887_v61 = vsel %vm1239_vm4, %v6020_v47, %v4421_v48  ;;  %v1910_v48 = vsel %vm1273_vm6, %v1894_v40, %v4451_v10 }
 0x2d2   : > { %1161 = vrot.lane.b32.xlu1 %v6006_v52, %s2775_s5  ;;  %2535 = vmatprep.subr.mxu1 %v2090_v16  ;;  %v1886_v52 = vsel %vm1239_vm4, %v6015_v20, %v4411_v49  ;;  %v6027_v20 = vld [vmem:[#allocation46_spill] sm:$0xff]  ;;  %v1903_v47 = vsel %vm1256_vm5, %v1887_v61, %v4440_v15  ;;  %v1926_v15 = vsel %vm1290_vm7, %v1910_v48, %v4473_v26  ;;  %v2653_v61 = vld [vmem:[%s2877_s10 + $0xc0] sm:$0xff] }
 0x2d3   : > { %1159 = vrot.lane.b32.xlu0 %v6003_v62, %s2775_s5  ;;  %2495 = vmatpush3.msra.mxu0 %v2090_v16  ;;  %v2088_v62 = vld [vmem:[%s5572_s1 + $0x8] sm:$0xff]  ;;  %v1902_v49 = vsel %vm1256_vm5, %v1886_v52, %v4432_v25  ;;  %v1942_v40 = vsel %vm5679_vm8, %v1926_v15, %v4506_v14  ;;  %v6037_v15 = vld [vmem:[#allocation180_spill] sm:$0xff] }
 0x2d4   : > { %v4781_v3 = vpop.permute.xlu1 %1804  ;;  %2548 = vmatpush3.msra.mxu1 %v2090_v16  ;;  %2496 = vmatprep.subr.mxu0 %v2089_v7  ;;  %v1918_v63 = vsel %vm1273_vm6, %v1902_v49, %v4449_v28  ;;  %v2087_v28 = vld [vmem:[%s5572_s1] sm:$0xff]  ;;  %v1880_v49 = vsel %vm1239_vm4, %v5927_v4, %v4487_v37  ;;  %v6033_v37 = vld [vmem:[#allocation7_spill] sm:$0xff] }
 0x2d5   : > { %v4786_v11 = vpop.permute.xlu0 %1788  ;;  %2536 = vmatprep.subr.mxu1 %v2089_v7  ;;  %2497 = vmatpush3.msra.mxu0 %v2089_v7 }
 0x2d6   : > { %1207 = vrot.lane.b32.xlu1 %v4114_v57, %s2776_s24  ;;  %v6028_v57 = vld [vmem:[#allocation5_spill] sm:$0xff]  ;;  %2549 = vmatpush3.msra.mxu1 %v2089_v7 }
 0x2d7   : > { %1191 = vrot.lane.b32.xlu0 %v6027_v20, %s2776_s24  ;;  %v1879_v16 = vsel %vm1239_vm4, %v6028_v57, %v4423_v33  ;;  %v1934_v33 = vsel %vm1290_vm7, %v1918_v63, %v4471_v8  ;;  %2498 = vmatprep.subr.mxu0 %v2088_v62  ;;  %v1919_v8 = vsel %vm1273_vm6, %v1903_v47, %v4460_v24  ;;  %v6029_v20 = vld [vmem:[#allocation181_spill] sm:$0xff]  ;;  %v6030_v57 = vld [vmem:[#allocation19_spill] sm:$0xff]  ;;  %v6032_v47 = vld [vmem:[#allocation178_spill] sm:$0xff] }
 0x2d8   : > { %v4813_v53 = vpop.permute.xlu1 %1850  ;;  %v1895_v0 = vsel %vm1256_vm5, %v1879_v16, %v4442_v18  ;;  %v1950_v10 = vsel %vm5679_vm8, %v1934_v33, %v4504_v13  ;;  %2537 = vmatprep.subr.mxu1 %v2088_v62  ;;  %v2652_v18 = vld [vmem:[%s2877_s10 + $0x50] sm:$0xff]  ;;  %2499 = vmatpush3.msra.mxu0 %v2088_v62  ;;  %v1935_v14 = vsel %vm1290_vm7, %v1919_v8, %v4495_v19  ;;  %v6031_v16 = vld [vmem:[#allocation76_spill] sm:$0xff] }
 0x2d9   : > { %v4821_v25 = vpop.permute.xlu0 %1834  ;;  %v1966_v7 = vsel %vm5680_vm9, %v1950_v10, %v4544_v36  ;;  %v1911_v13 = vsel %vm1273_vm6, %v1895_v0, %v4462_v46  ;;  %2550 = vmatpush3.msra.mxu1 %v2088_v62  ;;  %2500 = vmatprep.subr.mxu0 %v2087_v28  ;;  %v1889_v63 = vsel %vm1239_vm4, %v6031_v16, %v6030_v57  ;;  %v6038_v8 = vld [vmem:[#allocation184_spill] sm:$0xff] }
 0x2da   : > { %1209 = vrot.lane.b32.xlu1 %v4104_v39, %s2776_s24  ;;  %v1958_v39 = vsel %vm5680_vm9, %v1942_v40, %v4546_v9  ;;  %v1982_v26 = vsel %vm1341_vm10, %v1966_v7, %v4580_v38  ;;  %2538 = vmatprep.subr.mxu1 %v2087_v28  ;;  %v1927_v46 = vsel %vm1290_vm7, %v1911_v13, %v4497_v29  ;;  %v6039_v7 = vld [vmem:[#allocation188_spill] sm:$0xff]  ;;  %v2654_v13 = vld [vmem:[%s2877_s10 + $0xc8] sm:$0xff] }
 0x2db   : > { %1193 = vrot.lane.b32.xlu0 %v2652_v18, %s2776_s24  ;;  %v1974_v36 = vsel %vm1341_vm10, %v1958_v39, %v4582_v44  ;;  %v1998_v52 = vsel %vm5677_vm11, %v1982_v26, %v4610_v43  ;;  %2501 = vmatpush3.msra.mxu0 %v2087_v28  ;;  %v1951_v9 = vsel %vm5679_vm8, %v1935_v14, %v4533_v56  ;;  %v6040_v39 = vld [vmem:[#allocation29_spill] sm:$0xff]  ;;  %v6041_v14 = vld [vmem:[#allocation183_spill] sm:$0xff] }
 0x2dc   : > { %v1523_v24 = vpop.permute.xlu1 %1522  ;;  %v1990_v38 = vsel %vm5677_vm11, %v1974_v36, %v4612_v31  ;;  %2551 = vmatpush3.msra.mxu1 %v2087_v28  ;;  %v1943_v44 = vsel %vm5679_vm8, %v1927_v46, %v4535_v41  ;;  %v1967_v19 = vsel %vm5680_vm9, %v1951_v9, %v4570_v2  ;;  %v1881_v4 = vsel %vm1239_vm4, %v6033_v37, %v6032_v47  ;;  %v6036_v28 = vld [vmem:[#allocation18_spill] sm:$0xff] }
 0x2dd   : > { %v1507_v35 = vpop.permute.xlu0 %1506  ;;  %v1959_v29 = vsel %vm5680_vm9, %v1943_v44, %v4572_v1  ;;  %v1983_v56 = vsel %vm1341_vm10, %v1967_v19, %v4602_v51  ;;  %v1905_v0 = vsel %vm1256_vm5, %v1889_v63, %v6036_v28  ;;  %v1897_v10 = vsel %vm1256_vm5, %v1881_v4, %v6037_v15  ;;  %v6044_v44 = vld [vmem:[#allocation186_spill] sm:$0xff]  ;;  %v6053_v15 = vld [vmem:[#allocation133_spill] sm:$0xff] }
 0x2de   : > { %2038 = vrot.lane.b32.xlu1 %v1998_v52, %s2777_s28  ;;  %v1975_v31 = vsel %vm1341_vm10, %v1959_v29, %v4604_v34  ;;  %v1999_v41 = vsel %vm5677_vm11, %v1983_v56, %v4647_v22  ;;  %v1921_v26 = vsel %vm1273_vm6, %v1905_v0, %v6040_v39  ;;  %v1913_v36 = vsel %vm1273_vm6, %v1897_v10, %v6041_v14  ;;  %v6042_v52 = vld [vmem:[#allocation189_spill] sm:$0xff]  ;;  %v6054_v14 = vld [vmem:[#allocation40_spill] sm:$0xff] }
 0x2df   : > { %2022 = vrot.lane.b32.xlu0 %v1990_v38, %s2777_s28  ;;  %v1991_v2 = vsel %vm5677_vm11, %v1975_v31, %v4649_v58  ;;  %v1888_v58 = vsel %vm1239_vm4, %v3493_v5, %v4482_v21  ;;  %v6043_v38 = vld [vmem:[#allocation55_spill] sm:$0xff]  ;;  %v1937_v19 = vsel %vm1290_vm7, %v1921_v26, %v6044_v44  ;;  %v2656_v0 = vld [vmem:[%s2877_s10 + $0xe0] sm:$0xff]  ;;  %v6058_v44 = vld [vmem:[#allocation14_spill] sm:$0xff] }
 0x2e0   : > { %v4870_v43 = vpop.permute.xlu1 %1664  ;;  %v6045_v31 = vld [vmem:[#allocation179_spill] sm:$0xff] }
 0x2e1   : > { %v4876_v62 = vpop.permute.xlu0 %1648 }
 0x2e2   : > { %2040 = vrot.lane.b32.xlu1 %v1999_v41, %s2777_s28  ;;  %v1892_v41 = vsel %vm1239_vm4, %v6045_v31, %v1523_v24  ;;  %v6060_v31 = vld [vmem:[#allocation196_spill] sm:$0xff] }
 0x2e3   : > { %2024 = vrot.lane.b32.xlu0 %v1991_v2, %s2777_s28 }
 0x2e4   : > { %v4882_v1 = vpop.permute.xlu1 %1710 }
 0x2e5   : > { %v4884_v51 = vpop.permute.xlu0 %1694 }
 0x2e6   : > { %1165 = vrot.lane.b32.xlu1 %v3342_v23, %s2775_s5  ;;  %v1904_v23 = vsel %vm1256_vm5, %v1888_v58, %v4524_v59  ;;  %v6034_v59 = vld [vmem:[#allocation182_spill] sm:$0xff] }
 0x2e7   : > { %1163 = vrot.lane.b32.xlu0 %v3347_v55, %s2775_s5  ;;  %v1896_v55 = vsel %vm1256_vm5, %v1880_v49, %v4527_v30  ;;  %v1920_v5 = vsel %vm1273_vm6, %v1904_v23, %v6029_v20  ;;  %v6048_v20 = vld [vmem:[#allocation193_spill] sm:$0xff] }
 0x2e8   : > { %v1853_v34 = vpop.permute.xlu1 %1852  ;;  %v1912_v48 = vsel %vm1273_vm6, %v1896_v55, %v6034_v59  ;;  %v6047_v55 = vld [vmem:[#allocation187_spill] sm:$0xff]  ;;  %v1953_v24 = vsel %vm5679_vm8, %v1937_v19, %v6048_v20 }
 0x2e9   : > { %v1837_v22 = vpop.permute.xlu0 %1836  ;;  %v1928_v40 = vsel %vm1290_vm7, %v1912_v48, %v6038_v8  ;;  %v1969_v57 = vsel %vm5680_vm9, %v1953_v24, %v4731_v32  ;;  %v6050_v48 = vld [vmem:[#allocation121_spill] sm:$0xff] }
 0x2ea   : > { %1211 = vrot.lane.b32.xlu1 %v2653_v61, %s2776_s24  ;;  %v1944_v46 = vsel %vm5679_vm8, %v1928_v40, %v6042_v52  ;;  %v6046_v61 = vld [vmem:[#allocation12_spill] sm:$0xff] }
 0x2eb   : > { %1195 = vrot.lane.b32.xlu0 %v4225_v54, %s2776_s24  ;;  %v6035_v54 = vld [vmem:[#allocation42_spill] sm:$0xff]  ;;  %v1960_v29 = vsel %vm5680_vm9, %v1944_v46, %v4688_v17  ;;  %v1884_v49 = vsel %vm1239_vm4, %v6046_v61, %v1507_v35  ;;  %v6056_v46 = vld [vmem:[#allocation185_spill] sm:$0xff] }
 0x2ec   : > { %v4906_v21 = vpop.permute.xlu1 %1524  ;;  %v1936_v33 = vsel %vm1290_vm7, %v1920_v5, %v6035_v54  ;;  %v1976_v58 = vsel %vm1341_vm10, %v1960_v29, %v4748_v42  ;;  %v6059_v29 = vld [vmem:[#allocation192_spill] sm:$0xff] }
 0x2ed   : > { %v4918_v30 = vpop.permute.xlu0 %1508  ;;  %v1952_v18 = vsel %vm5679_vm8, %v1936_v33, %v6039_v7  ;;  %v1992_v5 = vsel %vm5677_vm11, %v1976_v58, %v4821_v25  ;;  %v1985_v25 = vsel %vm1341_vm10, %v1969_v57, %v4781_v3  ;;  %v6051_v3 = vld [vmem:[#allocation122_spill] sm:$0xff]  ;;  %v6061_v58 = vld [vmem:[#allocation197_spill] sm:$0xff] }
 0x2ee   : > { %1213 = vrot.lane.b32.xlu1 %v2654_v13, %s2776_s24  ;;  %v1968_v9 = vsel %vm5680_vm9, %v1952_v18, %v4686_v60  ;;  %v2001_v37 = vsel %vm5677_vm11, %v1985_v25, %v1853_v34  ;;  %v2655_v34 = vld [vmem:[%s2877_s10 + $0xd8] sm:$0xff]  ;;  %v6063_v25 = vld [vmem:[#allocation145_spill] sm:$0xff] }
 0x2ef   : > { %1197 = vrot.lane.b32.xlu0 %v6043_v38, %s2776_s24  ;;  %v1984_v56 = vsel %vm1341_vm10, %v1968_v9, %v4746_v6  ;;  %v1929_v6 = vsel %vm1290_vm7, %v1913_v36, %v6047_v55  ;;  %v6055_v36 = vld [vmem:[#allocation146_spill] sm:$0xff] }
 0x2f0   : > { %v1571_v2 = vpop.permute.xlu1 %1570  ;;  %v2000_v60 = vsel %vm5677_vm11, %v1984_v56, %v4813_v53  ;;  %v6049_v53 = vld [vmem:[#allocation194_spill] sm:$0xff]  ;;  %v1890_v52 = vsel %vm1239_vm4, %v6055_v36, %v6054_v14 }
 0x2f1   : > { %v4955_v23 = vsel %vm1256_vm5, %v1892_v41, %v1571_v2  ;;  %v1555_v17 = vpop.permute.xlu0 %1554  ;;  %v1945_v35 = vsel %vm5679_vm8, %v1929_v6, %v6049_v53  ;;  %v6057_v9 = vld [vmem:[#allocation10_spill] sm:$0xff]  ;;  %v1906_v19 = vsel %vm1256_vm5, %v1890_v52, %v6058_v44 }
 0x2f2   : > { %v4964_v42 = vsel %vm1256_vm5, %v1884_v49, %v1555_v17  ;;  %2042 = vrot.lane.b32.xlu1 %v2000_v60, %s2777_s28  ;;  %v1961_v16 = vsel %vm5680_vm9, %v1945_v35, %v4736_v27  ;;  %v1882_v38 = vsel %vm1239_vm4, %v6057_v9, %v6056_v46  ;;  %v1922_v41 = vsel %vm1273_vm6, %v1906_v19, %v6060_v31 }
 0x2f3   : > { %2026 = vrot.lane.b32.xlu0 %v1992_v5, %s2777_s28  ;;  %v1977_v47 = vsel %vm1341_vm10, %v1961_v16, %v4786_v11  ;;  %v1898_v56 = vsel %vm1256_vm5, %v1882_v38, %v6059_v29  ;;  %v1938_v61 = vsel %vm1290_vm7, %v1922_v41, %v4770_v12  ;;  %v6062_v16 = vld [vmem:[#allocation190_spill] sm:$0xff]  ;;  %v6071_v41 = vld [vmem:[#allocation175_spill] sm:$0xff] }
 0x2f4   : > { %v4976_v63 = vpop.permute.xlu1 %1712  ;;  %v1993_v32 = vsel %vm5677_vm11, %v1977_v47, %v1837_v22  ;;  %v6052_v22 = vld [vmem:[#allocation161_spill] sm:$0xff]  ;;  %v1914_v60 = vsel %vm1273_vm6, %v1898_v56, %v6061_v58  ;;  %v1954_v55 = vsel %vm5679_vm8, %v1938_v61, %v4882_v1  ;;  %v1891_v47 = vsel %vm1239_vm4, %v6063_v25, %v6062_v16 }
 0x2f5   : > { %v1697_v4 = vpop.permute.xlu0 %1696  ;;  %v1930_v17 = vsel %vm1290_vm7, %v1914_v60, %v4772_v50  ;;  %v6073_v61 = vld [vmem:[#allocation177_spill] sm:$0xff] }
 0x2f6   : > { %2044 = vrot.lane.b32.xlu1 %v2001_v37, %s2777_s28  ;;  %v1946_v6 = vsel %vm5679_vm8, %v1930_v17, %v4884_v51  ;;  %v6064_v37 = vld [vmem:[#allocation191_spill] sm:$0xff] }
 0x2f7   : > { %2028 = vrot.lane.b32.xlu0 %v1993_v32, %s2777_s28  ;;  %v6065_v32 = vld [vmem:[#allocation9_spill] sm:$0xff] }
 0x2f8   : > { %v1759_v59 = vpop.permute.xlu1 %1758 }
 0x2f9   : > { %v1743_v27 = vpop.permute.xlu0 %1742  ;;  %v1970_v20 = vsel %vm5680_vm9, %v1954_v55, %v1759_v59  ;;  %v1883_v59 = vsel %vm1239_vm4, %v6065_v32, %v6064_v37 }
 0x2fa   : > { %1169 = vrot.lane.b32.xlu1 %v6050_v48, %s2775_s5  ;;  %v1962_v24 = vsel %vm5680_vm9, %v1946_v6, %v1743_v27  ;;  %v6066_v27 = vld [vmem:[#allocation13_spill] sm:$0xff] }
 0x2fb   : > { %1167 = vrot.lane.b32.xlu0 %v6051_v3, %s2775_s5  ;;  %v1907_v48 = vsel %vm1256_vm5, %v1891_v47, %v6066_v27  ;;  %v6067_v3 = vld [vmem:[#allocation195_spill] sm:$0xff] }
 0x2fc   : > { %v4988_v54 = vpop.permute.xlu1 %1572 }
 0x2fd   : > { %v4990_v11 = vpop.permute.xlu0 %1556 }
 0x2fe   : > { %1215 = vrot.lane.b32.xlu1 %v2655_v34, %s2776_s24  ;;  %v1899_v34 = vsel %vm1256_vm5, %v1883_v59, %v6067_v3 }
 0x2ff   : > { %1199 = vrot.lane.b32.xlu0 %v6052_v22, %s2776_s24  ;;  %v1923_v22 = vsel %vm1273_vm6, %v1907_v48, %v4757_v45 }
 0x300   : > { %v4996_v33 = vpop.permute.xlu1 %1618 }
 0x301   : > { %v4998_v28 = vpop.permute.xlu0 %1602  ;;  %v1924_v6 = vsel %vm1273_vm6, %v4955_v23, %v4996_v33  ;;  %v6075_v23 = vld [vmem:[#allocation11_spill] sm:$0xff] }
 0x302   : > { %1217 = vrot.lane.b32.xlu1 %v2656_v0, %s2776_s24  ;;  %v1885_v33 = vsel %vm1239_vm4, %v6075_v23, %v4918_v30 }
 0x303   : > { %1201 = vrot.lane.b32.xlu0 %v6053_v15, %s2776_s24  ;;  %v6068_v15 = vld [vmem:[#allocation198_spill] sm:$0xff]  ;;  %v1901_v16 = vsel %vm1256_vm5, %v1885_v33, %v4990_v11  ;;  %v6092_v33 = vld [vmem:[#allocation107_spill] sm:$0xff] }
 0x304   : > { %v1761_v10 = vpop.permute.xlu1 %1760 }
 0x305   : > { %v1745_v8 = vpop.permute.xlu0 %1744 }
 0x308   : > { %v1807_v40 = vpop.permute.xlu1 %1806 }
 0x309   : > { %v1791_v7 = vpop.permute.xlu0 %1790  ;;  %v1986_v5 = vsel %vm1341_vm10, %v1970_v20, %v1807_v40  ;;  %v1915_v40 = vsel %vm1273_vm6, %v1899_v34, %v6068_v15  ;;  %v2658_v15 = vld [vmem:[%s2877_s10 + $0x60] sm:$0xff] }
 0x30a   : > { %v1978_v35 = vsel %vm1341_vm10, %v1962_v24, %v1791_v7  ;;  %v1939_v7 = vsel %vm1290_vm7, %v1923_v22, %v4870_v43  ;;  %v1931_v36 = vsel %vm1290_vm7, %v1915_v40, %v4876_v62  ;;  %v1916_v24 = vsel %vm1273_vm6, %v4964_v42, %v4998_v28  ;;  %v6076_v40 = vld [vmem:[#allocation49_spill] sm:$0xff] }
 0x30b   : > { %v1955_v52 = vsel %vm5679_vm8, %v1939_v7, %v4976_v63  ;;  %v1947_v46 = vsel %vm5679_vm8, %v1931_v36, %v1697_v4  ;;  %v1248_v7 = vsel %vm1239_vm4, %v2658_v15, %v6076_v40  ;;  %v2659_v36 = vld [vmem:[%s2877_s10] sm:$0xff]  ;;  %v6104_v40 = vld [vmem:[#allocation142_spill] sm:$0xff] }
 0x30c   : > { %v5004_v18 = vpop.permute.xlu1 %1620  ;;  %v1971_v9 = vsel %vm5680_vm9, %v1955_v52, %v1761_v10  ;;  %v1963_v45 = vsel %vm5680_vm9, %v1947_v46, %v1745_v8  ;;  %v6069_v10 = vld [vmem:[#allocation141_spill] sm:$0xff]  ;;  %v6070_v8 = vld [vmem:[#allocation27_spill] sm:$0xff] }
 0x30d   : > { %v5006_v13 = vpop.permute.xlu0 %1604  ;;  %v6077_v52 = vld [vmem:[#allocation39_spill] sm:$0xff] }
 0x30e   : > { %v1917_v30 = vsel %vm1273_vm6, %v1901_v16, %v5006_v13  ;;  %v1240_v46 = vsel %vm1239_vm4, %v2659_v36, %v6077_v52  ;;  %v6094_v16 = vld [vmem:[#allocation20_spill] sm:$0xff]  ;;  %v6106_v52 = vld [vmem:[#allocation135_spill] sm:$0xff] }
 0x310   : > { %v5008_v39 = vpop.permute.xlu1 %1666 }
 0x311   : > { %v5010_v26 = vpop.permute.xlu0 %1650 }
 0x314   : > { %v1809_v2 = vpop.permute.xlu1 %1808 }
 0x315   : > { %v1793_v49 = vpop.permute.xlu0 %1792  ;;  %v1987_v38 = vsel %vm1341_vm10, %v1971_v9, %v1809_v2  ;;  %v6072_v2 = vld [vmem:[#allocation176_spill] sm:$0xff]  ;;  %v6078_v9 = vld [vmem:[#allocation65_spill] sm:$0xff] }
 0x316   : > { %v1979_v19 = vsel %vm1341_vm10, %v1963_v45, %v1793_v49  ;;  %v2657_v49 = vld [vmem:[%s2877_s10 + $0x98] sm:$0xff]  ;;  %v1265_v45 = vsel %vm1256_vm5, %v1248_v7, %v6078_v9 }
 0x317   : > { %v6107_v9 = vld [vmem:[#allocation140_spill] sm:$0xff] }
 0x318   : > { %v1855_v53 = vpop.permute.xlu1 %1854 }
 0x319   : > { %v2002_v12 = vsel %vm5677_vm11, %v1986_v5, %v1855_v53  ;;  %v1839_v57 = vpop.permute.xlu0 %1838  ;;  %v1940_v5 = vsel %vm1290_vm7, %v1924_v6, %v5008_v39  ;;  %v6087_v6 = vld [vmem:[#allocation72_spill] sm:$0xff] }
 0x31a   : > { %v1994_v50 = vsel %vm5677_vm11, %v1978_v35, %v1839_v57  ;;  %2046 = vrot.lane.b32.xlu1 %v2002_v12, %s2777_s28  ;;  %v6074_v35 = vld [vmem:[#allocation30_spill] sm:$0xff]  ;;  %v1932_v57 = vsel %vm1290_vm7, %v1916_v24, %v5010_v26 }
 0x31b   : > { %2030 = vrot.lane.b32.xlu0 %v1994_v50, %s2777_s28  ;;  %v1893_v12 = vsel %vm1239_vm4, %v6074_v35, %v4906_v21  ;;  %v6088_v24 = vld [vmem:[#allocation90_spill] sm:$0xff] }
 0x31c   : > { %v1669_v1 = vpop.permute.xlu1 %1668  ;;  %v1909_v42 = vsel %vm1256_vm5, %v1893_v12, %v4988_v54  ;;  %v6090_v12 = vld [vmem:[#allocation81_spill] sm:$0xff] }
 0x31d   : > { %v1653_v51 = vpop.permute.xlu0 %1652  ;;  %v1925_v21 = vsel %vm1273_vm6, %v1909_v42, %v5004_v18 }
 0x31e   : > { %v1941_v54 = vsel %vm1290_vm7, %v1925_v21, %v1669_v1  ;;  %v1933_v11 = vsel %vm1290_vm7, %v1917_v30, %v1653_v51 }
 0x320   : > { %v1715_v0 = vpop.permute.xlu1 %1714 }
 0x321   : > { %v1699_v14 = vpop.permute.xlu0 %1698  ;;  %v1956_v50 = vsel %vm5679_vm8, %v1940_v5, %v1715_v0 }
 0x322   : > { %v1948_v28 = vsel %vm5679_vm8, %v1932_v57, %v1699_v14 }
 0x324   : > { %v1857_v44 = vpop.permute.xlu1 %1856 }
 0x325   : > { %v2003_v43 = vsel %vm5677_vm11, %v1987_v38, %v1857_v44  ;;  %v1841_v29 = vpop.permute.xlu0 %1840  ;;  %v2660_v38 = vld [vmem:[%s2877_s10 + $0x8] sm:$0xff]  ;;  %v6079_v44 = vld [vmem:[#allocation43_spill] sm:$0xff] }
 0x326   : > { %v1995_v62 = vsel %vm5677_vm11, %v1979_v19, %v1841_v29  ;;  %2048 = vrot.lane.b32.xlu1 %v2003_v43, %s2777_s28  ;;  %v1241_v19 = vsel %vm1239_vm4, %v2660_v38, %v6079_v44  ;;  %v6080_v43 = vld [vmem:[#allocation57_spill] sm:$0xff]  ;;  %v6108_v38 = vld [vmem:[#allocation154_spill] sm:$0xff] }
 0x327   : > { %2032 = vrot.lane.b32.xlu0 %v1995_v62, %s2777_s28  ;;  %v1257_v29 = vsel %vm1256_vm5, %v1240_v46, %v6080_v43  ;;  %v6081_v62 = vld [vmem:[#allocation82_spill] sm:$0xff] }
 0x328   : > { %v1717_v63 = vpop.permute.xlu1 %1716 }
 0x329   : > { %v1701_v4 = vpop.permute.xlu0 %1700  ;;  %v1957_v18 = vsel %vm5679_vm8, %v1941_v54, %v1717_v63  ;;  %v1282_v63 = vsel %vm1273_vm6, %v1265_v45, %v6081_v62  ;;  %v6097_v54 = vld [vmem:[#allocation136_spill] sm:$0xff] }
 0x32a   : > { %1173 = vrot.lane.b32.xlu1 %v6069_v10, %s2775_s5  ;;  %v1949_v48 = vsel %vm5679_vm8, %v1933_v11, %v1701_v4  ;;  %v2661_v10 = vld [vmem:[%s2877_s10 + $0x68] sm:$0xff] }
 0x32b   : > { %1171 = vrot.lane.b32.xlu0 %v6070_v8, %s2775_s5  ;;  %v6082_v8 = vld [vmem:[#allocation48_spill] sm:$0xff] }
 0x32c   : > { %v1763_v56 = vpop.permute.xlu1 %1762 }
 0x32d   : > { %v1747_v31 = vpop.permute.xlu0 %1746  ;;  %v1972_v39 = vsel %vm5680_vm9, %v1956_v50, %v1763_v56  ;;  %v1249_v56 = vsel %vm1239_vm4, %v2661_v10, %v6082_v8  ;;  %v6091_v50 = vld [vmem:[#allocation89_spill] sm:$0xff]  ;;  %v6112_v8 = vld [vmem:[#allocation60_spill] sm:$0xff] }
 0x32e   : > { %1219 = vrot.lane.b32.xlu1 %v6071_v41, %s2776_s24  ;;  %v1964_v26 = vsel %vm5680_vm9, %v1948_v28, %v1747_v31  ;;  %v6083_v31 = vld [vmem:[#allocation56_spill] sm:$0xff]  ;;  %v6093_v28 = vld [vmem:[#allocation125_spill] sm:$0xff] }
 0x32f   : > { %1203 = vrot.lane.b32.xlu0 %v6072_v2, %s2776_s24  ;;  %v1258_v41 = vsel %vm1256_vm5, %v1241_v19, %v6083_v31  ;;  %v6084_v2 = vld [vmem:[#allocation73_spill] sm:$0xff]  ;;  %v6109_v19 = vld [vmem:[#allocation63_spill] sm:$0xff]  ;;  %v6113_v31 = vld [vmem:[#allocation102_spill] sm:$0xff] }
 0x330   : > { %v1765_v58 = vpop.permute.xlu1 %1764 }
 0x331   : > { %v1749_v60 = vpop.permute.xlu0 %1748  ;;  %v1973_v13 = vsel %vm5680_vm9, %v1957_v18, %v1765_v58  ;;  %v1274_v58 = vsel %vm1273_vm6, %v1257_v29, %v6084_v2  ;;  %v6099_v18 = vld [vmem:[#allocation38_spill] sm:$0xff]  ;;  %v6110_v29 = vld [vmem:[#allocation148_spill] sm:$0xff] }
 0x332   : > { %1221 = vrot.lane.b32.xlu1 %v6073_v61, %s2776_s24  ;;  %v1965_v1 = vsel %vm5680_vm9, %v1949_v48, %v1749_v60  ;;  %v6085_v60 = vld [vmem:[#allocation99_spill] sm:$0xff]  ;;  %v1291_v5 = vsel %vm1290_vm7, %v1274_v58, %v6088_v24  ;;  %v6100_v48 = vld [vmem:[#allocation130_spill] sm:$0xff] }
 0x333   : > { %1205 = vrot.lane.b32.xlu0 %v2657_v49, %s2776_s24  ;;  %v1299_v61 = vsel %vm1290_vm7, %v1282_v63, %v6085_v60  ;;  %v1308_v42 = vsel %vm5679_vm8, %v1291_v5, %v6092_v33  ;;  %v6111_v63 = vld [vmem:[#allocation153_spill] sm:$0xff]  ;;  %v6114_v58 = vld [vmem:[#allocation110_spill] sm:$0xff]  ;;  %v6118_v24 = vld [vmem:[#allocation71_spill] sm:$0xff]  ;;  %s2333_s24 = sadd.s32 %s2443_s21, %s2442_s4 }
 0x334   : > { %v1811_v17 = vpop.permute.xlu1 %1810  ;;  %s2444_s27 = sshll.u32 %s2333_s24, 7 }
 0x335   : > { %v1795_v55 = vpop.permute.xlu0 %1794  ;;  %v1988_v25 = vsel %vm1341_vm10, %v1972_v39, %v1811_v17  ;;  %v6086_v17 = vld [vmem:[#allocation64_spill] sm:$0xff]  ;;  %s5510_s15 = scalar_lea.hbm %s5574_s3, %s2444_s27 }
 0x336   : > { %v1980_v37 = vsel %vm1341_vm10, %v1964_v26, %v1795_v55  ;;  %v1266_v55 = vsel %vm1256_vm5, %v1249_v56, %v6086_v17  ;;  %v6095_v26 = vld [vmem:[#allocation106_spill] sm:$0xff] }
 0x337   : > { %v1283_v57 = vsel %vm1273_vm6, %v1266_v55, %v6090_v12  ;;  %v6121_v12 = vld [vmem:[#allocation62_spill] sm:$0xff] }
 0x338   : > { %v1813_v20 = vpop.permute.xlu1 %1812  ;;  %v1300_v21 = vsel %vm1290_vm7, %v1283_v57, %v6094_v16 }
 0x339   : > { %v1797_v53 = vpop.permute.xlu0 %1796  ;;  %v1989_v3 = vsel %vm1341_vm10, %v1973_v13, %v1813_v20  ;;  %v1275_v20 = vsel %vm1273_vm6, %v1258_v41, %v6087_v6  ;;  %v6117_v6 = vld [vmem:[#allocation21_spill] sm:$0xff] }
 0x33a   : > { %v1981_v51 = vsel %vm1341_vm10, %v1965_v1, %v1797_v53  ;;  %v6089_v53 = vld [vmem:[#allocation112_spill] sm:$0xff]  ;;  %v1292_v23 = vsel %vm1290_vm7, %v1275_v20, %v6091_v50  ;;  %v6101_v1 = vld [vmem:[#allocation149_spill] sm:$0xff] }
 0x33b   : > { %v1316_v35 = vsel %vm5679_vm8, %v1299_v61, %v6089_v53  ;;  %v6115_v61 = vld [vmem:[#allocation105_spill] sm:$0xff] }
 0x33c   : > { %v1859_v47 = vpop.permute.xlu1 %1858  ;;  %v1333_v39 = vsel %vm5680_vm9, %v1316_v35, %v6093_v28  ;;  %v6120_v53 = vld [vmem:[#allocation165_spill] sm:$0xff] }
 0x33d   : > { %v2004_v32 = vsel %vm5677_vm11, %v1988_v25, %v1859_v47  ;;  %v1843_v59 = vpop.permute.xlu0 %1842  ;;  %v1309_v25 = vsel %vm5679_vm8, %v1292_v23, %v6095_v26  ;;  %v6096_v47 = vld [vmem:[#allocation118_spill] sm:$0xff]  ;;  %v6122_v50 = vld [vmem:[#allocation93_spill] sm:$0xff] }
 0x33e   : > { %v1996_v27 = vsel %vm5677_vm11, %v1980_v37, %v1843_v59  ;;  %2050 = vrot.lane.b32.xlu1 %v2004_v32, %s2777_s28  ;;  %v1325_v30 = vsel %vm5680_vm9, %v1308_v42, %v6096_v47  ;;  %v1350_v37 = vsel %vm1341_vm10, %v1333_v39, %v6097_v54  ;;  %v6098_v59 = vld [vmem:[#allocation111_spill] sm:$0xff]  ;;  %v6123_v42 = vld [vmem:[#allocation44_spill] sm:$0xff]  ;;  %v6124_v39 = vld [vmem:[#allocation85_spill] sm:$0xff] }
 0x33f   : > { %2034 = vrot.lane.b32.xlu0 %v1996_v27, %s2777_s28  ;;  %v1317_v11 = vsel %vm5679_vm8, %v1300_v21, %v6098_v59  ;;  %v1326_v27 = vsel %vm5680_vm9, %v1309_v25, %v6099_v18  ;;  %v1342_v13 = vsel %vm1341_vm10, %v1325_v30, %v6100_v48  ;;  %v6125_v21 = vld [vmem:[#allocation171_spill] sm:$0xff]  ;;  %v6126_v30 = vld [vmem:[#allocation98_spill] sm:$0xff] }
 0x340   : > { %v1861_v34 = vpop.permute.xlu1 %1860  ;;  %v1359_v7 = vsel %vm5677_vm11, %v1342_v13, %v6104_v40  ;;  %v6130_v13 = vld [vmem:[#allocation164_spill] sm:$0xff] }
 0x341   : > { %v2005_v22 = vsel %vm5677_vm11, %v1989_v3, %v1861_v34  ;;  %v1845_v0 = vpop.permute.xlu0 %1844  ;;  %v1367_v3 = vsel %vm5677_vm11, %v1350_v37, %v6101_v1  ;;  %v1376_v44 = vsel %vm1375_vm12, %v1359_v7, %v6108_v38  ;;  %v6127_v37 = vld [vmem:[#allocation35_spill] sm:$0xff]  ;;  %v6134_v38 = vld [vmem:[#allocation37_spill] sm:$0xff] }
 0x342   : > { %v1997_v14 = vsel %vm5677_vm11, %v1981_v51, %v1845_v0  ;;  %2052 = vrot.lane.b32.xlu1 %v2005_v22, %s2777_s28  ;;  %v6102_v51 = vld [vmem:[#allocation124_spill] sm:$0xff]  ;;  %v6103_v0 = vld [vmem:[#allocation129_spill] sm:$0xff]  ;;  %v1393_v56 = vsel %vm5678_vm13, %v1376_v44, %v6112_v8 }
 0x343   : > { %2036 = vrot.lane.b32.xlu0 %v1997_v14, %s2777_s28  ;;  %v1334_v22 = vsel %vm5680_vm9, %v1317_v11, %v6102_v51  ;;  %v1343_v15 = vsel %vm1341_vm10, %v1326_v27, %v6103_v0  ;;  %v6105_v14 = vld [vmem:[#allocation22_spill] sm:$0xff]  ;;  %v1410_v60 = vsel %vm1409_vm14, %v1393_v56, %v6114_v58  ;;  %v6138_v56 = vld [vmem:[#allocation75_spill] sm:$0xff] }
 0x344   : > { %v5144_v4 = vpop.permute.xlu1 %1161  ;;  %v1384_v36 = vsel %vm1375_vm12, %v1367_v3, %v6105_v14  ;;  %v1351_v46 = vsel %vm1341_vm10, %v1334_v22, %v6106_v52  ;;  %v1360_v45 = vsel %vm5677_vm11, %v1343_v15, %v6107_v9  ;;  %v1427_v5 = vsel %vm6119_vm3, %v1410_v60, %v6118_v24  ;;  %v6128_v27 = vld [vmem:[#allocation70_spill] sm:$0xff]  ;;  %v6131_v3 = vld [vmem:[#allocation8_spill] sm:$0xff]  ;;  %v2664_v60 = vld [vmem:[%s2877_s10 + $0x80] sm:$0xff] }
 0x345   : > { %v1160_v49 = vpop.permute.xlu0 %1159  ;;  %v1401_v43 = vsel %vm5678_vm13, %v1384_v36, %v6109_v19  ;;  %v1368_v62 = vsel %vm5677_vm11, %v1351_v46, %v6110_v29  ;;  %v1377_v10 = vsel %vm1375_vm12, %v1360_v45, %v6111_v63  ;;  %vm2070_vm11 = vcmask 523264   ;;  %v6132_v22 = vld [vmem:[#allocation170_spill] sm:$0xff]  ;;  %v2662_v52 = vld [vmem:[%s2877_s10 + $0x78] sm:$0xff]  ;;  %v6133_v46 = vld [vmem:[#allocation51_spill] sm:$0xff] }
 0x346   : > { %v1418_v41 = vsel %vm1409_vm14, %v1401_v43, %v6113_v31  ;;  %v1385_v20 = vsel %vm1375_vm12, %v1368_v62, %v6117_v6  ;;  %v1444_v23 = vsel %vm1443_vm15, %v1427_v5, %v6122_v50  ;;  %v1394_v28 = vsel %vm5678_vm13, %v1377_v10, %v6123_v42  ;;  %v2663_v45 = vld [vmem:[%s2877_s10 + $0x18] sm:$0xff]  ;;  %v6135_v19 = vld [vmem:[#allocation67_spill] sm:$0xff]  ;;  %v2665_v5 = vld [vmem:[%s2877_s10 + $0x20] sm:$0xff] }
 0x347   : > { %v1435_v17 = vsel %vm6116_vm0, %v1418_v41, %v6115_v61  ;;  %v1402_v57 = vsel %vm5678_vm13, %v1385_v20, %v6121_v12  ;;  %vm2107_vm0 = vcmask 818176   ;;  %v1461_v26 = vsel %vm1460_vm1, %v1444_v23, %v6125_v21  ;;  %vm6129_vm13 = vmmov %vm6119_vm3  ;;  %v6136_v29 = vld [vmem:[#allocation59_spill] sm:$0xff]  ;;  %v6137_v63 = vld [vmem:[#allocation84_spill] sm:$0xff] }
 0x348   : > { %v1208_v32 = vpop.permute.xlu1 %1207  ;;  %v1452_v35 = vsel %vm1443_vm15, %v1435_v17, %v6120_v53  ;;  %v1419_v16 = vsel %vm1409_vm14, %v1402_v57, %v6124_v39  ;;  %v1411_v54 = vsel %vm1409_vm14, %v1394_v28, %v6126_v30  ;;  %v1250_v9 = vsel %vm1239_vm4, %v2662_v52, %v6133_v46  ;;  %v6139_v41 = vld [vmem:[#allocation101_spill] sm:$0xff]  ;;  %v6140_v61 = vld [vmem:[#allocation50_spill] sm:$0xff]  ;;  %v6163_v46 = vld [vmem:[#allocation156_spill] sm:$0xff] }
 0x349   : > { %v1192_v34 = vpop.permute.xlu0 %1191  ;;  %v1469_v33 = vsel %vm1460_vm1, %v1452_v35, %v1160_v49  ;;  %v1436_v59 = vsel %vm6119_vm3, %v1419_v16, %v6127_v37  ;;  %v1428_v48 = vsel %vm6129_vm13, %v1411_v54, %v6128_v27  ;;  %v1242_v44 = vsel %vm1239_vm4, %v2663_v45, %v6134_v38  ;;  %v6142_v20 = vld [vmem:[#allocation114_spill] sm:$0xff]  ;;  %v6143_v53 = vld [vmem:[#allocation41_spill] sm:$0xff]  ;;  %v6148_v16 = vld [vmem:[#allocation83_spill] sm:$0xff] }
 0x34a   : > { %v1486_v25 = vsel %vm1477_vm2, %v1469_v33, %v1208_v32  ;;  %v1478_v49 = vsel %vm1477_vm2, %v1461_v26, %v1192_v34  ;;  %v1453_v1 = vsel %vm1443_vm15, %v1436_v59, %v6130_v13  ;;  %v1445_v51 = vsel %vm1443_vm15, %v1428_v48, %v6131_v3  ;;  %v6144_v12 = vld [vmem:[#allocation66_spill] sm:$0xff]  ;;  %v6145_v50 = vld [vmem:[#allocation109_spill] sm:$0xff]  ;;  %v6146_v33 = vld [vmem:[#allocation127_spill] sm:$0xff] }
 0x34b   : > { %v1470_v34 = vsel %vm1460_vm1, %v1453_v1, %v5144_v4  ;;  %v1462_v0 = vsel %vm1460_vm1, %v1445_v51, %v6132_v22  ;;  %v1267_v43 = vsel %vm1256_vm5, %v1250_v9, %v6135_v19  ;;  %v1259_v62 = vsel %vm1256_vm5, %v1242_v44, %v6136_v29  ;;  %v6147_v28 = vld [vmem:[#allocation58_spill] sm:$0xff]  ;;  %v6149_v26 = vld [vmem:[#allocation120_spill] sm:$0xff]  ;;  %v6154_v48 = vld [vmem:[#allocation151_spill] sm:$0xff] }
 0x34c   : > { %v1210_v2 = vpop.permute.xlu1 %1209  ;;  %v1284_v10 = vsel %vm1273_vm6, %v1267_v43, %v6137_v63  ;;  %v1276_v31 = vsel %vm1273_vm6, %v1259_v62, %v6138_v56  ;;  %v1251_v17 = vsel %vm1239_vm4, %v2664_v60, %v6140_v61  ;;  %v1243_v35 = vsel %vm1239_vm4, %v2665_v5, %v6143_v53  ;;  %v6151_v37 = vld [vmem:[#allocation74_spill] sm:$0xff]  ;;  %v6157_v51 = vld [vmem:[#allocation113_spill] sm:$0xff]  ;;  %v6158_v22 = vld [vmem:[#allocation144_spill] sm:$0xff] }
 0x34d   : > { %v1194_v55 = vpop.permute.xlu0 %1193  ;;  %v1487_v15 = vsel %vm1477_vm2, %v1470_v34, %v1210_v2  ;;  %v1301_v2 = vsel %vm1290_vm7, %v1284_v10, %v6139_v41  ;;  %v1268_v57 = vsel %vm1256_vm5, %v1251_v17, %v6144_v12  ;;  %v1260_v39 = vsel %vm1256_vm5, %v1243_v35, %v6147_v28  ;;  %v6166_v38 = vld [vmem:[#allocation119_spill] sm:$0xff]  ;;  %v6167_v19 = vld [vmem:[#allocation137_spill] sm:$0xff]  ;;  %v6170_v63 = vld [vmem:[#allocation54_spill] sm:$0xff] }
 0x34e   : > { %v1479_v7 = vsel %vm1477_vm2, %v1462_v0, %v1194_v55  ;;  %v6141_v55 = vld [vmem:[#allocation92_spill] sm:$0xff]  ;;  %v1318_v24 = vsel %vm5679_vm8, %v1301_v2, %v6142_v20  ;;  %v1285_v21 = vsel %vm1273_vm6, %v1268_v57, %v6148_v16  ;;  %v1277_v59 = vsel %vm1273_vm6, %v1260_v39, %v6151_v37  ;;  %v6168_v29 = vld [vmem:[#allocation47_spill] sm:$0xff]  ;;  %v6172_v2 = vld [vmem:[#allocation150_spill] sm:$0xff] }
 0x34f   : > { %v1293_v6 = vsel %vm1290_vm7, %v1276_v31, %v6141_v55  ;;  %v1335_v42 = vsel %vm5680_vm9, %v1318_v24, %v6146_v33  ;;  %vm6155_vm13 = vcmask 261120   ;;  %v6171_v31 = vld [vmem:[#allocation131_spill] sm:$0xff]  ;;  %v6174_v61 = vld [vmem:[#allocation52_spill] sm:$0xff]  ;;  %v6175_v55 = vld [vmem:[#allocation117_spill] sm:$0xff] }
 0x350   : > { %v2039_v47 = vpop.permute.xlu1 %2038  ;;  %v1310_v23 = vsel %vm5679_vm8, %v1293_v6, %v6145_v50  ;;  %vm6159_vm3 = vmmov %vm6155_vm13  ;;  %v6177_v24 = vld [vmem:[#allocation143_spill] sm:$0xff]  ;;  %v6180_v12 = vld [vmem:[#allocation88_spill] sm:$0xff] }
 0x351   : > { %v2023_v11 = vpop.permute.xlu0 %2022  ;;  %v2079_v18 = vsel %vm2070_vm11, %v1486_v25, %v2039_v47  ;;  %v1327_v25 = vsel %vm5680_vm9, %v1310_v23, %v6149_v26  ;;  %v6150_v47 = vld [vmem:[#allocation138_spill] sm:$0xff]  ;;  %v6179_v53 = vld [vmem:[#allocation23_spill] sm:$0xff] }
 0x352   : > { %v2071_v32 = vsel %vm2070_vm11, %v1478_v49, %v2023_v11  ;;  %2514 = vmatprep.mubr.msk.f32.mxu1 %vm2107_vm0, %v2079_v18  ;;  %v1352_v30 = vsel %vm1341_vm10, %v1335_v42, %v6150_v47  ;;  %v6152_v49 = vld [vmem:[#allocation100_spill] sm:$0xff]  ;;  %v6182_v50 = vld [vmem:[#allocation167_spill] sm:$0xff]  ;;  %v6186_v16 = vld [vmem:[#allocation26_spill] sm:$0xff] }
 0x353   : > { %2502 = vmatprep.mubr.msk.f32.mxu0 %vm2107_vm0, %v2071_v32  ;;  %v1302_v11 = vsel %vm1290_vm7, %v1285_v21, %v6152_v49  ;;  %v6153_v18 = vld [vmem:[#allocation132_spill] sm:$0xff]  ;;  %v1369_v13 = vsel %vm6155_vm13, %v1352_v30, %v6154_v48  ;;  %v6156_v32 = vld [vmem:[#allocation91_spill] sm:$0xff]  ;;  %vm6165_vm13 = vcmask 326656   ;;  %v6189_v30 = vld [vmem:[#allocation34_spill] sm:$0xff] }
 0x354   : > { %v2041_v40 = vpop.permute.xlu1 %2040  ;;  %v1344_v27 = vsel %vm1341_vm10, %v1327_v25, %v6153_v18  ;;  %v1294_v3 = vsel %vm1290_vm7, %v1277_v59, %v6156_v32  ;;  %v1319_v34 = vsel %vm5679_vm8, %v1302_v11, %v6157_v51  ;;  %v6183_v33 = vld [vmem:[#allocation155_spill] sm:$0xff]  ;;  %v6187_v25 = vld [vmem:[#allocation77_spill] sm:$0xff] }
 0x355   : > { %v2080_v14 = vsel %vm2070_vm11, %v1487_v15, %v2041_v40  ;;  %v2025_v36 = vpop.permute.xlu0 %2024  ;;  %v1361_v0 = vsel %vm6159_vm3, %v1344_v27, %v6158_v22  ;;  %v6160_v15 = vld [vmem:[#allocation24_spill] sm:$0xff]  ;;  %vm6169_vm3 = vmmov %vm6165_vm13  ;;  %v6184_v28 = vld [vmem:[#allocation79_spill] sm:$0xff] }
 0x356   : > { %v2072_v4 = vsel %vm2070_vm11, %v1479_v7, %v2025_v36  ;;  %2515 = vmatmul.mubr.msk.f32.vlgmr.msra.gmra.mxu1 %vm2107_vm0, %v2080_v14  ;;  %v1386_v40 = vsel %vm1375_vm12, %v1369_v13, %v6160_v15  ;;  %v6161_v7 = vld [vmem:[#allocation108_spill] sm:$0xff]  ;;  %v6162_v36 = vld [vmem:[#allocation126_spill] sm:$0xff]  ;;  %v1378_v9 = vsel %vm1375_vm12, %v1361_v0, %v6163_v46  ;;  %v6190_v59 = vld [vmem:[#allocation173_spill] sm:$0xff] }
 0x357   : > { %2503 = vmatmul.mubr.msk.f32.vlgmr.msra.gmra.mxu0 %vm2107_vm0, %v2072_v4  ;;  %v1311_v14 = vsel %vm5679_vm8, %v1294_v3, %v6161_v7  ;;  %v1336_v52 = vsel %vm5680_vm9, %v1319_v34, %v6162_v36  ;;  %v6164_v4 = vld [vmem:[#allocation80_spill] sm:$0xff]  ;;  %v1395_v62 = vsel %vm6169_vm3, %v1378_v9, %v6168_v29  ;;  %vm6173_vm8 = vcmask 261120   ;;  %v6194_v34 = vld [vmem:[#allocation87_spill] sm:$0xff]  ;;  %v6195_v0 = vld [vmem:[#allocation166_spill] sm:$0xff] }
 0x358   : > { %v5270_v8 = vpop.permute.xlu1 %1165  ;;  %v1403_v45 = vsel %vm6165_vm13, %v1386_v40, %v6164_v4  ;;  %v1328_v44 = vsel %vm5680_vm9, %v1311_v14, %v6166_v38  ;;  %v1353_v43 = vsel %vm1341_vm10, %v1336_v52, %v6167_v19  ;;  %v1412_v17 = vsel %vm1409_vm14, %v1395_v62, %v6174_v61  ;;  %vm6178_vm9 = vmmov %vm6173_vm8  ;;  %v6191_v27 = vld [vmem:[#allocation32_spill] sm:$0xff]  ;;  %v6196_v40 = vld [vmem:[#allocation15_spill] sm:$0xff] }
 0x359   : > { %v1164_v58 = vpop.permute.xlu0 %1163  ;;  %v1420_v10 = vsel %vm1409_vm14, %v1403_v45, %v6170_v63  ;;  %v1345_v41 = vsel %vm1341_vm10, %v1328_v44, %v6171_v31  ;;  %v1370_v60 = vsel %vm6173_vm8, %v1353_v43, %v6172_v2  ;;  %vm6176_vm13 = vcmask 392192   ;;  %v6192_v13 = vld [vmem:[#allocation116_spill] sm:$0xff]  ;;  %v2666_v19 = vld [vmem:[%s2877_s10 + $0x90] sm:$0xff]  ;;  %v6198_v43 = vld [vmem:[#allocation53_spill] sm:$0xff] }
 0x35a   : > { %v1437_v6 = vsel %vm6176_vm13, %v1420_v10, %v6175_v55  ;;  %v1362_v5 = vsel %vm6178_vm9, %v1345_v41, %v6177_v24  ;;  %v1387_v35 = vsel %vm1375_vm12, %v1370_v60, %v6179_v53  ;;  %vm6181_vm3 = vmmov %vm6176_vm13  ;;  %vm6185_vm8 = vcmask 326656   ;;  %v6197_v14 = vld [vmem:[#allocation172_spill] sm:$0xff]  ;;  %v2667_v62 = vld [vmem:[%s2877_s10 + $0x30] sm:$0xff]  ;;  %s175_s10 = sand.u32 1, %s2736_s13  }
 0x35b   : > { %v1429_v57 = vsel %vm6181_vm3, %v1412_v17, %v6180_v12  ;;  %v1454_v23 = vsel %vm1443_vm15, %v1437_v6, %v6182_v50  ;;  %v1379_v42 = vsel %vm1375_vm12, %v1362_v5, %v6183_v33  ;;  %v1404_v39 = vsel %vm6185_vm8, %v1387_v35, %v6184_v28  ;;  %vm6188_vm9 = vmmov %vm6185_vm8  ;;  %v6199_v63 = vld [vmem:[#allocation45_spill] sm:$0xff]  ;;  %v6202_v60 = vld [vmem:[#allocation86_spill] sm:$0xff]  ;;  %s2419_s5 = sshll.u32 %s175_s10, 7  ;;  %s5519_s16 = scalar_lea.sflag [#allocation3], %s175_s10 }
 0x35c   : > { %v1212_v54 = vpop.permute.xlu1 %1211  ;;  %v1446_v21 = vsel %vm1443_vm15, %v1429_v57, %v6186_v16  ;;  %v1471_v26 = vsel %vm1460_vm1, %v1454_v23, %v1164_v58  ;;  %v1396_v47 = vsel %vm6188_vm9, %v1379_v42, %v6187_v25  ;;  %v1421_v37 = vsel %vm1409_vm14, %v1404_v39, %v6189_v30  ;;  %vm6193_vm13 = vmmov %vm6181_vm3  ;;  %v6201_v41 = vld [vmem:[#allocation61_spill] sm:$0xff]  ;;  %v6203_v17 = vld [vmem:[#allocation78_spill] sm:$0xff]  ;;  %s5489_s11 = scalar_lea.vmem [#allocation2], %s2419_s5  ;;  %s2778_s5 = smov [#allocation2]  }
 0x35d   : > { %v1196_v1 = vpop.permute.xlu0 %1195  ;;  %v1463_v49 = vsel %vm1460_vm1, %v1446_v21, %v6190_v59  ;;  %v1488_v11 = vsel %vm1477_vm2, %v1471_v26, %v1212_v54  ;;  %v1413_v48 = vsel %vm1409_vm14, %v1396_v47, %v6191_v27  ;;  %v1438_v32 = vsel %vm6193_vm13, %v1421_v37, %v6192_v13  ;;  %v6204_v6 = vld [vmem:[#allocation103_spill] sm:$0xff]  ;;  %v6205_v24 = vld [vmem:[#allocation96_spill] sm:$0xff]  ;;  %v6215_v26 = vld [vmem:[#allocation134_spill] sm:$0xff]  ;;  %s2336_s6 = sshll.u32 %s5489_s11, 4  ;;  %s2672_s8 = sshll.u32 %s2778_s5, 4  ;;  %s5513_s6 = int_to_ptr.vmem [resolvable:$true] %s2336_s6  ;;  %s2673_s8 = int_to_ptr.vmem [resolvable:$false] %s2672_s8 }
 0x35e   : > { %v1480_v58 = vsel %vm1477_vm2, %v1463_v49, %v1196_v1  ;;  %v1430_v22 = vsel %vm6181_vm3, %v1413_v48, %v6194_v34  ;;  %v1455_v15 = vsel %vm1443_vm15, %v1438_v32, %v6195_v0  ;;  %v1252_v29 = vsel %vm1239_vm4, %v2666_v19, %v6198_v43  ;;  %v6206_v53 = vld [vmem:[#allocation115_spill] sm:$0xff]  ;;  %v6210_v23 = vld [vmem:[#allocation128_spill] sm:$0xff]  ;;  %v6222_v48 = vld [vmem:[#allocation97_spill] sm:$0xff]  ;;  %s2668_s28 = scalar_lea.vmem %s5513_s6, 2048  ;;  %s2674_s9 = scalar_lea.vmem %s2673_s8, 4096 }
 0x35f   : > { %v1447_v7 = vsel %vm1443_vm15, %v1430_v22, %v6196_v40  ;;  %v1472_v1 = vsel %vm1460_vm1, %v1455_v15, %v5270_v8  ;;  %v1244_v10 = vsel %vm1239_vm4, %v2667_v62, %v6199_v63  ;;  %vm6207_vm4 = vcmask 162816   ;;  %v6208_v57 = vld [vmem:[#allocation31_spill] sm:$0xff]  ;;  %v6216_v47 = vld [vmem:[#allocation152_spill] sm:$0xff]  ;;  %v6224_v32 = vld [vmem:[#allocation94_spill] sm:$0xff]  ;;  %p2669_p13 = scmp.ne.s32.totalorder %s5513_s6, %s2668_s28  ;;  %p2675_p2 = scmp.lt.s32.totalorder %s5513_s6, %s2673_s8 }
 0x360   : > { %v1214_v56 = vpop.permute.xlu1 %1213  ;;  %v1464_v36 = vsel %vm1460_vm1, %v1447_v7, %v6197_v14  ;;  %v1261_v2 = vsel %vm1256_vm5, %v1244_v10, %v6201_v41  ;;  %vm6209_vm8 = vmmov %vm6207_vm4  ;;  %v6212_v28 = vld [vmem:[#allocation123_spill] sm:$0xff]  ;;  %vm6223_vm13 = vcmask 326656   ;;  %v6227_v22 = vld [vmem:[#allocation68_spill] sm:$0xff]  ;;  %p2676_p4 = scmp.lt.s32.totalorder %s2674_s9, %s2668_s28 }
 0x361   : > { %v1198_v20 = vpop.permute.xlu0 %1197  ;;  %v1489_v52 = vsel %vm1477_vm2, %v1472_v1, %v1214_v56  ;;  %v6200_v56 = vld [vmem:[#allocation69_spill] sm:$0xff]  ;;  %v1278_v55 = vsel %vm1273_vm6, %v1261_v2, %v6203_v17  ;;  %v6214_v16 = vld [vmem:[#allocation139_spill] sm:$0xff]  ;;  %vm6225_vm3 = vmmov %vm6223_vm13  ;;  %p2670_p0 = pnand %p2669_p13, %p2851_p3 }
 0x362   : > { %v1481_v9 = vsel %vm1477_vm2, %v1464_v36, %v1198_v20  ;;  %v1269_v31 = vsel %vm1256_vm5, %v1252_v29, %v6200_v56  ;;  %v1295_v5 = vsel %vm1290_vm7, %v1278_v55, %v6205_v24  ;;  %vm6211_vm5 = vcmask 195584   ;;  %v6218_v37 = vld [vmem:[#allocation147_spill] sm:$0xff]  ;;  %v6228_v15 = vld [vmem:[#allocation36_spill] sm:$0xff]  ;;  %v6232_v14 = vld [vmem:[#allocation17_spill] sm:$0xff]  ;;  %p2677_p5 = por %p2676_p4, %p2675_p2 }
 0x363   : > { %v1286_v61 = vsel %vm1273_vm6, %v1269_v31, %v6202_v60  ;;  %v1312_v50 = vsel %vm6209_vm8, %v1295_v5, %v6208_v57  ;;  %vm6213_vm9 = vmmov %vm6211_vm5  ;;  %vm6217_vm6 = vcmask 261120   ;;  %v6220_v49 = vld [vmem:[#allocation159_spill] sm:$0xff]  ;;  %v6230_v7 = vld [vmem:[#allocation104_spill] sm:$0xff]  ;;  %p2671_p1 = pneg %p2670_p0 }
 0x364   : > { %v2043_v18 = vpop.permute.xlu1 %2042  ;;  %v1303_v20 = vsel %vm1290_vm7, %v1286_v61, %v6204_v6  ;;  %v1329_v39 = vsel %vm6213_vm9, %v1312_v50, %v6212_v28  ;;  %vm6219_vm7 = vmmov %vm6217_vm6  ;;  %v6235_v10 = vld [vmem:[#allocation157_spill] sm:$0xff]  ;;  %v6236_v56 = vld [vmem:[#allocation95_spill] sm:$0xff] }
 0x365   : > { %v2081_v3 = vsel %vm2070_vm11, %v1488_v11, %v2043_v18  ;;  %v2027_v51 = vpop.permute.xlu0 %2026  ;;  %v1320_v35 = vsel %vm6207_vm4, %v1303_v20, %v6206_v53  ;;  %v1346_v25 = vsel %vm1341_vm10, %v1329_v39, %v6215_v26  ;;  %v6221_v18 = vld [vmem:[#allocation158_spill] sm:$0xff]  ;;  %v6237_v31 = vld [vmem:[#allocation25_spill] sm:$0xff]  ;;  %p2678_p6 = pnand %p2677_p5, %p2671_p1 }
 0x366   : > { %v2073_v54 = vsel %vm2070_vm11, %v1480_v58, %v2027_v51  ;;  %2517 = vmatprep.mubr.msk.f32.mxu1 %vm2107_vm0, %v2081_v3  ;;  %v1337_v33 = vsel %vm6211_vm5, %v1320_v35, %v6210_v23  ;;  %v1363_v59 = vsel %vm6219_vm7, %v1346_v25, %v6218_v37  ;;  %v6226_v3 = vld [vmem:[#allocation33_spill] sm:$0xff]  ;;  %v1466_v41 = vsel %vm1460_vm1, %v6237_v31, %v6236_v56  ;;  %v6239_v50 = vld [vmem:[#allocation174_spill] sm:$0xff]  ;;  %v6240_v23 = vld [vmem:[#allocation163_spill] sm:$0xff] }
 0x367   : > { %2505 = vmatprep.mubr.msk.f32.mxu0 %vm2107_vm0, %v2073_v54  ;;  %v1354_v21 = vsel %vm1341_vm10, %v1337_v33, %v6214_v16  ;;  %v1380_v27 = vsel %vm1375_vm12, %v1363_v59, %v6221_v18  ;;  %vm6229_vm10 = vcmask 392192   ;;  %v1467_v33 = vsel %vm1460_vm1, %v6240_v23, %v6239_v50  ;;  %v6241_v25 = vld [vmem:[#allocation168_spill] sm:$0xff]  ;;  %v6243_v37 = vld [vmem:[#allocation162_spill] sm:$0xff] }
 0x368   : > { %v2045_v46 = vpop.permute.xlu1 %2044  ;;  %v1371_v30 = vsel %vm6217_vm6, %v1354_v21, %v6216_v47  ;;  %v1397_v58 = vsel %vm6225_vm3, %v1380_v27, %v6224_v32  ;;  %vm6231_vm4 = vmmov %vm6229_vm10  ;;  %v2423_v32 = vld [vmem:[%s5573_s2] ss:$0 sm:$0xff] }
 0x369   : > { %v2082_v4 = vsel %vm2070_vm11, %v1489_v52, %v2045_v46  ;;  %v2029_v45 = vpop.permute.xlu0 %2028  ;;  %v1388_v11 = vsel %vm1375_vm12, %v1371_v30, %v6220_v49  ;;  %v1414_v0 = vsel %vm1409_vm14, %v1397_v58, %v6227_v22  ;;  %v6233_v52 = vld [vmem:[#allocation160_spill] sm:$0xff] }
 0x36a   : > { %v2074_v38 = vsel %vm2070_vm11, %v1481_v9, %v2029_v45  ;;  %2518 = vmatmul.mubr.msk.f32.gmra.mxu1 %vm2107_vm0, %v2082_v4  ;;  %v1405_v13 = vsel %vm6223_vm13, %v1388_v11, %v6222_v48  ;;  %v1431_v1 = vsel %vm6231_vm4, %v1414_v0, %v6230_v7  ;;  %v6234_v4 = vld [vmem:[#allocation16_spill] sm:$0xff] }
 0x36b   : > { %2506 = vmatmul.mubr.msk.f32.gmra.mxu0 %vm2107_vm0, %v2074_v38  ;;  %v1422_v51 = vsel %vm1409_vm14, %v1405_v13, %v6226_v3  ;;  %v1448_v46 = vsel %vm1443_vm15, %v1431_v1, %v6233_v52  ;;  %v6242_v30 = vld [vmem:[#allocation28_spill] sm:$0xff] }
 0x36c   : > { %v1170_v8 = vpop.permute.xlu1 %1169  ;;  %v1439_v54 = vsel %vm6229_vm10, %v1422_v51, %v6228_v15  ;;  %v1465_v45 = vsel %vm1460_vm1, %v1448_v46, %v6234_v4  ;;  %v1468_v59 = vsel %vm1460_vm1, %v6243_v37, %v6242_v30 }
 0x36d   : > { %v1168_v44 = vpop.permute.xlu0 %1167  ;;  %v1456_v36 = vsel %vm1443_vm15, %v1439_v54, %v6232_v14 }
 0x36e   : > { %v1473_v9 = vsel %vm1460_vm1, %v1456_v36, %v1168_v44  ;;  %v1474_v44 = vsel %vm1460_vm1, %v6235_v10, %v1170_v8 }
 0x370   : > { %v1216_v12 = vpop.permute.xlu1 %1215 }
 0x371   : > { %v1200_v42 = vpop.permute.xlu0 %1199  ;;  %v1490_v38 = vsel %vm1477_vm2, %v1473_v9, %v1216_v12  ;;  %v6238_v12 = vld [vmem:[#allocation169_spill] sm:$0xff] }
 0x372   : > { %v1482_v43 = vsel %vm1477_vm2, %v1465_v45, %v1200_v42 }
 0x374   : > { %v1218_v34 = vpop.permute.xlu1 %1217 }
 0x375   : > { %v1202_v40 = vpop.permute.xlu0 %1201  ;;  %v1491_v2 = vsel %vm1477_vm2, %v1474_v44, %v1218_v34 }
 0x376   : > { %v1483_v61 = vsel %vm1477_vm2, %v1466_v41, %v1202_v40 }
 0x38c   : > { %v2047_v19 = vpop.permute.xlu1 %2046 }
 0x38d   : > { %v2083_v29 = vsel %vm2070_vm11, %v1490_v38, %v2047_v19  ;;  %v2031_v62 = vpop.permute.xlu0 %2030 }
 0x38e   : > { %v2075_v63 = vsel %vm2070_vm11, %v1482_v43, %v2031_v62  ;;  %2520 = vmatprep.mubr.msk.f32.mxu1 %vm2107_vm0, %v2083_v29 }
 0x38f   : > { %2508 = vmatprep.mubr.msk.f32.mxu0 %vm2107_vm0, %v2075_v63 }
 0x398   : > { %v2049_v60 = vpop.permute.xlu1 %2048 }
 0x399   : > { %v2084_v17 = vsel %vm2070_vm11, %v1491_v2, %v2049_v60  ;;  %v2033_v55 = vpop.permute.xlu0 %2032 }
 0x39a   : > { %v2076_v6 = vsel %vm2070_vm11, %v1483_v61, %v2033_v55  ;;  %2521 = vmatmul.mubr.msk.f32.gmra.mxu1 %vm2107_vm0, %v2084_v17 }
 0x39b   : > { %2509 = vmatmul.mubr.msk.f32.gmra.mxu0 %vm2107_vm0, %v2076_v6 }
 0x39c   : > { %v1174_v20 = vpop.permute.xlu1 %1173 }
 0x39d   : > { %v1172_v8 = vpop.permute.xlu0 %1171  ;;  %v1476_v47 = vsel %vm1460_vm1, %v6241_v25, %v1174_v20 }
 0x39e   : > { %v1475_v57 = vsel %vm1460_vm1, %v6238_v12, %v1172_v8 }
 0x3a0   : > { %v1220_v24 = vpop.permute.xlu1 %1219 }
 0x3a1   : > { %v1204_v5 = vpop.permute.xlu0 %1203  ;;  %v1492_v42 = vsel %vm1477_vm2, %v1475_v57, %v1220_v24 }
 0x3a2   : > { %v1484_v39 = vsel %vm1477_vm2, %v1467_v33, %v1204_v5 }
 0x3a4   : > { %v1222_v53 = vpop.permute.xlu1 %1221 }
 0x3a5   : > { %v1206_v35 = vpop.permute.xlu0 %1205  ;;  %v1493_v49 = vsel %vm1477_vm2, %v1476_v47, %v1222_v53 }
 0x3a6   : > { %v1485_v18 = vsel %vm1477_vm2, %v1468_v59, %v1206_v35 }
 0x3b0   : > { %v2051_v28 = vpop.permute.xlu1 %2050 }
 0x3b1   : > { %v2085_v16 = vsel %vm2070_vm11, %v1492_v42, %v2051_v28  ;;  %v2035_v21 = vpop.permute.xlu0 %2034 }
 0x3b2   : > { %v2077_v26 = vsel %vm2070_vm11, %v1484_v39, %v2035_v21  ;;  %2523 = vmatprep.mubr.msk.f32.mxu1 %vm2107_vm0, %v2085_v16 }
 0x3b3   : > { %2511 = vmatprep.mubr.msk.f32.mxu0 %vm2107_vm0, %v2077_v26 }
 0x3b4   : > { %v2053_v11 = vpop.permute.xlu1 %2052 }
 0x3b5   : > { %v2086_v27 = vsel %vm2070_vm11, %v1493_v49, %v2053_v11  ;;  %v2037_v48 = vpop.permute.xlu0 %2036 }
 0x3b6   : > { %v2078_v13 = vsel %vm2070_vm11, %v1485_v18, %v2037_v48  ;;  %2524 = vmatmul.mubr.msk.f32.gmra.mxu1 %vm2107_vm0, %v2086_v27 }
 0x3b7   : > { %2512 = vmatmul.mubr.msk.f32.gmra.mxu0 %vm2107_vm0, %v2078_v13 }
 0x416   : > { %v2516_v58 = vpop.f32.mrf.mxu1 }
 0x417   : > { %v2504_v3 = vpop.f32.mrf.mxu0  ;;  %v2271_v51 = vadd.f32 %v2516_v58, %v2423_v32 }
 0x418   : > { %v2231_v34 = vadd.f32 %v2504_v3, %v2423_v32  ;;  %v2265_v22 = vpop.f32.mrf.mxu1 }
 0x419   : > { %2313 = vst [vmem:[%s5489_s11 + $0x48] sm:$0xff] %v2271_v51  ;;  %v2225_v0 = vpop.f32.mrf.mxu0  ;;  %v2266_v15 = vadd.f32 %v2423_v32, %v2265_v22 }
 0x41a   : > { %2305 = vst [vmem:[%s5489_s11 + $0x8] sm:$0xff] %v2231_v34  ;;  %v2226_v54 = vadd.f32 %v2423_v32, %v2225_v0 }
 0x41b   : > { %2312 = vst [vmem:[%s5489_s11 + $0x40] sm:$0xff] %v2266_v15 }
 0x41c   : > { %2304 = vst [vmem:[%s5489_s11] sm:$0xff] %v2226_v54 }
 0x42a   : > { %v2519_v40 = vpop.f32.mrf.mxu1 }
 0x42b   : > { %v2507_v7 = vpop.f32.mrf.mxu0  ;;  %v2281_v1 = vadd.f32 %v2519_v40, %v2423_v32 }
 0x42c   : > { %v2241_v14 = vadd.f32 %v2507_v7, %v2423_v32  ;;  %v2275_v36 = vpop.f32.mrf.mxu1 }
 0x42d   : > { %2315 = vst [vmem:[%s5489_s11 + $0x58] sm:$0xff] %v2281_v1  ;;  %v2235_v52 = vpop.f32.mrf.mxu0  ;;  %v2276_v46 = vadd.f32 %v2423_v32, %v2275_v36 }
 0x42e   : > { %2307 = vst [vmem:[%s5489_s11 + $0x18] sm:$0xff] %v2241_v14  ;;  %v2236_v9 = vadd.f32 %v2423_v32, %v2235_v52 }
 0x42f   : > { %2314 = vst [vmem:[%s5489_s11 + $0x50] sm:$0xff] %v2276_v46 }
 0x430   : > { %2306 = vst [vmem:[%s5489_s11 + $0x10] sm:$0xff] %v2236_v9 }
 0x45a   : > { %v2522_v4 = vpop.f32.mrf.mxu1 }
 0x45b   : > { %v2510_v45 = vpop.f32.mrf.mxu0  ;;  %v2291_v38 = vadd.f32 %v2522_v4, %v2423_v32 }
 0x45c   : > { %v2251_v19 = vadd.f32 %v2510_v45, %v2423_v32  ;;  %v2285_v43 = vpop.f32.mrf.mxu1 }
 0x45d   : > { %2317 = vst [vmem:[%s5489_s11 + $0x68] sm:$0xff] %v2291_v38  ;;  %v2245_v29 = vpop.f32.mrf.mxu0  ;;  %v2286_v62 = vadd.f32 %v2423_v32, %v2285_v43 }
 0x45e   : > { %2309 = vst [vmem:[%s5489_s11 + $0x28] sm:$0xff] %v2251_v19  ;;  %v2246_v63 = vadd.f32 %v2423_v32, %v2245_v29 }
 0x45f   : > { %2316 = vst [vmem:[%s5489_s11 + $0x60] sm:$0xff] %v2286_v62 }
 0x460   : > { %2308 = vst [vmem:[%s5489_s11 + $0x20] sm:$0xff] %v2246_v63 }
 0x476   : > { %v2525_v10 = vpop.f32.mrf.mxu1 }
 0x477   : > { %v2513_v44 = vpop.f32.mrf.mxu0  ;;  %v2301_v56 = vadd.f32 %v2525_v10, %v2423_v32 }
 0x478   : > { %v2261_v31 = vadd.f32 %v2513_v44, %v2423_v32  ;;  %v2295_v41 = vpop.f32.mrf.mxu1 }
 0x479   : > { %2319 = vst [vmem:[%s5489_s11 + $0x78] sm:$0xff] %v2301_v56  ;;  %v2255_v2 = vpop.f32.mrf.mxu0  ;;  %v2296_v60 = vadd.f32 %v2423_v32, %v2295_v41 }
 0x47a   : > { %2311 = vst [vmem:[%s5489_s11 + $0x38] sm:$0xff] %v2261_v31  ;;  %v2256_v61 = vadd.f32 %v2423_v32, %v2255_v2 }
 0x47b   : > { %2318 = vst [vmem:[%s5489_s11 + $0x70] sm:$0xff] %v2296_v60 }
 0x47c   : > { %2310 = vst [vmem:[%s5489_s11 + $0x30] sm:$0xff] %v2256_v61 }
 0x47d   : > { %2681 = shalt.err (!%p2678_p6)
}
 0x47e   : > { %s2682_s10 = scalar_lea.hbm %s5510_s15, 2048  ;;  %s2686_s21 = scalar_lea.hbm %s5574_s3, 8192 }
 0x47f   : > { %p2683_p7 = scmp.ne.s32.totalorder %s5510_s15, %s2682_s10  ;;  %p2687_p11 = scmp.lt.s32.totalorder %s5510_s15, %s5574_s3 }
 0x480   : > { %p2688_p12 = scmp.lt.s32.totalorder %s2686_s21, %s2682_s10 }
 0x481   : > { %p2684_p9 = pnand %p2683_p7, %p2851_p3 }
 0x482   : > { %p2689_p13 = por %p2688_p12, %p2687_p11 }
 0x483   : > { %p2685_p10 = pneg %p2684_p9 }
 0x485   : > { %p2690_p0 = pnand %p2689_p13, %p2685_p10 }
 0x487   : > { %2693 = shalt.err (!%p2690_p0)
}
 0x488   : > { %s2779_s29 = smov 128  }
 0x489   : > { %2553 = dma.vmem_to_hbm [thread:$0]  (%p2851_p3), %s5513_s6, 2048, %s5510_s15, %s5519_s16, %s2779_s29, %s2779_s29, %s2763_s20  }
 0x48a PF: > { %p2559_p1 = scmp.ge.s32.totalorder %s2760_s19, 2  ;;  %s2351_s7 = sand.u32 1, %s2732_s12  }
 0x48b   : > { %s2352_s28 = scalar_lea.sflag [#allocation3], %s2351_s7 }
 0x48c   : > { %p2556_p2 = pnand %p2559_p1, %p2860_p8 }
 0x48e   : > { %p2557_p4 = pneg %p2556_p2 }
 0x490   : > { %2727 = dma.done.wait (%p2557_p4), %s2352_s28, 2048  }
 0x491   : > { %2729 = vsyncadd (%p2557_p4), %s2352_s28, 4294965248  ;;  %s16_s19 = sadd.s32 1, %s2760_s19   ;;  %s6244_s12 = smov %s2736_s13 }
 0x492   : > { %p13_p5 = scmp.ge.s32.totalorder %s16_s19, 6   ;;  %s6245_s13 = smov %s2740_s14 }
 0x493   : > { %s6246_s14 = smov %s2869_s30  ;;  %s6247_s15 = smov %s2752_s17 }
 0x494   : > { %s6248_s16 = smov %s2756_s18  ;;  %s6249_s17 = smov %s6252_s22 }
 0x495   : > { %s6250_s18 = smov %s6256_s23  ;;  %15 = sbr.rel (!%p13_p5) target bundleno = 5 (0x5), region = 68 }
 0x49a   :  { %2357 = vsyncpa [#allocation3], 1 }
 0x49b   :  { %2359 = vsyncpa [#allocation3 + $0x1], 1 }

</bundles_post_ra>
